<compile_context>
chip_gen: v7x
topology: tpu7x:2x2x1
jax: 0.10.0
libtpu: 0.0.40
codegen_flags: <defaults>
</compile_context>

<pallas_src>
import functools

import jax
import jax.numpy as jnp
from jax.experimental import pallas as pl
from jax.experimental.pallas import tpu as pltpu


# ----------------------------------------------------------------------------
# Kernel: one (C, TT, TILE_HW) output block per (batch, frame-tile, hw-tile).
# ----------------------------------------------------------------------------
def _rope_kernel(ft_ref, fy_ref, fx_ref, frame_ref, hpos_ref, wpos_ref, o_ref,
                 *, DT, DY, DX, TT, TILE_HW):
    Dtot = DT + DY + DX

    # Hoisted dense (TT, TILE_HW) position grids (broadcast_in_dim is not
    # CSE'd by JAX, so each broadcast is done exactly once per block).
    gt = jnp.broadcast_to(frame_ref[...], (TT, TILE_HW))   # frame idx (varies on sublanes)
    gy = jnp.broadcast_to(hpos_ref[...], (TT, TILE_HW))    # h position (varies on lanes)
    gx = jnp.broadcast_to(wpos_ref[...], (TT, TILE_HW))    # w position (varies on lanes)

    def emit(pos, freq_ref, half_dim, chan_base):
        # One channel *pair* per step: channels 2k and 2k+1 share the angle
        # (repeat_interleave(2)), so cos/sin are computed once and stored
        # twice.  Intermediates stay a few vregs wide -> no VMEM temporaries.
        for k in range(half_dim):
            ang = freq_ref[k] * pos                 # SMEM scalar x vreg multiply
            c = jnp.cos(ang)
            s = jnp.sin(ang)
            o_ref[chan_base + 2 * k] = c
            o_ref[chan_base + 2 * k + 1] = c
            o_ref[Dtot + chan_base + 2 * k] = s
            o_ref[Dtot + chan_base + 2 * k + 1] = s

    emit(gt, ft_ref, DT // 2, 0)
    emit(gy, fy_ref, DY // 2, DT)
    emit(gx, fx_ref, DX // 2, DT + DY)


# ----------------------------------------------------------------------------
# Wrapper
# ----------------------------------------------------------------------------
def _inv_freq_half(dim, theta):
    """1 / theta**(arange(0, dim, 2)/dim) -> shape (dim//2,), NOT interleaved."""
    k = jnp.arange(0, dim, 2, dtype=jnp.float32)[: dim // 2]
    return (1.0 / (theta ** (k / float(dim)))).astype(jnp.float32)


def _pick_tile_hw(C, TT, HW, budget_bytes=4 * 1024 * 1024):
    """Largest multiple-of-128 flat-spatial tile keeping one f32 block <= budget."""
    if C * TT * HW * 4 <= budget_bytes:
        return HW                               # full extent: always a legal block dim
    t = budget_bytes // (C * TT * 4)
    t = max(128, (t // 128) * 128)
    return int(min(t, HW))


def hunyuan_video_rope(frame_indices, height, width, rope_dim, theta):
    """frame_indices: (B, T). Returns (B, 2*sum(rope_dim), T, H, W) float32."""
    DT, DY, DX = rope_dim
    assert DT % 2 == 0 and DY % 2 == 0 and DX % 2 == 0, "rope dims must be even"
    B, T = frame_indices.shape
    Dtot = DT + DY + DX
    C = 2 * Dtot
    HW = height * width

    # Tiny host-side constants / position tables (negligible vs. output bytes).
    frame_col = frame_indices.astype(jnp.float32).reshape(B, T, 1)
    ft = _inv_freq_half(DT, theta)
    fy = _inv_freq_half(DY, theta)
    fx = _inv_freq_half(DX, theta)
    hw = jnp.arange(HW, dtype=jnp.int32)
    hpos = (hw // width).astype(jnp.float32).reshape(1, HW)
    wpos = (hw % width).astype(jnp.float32).reshape(1, HW)

    TT = T if T <= 8 else 8                     # sublane tile over frames
    TILE_HW = _pick_tile_hw(C, TT, HW)          # lane tile over flat H*W
    NT = pl.cdiv(T, TT)
    NHW = pl.cdiv(HW, TILE_HW)

    kernel = functools.partial(_rope_kernel, DT=DT, DY=DY, DX=DX,
                               TT=TT, TILE_HW=TILE_HW)

    smem = pl.BlockSpec(memory_space=pltpu.MemorySpace.SMEM)

    out4 = pl.pallas_call(
        kernel,
        out_shape=jax.ShapeDtypeStruct((B, C, T, HW), jnp.float32),
        grid_spec=pltpu.PrefetchScalarGridSpec(
            num_scalar_prefetch=0,
            grid=(B, NT, NHW),
            in_specs=[
                smem, smem, smem,                                    # freq halves (SMEM)
                pl.BlockSpec((None, TT, 1), lambda b, t, h: (b, t, 0)),      # frame column
                pl.BlockSpec((1, TILE_HW), lambda b, t, h: (0, h)),          # h positions
                pl.BlockSpec((1, TILE_HW), lambda b, t, h: (0, h)),          # w positions
            ],
            out_specs=pl.BlockSpec((None, C, TT, TILE_HW),
                                   lambda b, t, h: (b, 0, t, h)),
        ),
        compiler_params=pltpu.CompilerParams(
            dimension_semantics=("parallel", "parallel", "parallel"),
            vmem_limit_bytes=32 * 1024 * 1024),
    )(ft, fy, fx, frame_col, hpos, wpos)

    # Contiguous (free) reshape back to the module's layout.
    return out4.reshape(B, C, T, height, width)


# ----------------------------------------------------------------------------
# Pure-JAX reference (mirrors the PyTorch module) for the correctness check.
# ----------------------------------------------------------------------------
def reference(frame_indices, height, width, rope_dim, theta):
    DT, DY, DX = rope_dim

    def get_frequency(dim, pos):
        inv = 1.0 / (theta ** (jnp.arange(0, dim, 2, dtype=jnp.float32)[: dim // 2] / float(dim)))
        fr = jnp.einsum("k,thw->kthw", inv, pos)
        fr = jnp.repeat(fr, 2, axis=0)
        return jnp.cos(fr), jnp.sin(fr)

    def inner(f):
        T = f.shape[0]
        GT = jnp.broadcast_to(f.astype(jnp.float32)[:, None, None], (T, height, width))
        GY = jnp.broadcast_to(jnp.arange(height, dtype=jnp.float32)[None, :, None], (T, height, width))
        GX = jnp.broadcast_to(jnp.arange(width, dtype=jnp.float32)[None, None, :], (T, height, width))
        FCT, FST = get_frequency(DT, GT)
        FCY, FSY = get_frequency(DY, GY)
        FCX, FSX = get_frequency(DX, GX)
        return jnp.concatenate([FCT, FCY, FCX, FST, FSY, FSX], axis=0)

    return jnp.stack([inner(frame_indices[b]) for b in range(frame_indices.shape[0])], axis=0)


if __name__ == "__main__":
    # Small shapes consistent with the module's forward.
    B, T, H, W = 2, 4, 16, 16
    rope_dim = (4, 8, 8)          # (DT, DY, DX) — must be even, as in the module
    theta = 256.0

    key = jax.random.PRNGKey(0)
    frame_indices = jax.random.randint(key, (B, T), 0, 64).astype(jnp.float32)

    out = hunyuan_video_rope(frame_indices, H, W, rope_dim, theta)
    out = jax.block_until_ready(out)

    ref = reference(frame_indices, H, W, rope_dim, theta)
    assert out.shape == (B, 2 * sum(rope_dim), T, H, W)
    assert jnp.allclose(out, ref, atol=1e-4, rtol=1e-4), "mismatch vs reference"

    print("KERNEL_OK")
</pallas_src>

<mosaic_0001>
module attributes {stable_mosaic.version = 11 : i64} {
  func.func @_rope_kernel(%arg0: i32, %arg1: i32, %arg2: i32, %arg3: memref<2xf32, #tpu.memory_space<smem>>, %arg4: memref<4xf32, #tpu.memory_space<smem>>, %arg5: memref<4xf32, #tpu.memory_space<smem>>, %arg6: memref<1x4x1xf32, #tpu.memory_space<vmem>>, %arg7: memref<1x256xf32, #tpu.memory_space<vmem>>, %arg8: memref<1x256xf32, #tpu.memory_space<vmem>>, %arg9: memref<1x40x4x256xf32, #tpu.memory_space<vmem>>) attributes {dimension_semantics = [#tpu.dimension_semantics<parallel>, #tpu.dimension_semantics<parallel>, #tpu.dimension_semantics<parallel>], iteration_bounds = array<i64: 2, 1, 1>, scalar_prefetch = 0 : i64, scratch_operands = 0 : i64, tpu.core_type = #tpu.core_type<tc>, window_params = [{transform_indices = @transform_0, window_bounds = array<i64: 2>}, {transform_indices = @transform_1, window_bounds = array<i64: 4>}, {transform_indices = @transform_2, window_bounds = array<i64: 4>}, {transform_indices = @transform_3, window_bounds = array<i64: 1, 4, 1>}, {transform_indices = @transform_4, window_bounds = array<i64: 1, 256>}, {transform_indices = @transform_5, window_bounds = array<i64: 1, 256>}, {transform_indices = @transform_6, window_bounds = array<i64: 1, 40, 4, 256>}]} {
    %c0 = arith.constant 0 : index
    %c0_0 = arith.constant 0 : index
    %c0_1 = arith.constant 0 : index
    %0 = vector.load %arg6[%c0, %c0_0, %c0_1] : memref<1x4x1xf32, #tpu.memory_space<vmem>>, vector<1x4x1xf32>
    %1 = vector.shape_cast %0 : vector<1x4x1xf32> to vector<4x1xf32>
    %2 = vector.shape_cast %1 : vector<4x1xf32> to vector<4x1xf32>
    %3 = vector.broadcast %2 : vector<4x1xf32> to vector<4x256xf32>
    %c0_2 = arith.constant 0 : index
    %c0_3 = arith.constant 0 : index
    %4 = vector.load %arg7[%c0_2, %c0_3] : memref<1x256xf32, #tpu.memory_space<vmem>>, vector<1x256xf32>
    %5 = vector.shape_cast %4 : vector<1x256xf32> to vector<1x256xf32>
    %6 = vector.broadcast %5 : vector<1x256xf32> to vector<4x256xf32>
    %c0_4 = arith.constant 0 : index
    %c0_5 = arith.constant 0 : index
    %7 = vector.load %arg8[%c0_4, %c0_5] : memref<1x256xf32, #tpu.memory_space<vmem>>, vector<1x256xf32>
    %8 = vector.shape_cast %7 : vector<1x256xf32> to vector<1x256xf32>
    %9 = vector.broadcast %8 : vector<1x256xf32> to vector<4x256xf32>
    %c0_6 = arith.constant 0 : index
    %10 = memref.load %arg3[%c0_6] : memref<2xf32, #tpu.memory_space<smem>>
    %11 = vector.broadcast %10 : f32 to vector<4x256xf32>
    %12 = arith.mulf %11, %3 : vector<4x256xf32>
    %13 = math.cos %12 : vector<4x256xf32>
    %14 = math.sin %12 : vector<4x256xf32>
    %c0_7 = arith.constant 0 : index
    %c0_8 = arith.constant 0 : index
    %c0_9 = arith.constant 0 : index
    %c0_10 = arith.constant 0 : index
    %15 = vector.load %arg9[%c0_7, %c0_8, %c0_9, %c0_10] : memref<1x40x4x256xf32, #tpu.memory_space<vmem>>, vector<1x1x4x256xf32>
    %16 = vector.shape_cast %15 : vector<1x1x4x256xf32> to vector<4x256xf32>
    %17 = vector.shape_cast %13 : vector<4x256xf32> to vector<1x1x4x256xf32>
    tpu.vector_store %arg9[%c0_7, %c0_8, %c0_9, %c0_10], %17 {strides = array<i32>} : memref<1x40x4x256xf32, #tpu.memory_space<vmem>>, vector<1x1x4x256xf32>,
    %c0_11 = arith.constant 0 : index
    %c1 = arith.constant 1 : index
    %c0_12 = arith.constant 0 : index
    %c0_13 = arith.constant 0 : index
    %18 = vector.load %arg9[%c0_11, %c1, %c0_12, %c0_13] : memref<1x40x4x256xf32, #tpu.memory_space<vmem>>, vector<1x1x4x256xf32>
    %19 = vector.shape_cast %18 : vector<1x1x4x256xf32> to vector<4x256xf32>
    %20 = vector.shape_cast %13 : vector<4x256xf32> to vector<1x1x4x256xf32>
    tpu.vector_store %arg9[%c0_11, %c1, %c0_12, %c0_13], %20 {strides = array<i32>} : memref<1x40x4x256xf32, #tpu.memory_space<vmem>>, vector<1x1x4x256xf32>,
    %c0_14 = arith.constant 0 : index
    %c20 = arith.constant 20 : index
    %c0_15 = arith.constant 0 : index
    %c0_16 = arith.constant 0 : index
    %21 = vector.load %arg9[%c0_14, %c20, %c0_15, %c0_16] : memref<1x40x4x256xf32, #tpu.memory_space<vmem>>, vector<1x1x4x256xf32>
    %22 = vector.shape_cast %21 : vector<1x1x4x256xf32> to vector<4x256xf32>
    %23 = vector.shape_cast %14 : vector<4x256xf32> to vector<1x1x4x256xf32>
    tpu.vector_store %arg9[%c0_14, %c20, %c0_15, %c0_16], %23 {strides = array<i32>} : memref<1x40x4x256xf32, #tpu.memory_space<vmem>>, vector<1x1x4x256xf32>,
    %c0_17 = arith.constant 0 : index
    %c21 = arith.constant 21 : index
    %c0_18 = arith.constant 0 : index
    %c0_19 = arith.constant 0 : index
    %24 = vector.load %arg9[%c0_17, %c21, %c0_18, %c0_19] : memref<1x40x4x256xf32, #tpu.memory_space<vmem>>, vector<1x1x4x256xf32>
    %25 = vector.shape_cast %24 : vector<1x1x4x256xf32> to vector<4x256xf32>
    %26 = vector.shape_cast %14 : vector<4x256xf32> to vector<1x1x4x256xf32>
    tpu.vector_store %arg9[%c0_17, %c21, %c0_18, %c0_19], %26 {strides = array<i32>} : memref<1x40x4x256xf32, #tpu.memory_space<vmem>>, vector<1x1x4x256xf32>,
    %c1_20 = arith.constant 1 : index
    %27 = memref.load %arg3[%c1_20] : memref<2xf32, #tpu.memory_space<smem>>
    %28 = vector.broadcast %27 : f32 to vector<4x256xf32>
    %29 = arith.mulf %28, %3 : vector<4x256xf32>
    %30 = math.cos %29 : vector<4x256xf32>
    %31 = math.sin %29 : vector<4x256xf32>
    %c0_21 = arith.constant 0 : index
    %c2 = arith.constant 2 : index
    %c0_22 = arith.constant 0 : index
    %c0_23 = arith.constant 0 : index
    %32 = vector.load %arg9[%c0_21, %c2, %c0_22, %c0_23] : memref<1x40x4x256xf32, #tpu.memory_space<vmem>>, vector<1x1x4x256xf32>
    %33 = vector.shape_cast %32 : vector<1x1x4x256xf32> to vector<4x256xf32>
    %34 = vector.shape_cast %30 : vector<4x256xf32> to vector<1x1x4x256xf32>
    tpu.vector_store %arg9[%c0_21, %c2, %c0_22, %c0_23], %34 {strides = array<i32>} : memref<1x40x4x256xf32, #tpu.memory_space<vmem>>, vector<1x1x4x256xf32>,
    %c0_24 = arith.constant 0 : index
    %c3 = arith.constant 3 : index
    %c0_25 = arith.constant 0 : index
    %c0_26 = arith.constant 0 : index
    %35 = vector.load %arg9[%c0_24, %c3, %c0_25, %c0_26] : memref<1x40x4x256xf32, #tpu.memory_space<vmem>>, vector<1x1x4x256xf32>
    %36 = vector.shape_cast %35 : vector<1x1x4x256xf32> to vector<4x256xf32>
    %37 = vector.shape_cast %30 : vector<4x256xf32> to vector<1x1x4x256xf32>
    tpu.vector_store %arg9[%c0_24, %c3, %c0_25, %c0_26], %37 {strides = array<i32>} : memref<1x40x4x256xf32, #tpu.memory_space<vmem>>, vector<1x1x4x256xf32>,
    %c0_27 = arith.constant 0 : index
    %c22 = arith.constant 22 : index
    %c0_28 = arith.constant 0 : index
    %c0_29 = arith.constant 0 : index
    %38 = vector.load %arg9[%c0_27, %c22, %c0_28, %c0_29] : memref<1x40x4x256xf32, #tpu.memory_space<vmem>>, vector<1x1x4x256xf32>
    %39 = vector.shape_cast %38 : vector<1x1x4x256xf32> to vector<4x256xf32>
    %40 = vector.shape_cast %31 : vector<4x256xf32> to vector<1x1x4x256xf32>
    tpu.vector_store %arg9[%c0_27, %c22, %c0_28, %c0_29], %40 {strides = array<i32>} : memref<1x40x4x256xf32, #tpu.memory_space<vmem>>, vector<1x1x4x256xf32>,
    %c0_30 = arith.constant 0 : index
    %c23 = arith.constant 23 : index
    %c0_31 = arith.constant 0 : index
    %c0_32 = arith.constant 0 : index
    %41 = vector.load %arg9[%c0_30, %c23, %c0_31, %c0_32] : memref<1x40x4x256xf32, #tpu.memory_space<vmem>>, vector<1x1x4x256xf32>
    %42 = vector.shape_cast %41 : vector<1x1x4x256xf32> to vector<4x256xf32>
    %43 = vector.shape_cast %31 : vector<4x256xf32> to vector<1x1x4x256xf32>
    tpu.vector_store %arg9[%c0_30, %c23, %c0_31, %c0_32], %43 {strides = array<i32>} : memref<1x40x4x256xf32, #tpu.memory_space<vmem>>, vector<1x1x4x256xf32>,
    %c0_33 = arith.constant 0 : index
    %44 = memref.load %arg4[%c0_33] : memref<4xf32, #tpu.memory_space<smem>>
    %45 = vector.broadcast %44 : f32 to vector<4x256xf32>
    %46 = arith.mulf %45, %6 : vector<4x256xf32>
    %47 = math.cos %46 : vector<4x256xf32>
    %48 = math.sin %46 : vector<4x256xf32>
    %c0_34 = arith.constant 0 : index
    %c4 = arith.constant 4 : index
    %c0_35 = arith.constant 0 : index
    %c0_36 = arith.constant 0 : index
    %49 = vector.load %arg9[%c0_34, %c4, %c0_35, %c0_36] : memref<1x40x4x256xf32, #tpu.memory_space<vmem>>, vector<1x1x4x256xf32>
    %50 = vector.shape_cast %49 : vector<1x1x4x256xf32> to vector<4x256xf32>
    %51 = vector.shape_cast %47 : vector<4x256xf32> to vector<1x1x4x256xf32>
    tpu.vector_store %arg9[%c0_34, %c4, %c0_35, %c0_36], %51 {strides = array<i32>} : memref<1x40x4x256xf32, #tpu.memory_space<vmem>>, vector<1x1x4x256xf32>,
    %c0_37 = arith.constant 0 : index
    %c5 = arith.constant 5 : index
    %c0_38 = arith.constant 0 : index
    %c0_39 = arith.constant 0 : index
    %52 = vector.load %arg9[%c0_37, %c5, %c0_38, %c0_39] : memref<1x40x4x256xf32, #tpu.memory_space<vmem>>, vector<1x1x4x256xf32>
    %53 = vector.shape_cast %52 : vector<1x1x4x256xf32> to vector<4x256xf32>
    %54 = vector.shape_cast %47 : vector<4x256xf32> to vector<1x1x4x256xf32>
    tpu.vector_store %arg9[%c0_37, %c5, %c0_38, %c0_39], %54 {strides = array<i32>} : memref<1x40x4x256xf32, #tpu.memory_space<vmem>>, vector<1x1x4x256xf32>,
    %c0_40 = arith.constant 0 : index
    %c24 = arith.constant 24 : index
    %c0_41 = arith.constant 0 : index
    %c0_42 = arith.constant 0 : index
    %55 = vector.load %arg9[%c0_40, %c24, %c0_41, %c0_42] : memref<1x40x4x256xf32, #tpu.memory_space<vmem>>, vector<1x1x4x256xf32>
    %56 = vector.shape_cast %55 : vector<1x1x4x256xf32> to vector<4x256xf32>
    %57 = vector.shape_cast %48 : vector<4x256xf32> to vector<1x1x4x256xf32>
    tpu.vector_store %arg9[%c0_40, %c24, %c0_41, %c0_42], %57 {strides = array<i32>} : memref<1x40x4x256xf32, #tpu.memory_space<vmem>>, vector<1x1x4x256xf32>,
    %c0_43 = arith.constant 0 : index
    %c25 = arith.constant 25 : index
    %c0_44 = arith.constant 0 : index
    %c0_45 = arith.constant 0 : index
    %58 = vector.load %arg9[%c0_43, %c25, %c0_44, %c0_45] : memref<1x40x4x256xf32, #tpu.memory_space<vmem>>, vector<1x1x4x256xf32>
    %59 = vector.shape_cast %58 : vector<1x1x4x256xf32> to vector<4x256xf32>
    %60 = vector.shape_cast %48 : vector<4x256xf32> to vector<1x1x4x256xf32>
    tpu.vector_store %arg9[%c0_43, %c25, %c0_44, %c0_45], %60 {strides = array<i32>} : memref<1x40x4x256xf32, #tpu.memory_space<vmem>>, vector<1x1x4x256xf32>,
    %c1_46 = arith.constant 1 : index
    %61 = memref.load %arg4[%c1_46] : memref<4xf32, #tpu.memory_space<smem>>
    %62 = vector.broadcast %61 : f32 to vector<4x256xf32>
    %63 = arith.mulf %62, %6 : vector<4x256xf32>
    %64 = math.cos %63 : vector<4x256xf32>
    %65 = math.sin %63 : vector<4x256xf32>
    %c0_47 = arith.constant 0 : index
    %c6 = arith.constant 6 : index
    %c0_48 = arith.constant 0 : index
    %c0_49 = arith.constant 0 : index
    %66 = vector.load %arg9[%c0_47, %c6, %c0_48, %c0_49] : memref<1x40x4x256xf32, #tpu.memory_space<vmem>>, vector<1x1x4x256xf32>
    %67 = vector.shape_cast %66 : vector<1x1x4x256xf32> to vector<4x256xf32>
    %68 = vector.shape_cast %64 : vector<4x256xf32> to vector<1x1x4x256xf32>
    tpu.vector_store %arg9[%c0_47, %c6, %c0_48, %c0_49], %68 {strides = array<i32>} : memref<1x40x4x256xf32, #tpu.memory_space<vmem>>, vector<1x1x4x256xf32>,
    %c0_50 = arith.constant 0 : index
    %c7 = arith.constant 7 : index
    %c0_51 = arith.constant 0 : index
    %c0_52 = arith.constant 0 : index
    %69 = vector.load %arg9[%c0_50, %c7, %c0_51, %c0_52] : memref<1x40x4x256xf32, #tpu.memory_space<vmem>>, vector<1x1x4x256xf32>
    %70 = vector.shape_cast %69 : vector<1x1x4x256xf32> to vector<4x256xf32>
    %71 = vector.shape_cast %64 : vector<4x256xf32> to vector<1x1x4x256xf32>
    tpu.vector_store %arg9[%c0_50, %c7, %c0_51, %c0_52], %71 {strides = array<i32>} : memref<1x40x4x256xf32, #tpu.memory_space<vmem>>, vector<1x1x4x256xf32>,
    %c0_53 = arith.constant 0 : index
    %c26 = arith.constant 26 : index
    %c0_54 = arith.constant 0 : index
    %c0_55 = arith.constant 0 : index
    %72 = vector.load %arg9[%c0_53, %c26, %c0_54, %c0_55] : memref<1x40x4x256xf32, #tpu.memory_space<vmem>>, vector<1x1x4x256xf32>
    %73 = vector.shape_cast %72 : vector<1x1x4x256xf32> to vector<4x256xf32>
    %74 = vector.shape_cast %65 : vector<4x256xf32> to vector<1x1x4x256xf32>
    tpu.vector_store %arg9[%c0_53, %c26, %c0_54, %c0_55], %74 {strides = array<i32>} : memref<1x40x4x256xf32, #tpu.memory_space<vmem>>, vector<1x1x4x256xf32>,
    %c0_56 = arith.constant 0 : index
    %c27 = arith.constant 27 : index
    %c0_57 = arith.constant 0 : index
    %c0_58 = arith.constant 0 : index
    %75 = vector.load %arg9[%c0_56, %c27, %c0_57, %c0_58] : memref<1x40x4x256xf32, #tpu.memory_space<vmem>>, vector<1x1x4x256xf32>
    %76 = vector.shape_cast %75 : vector<1x1x4x256xf32> to vector<4x256xf32>
    %77 = vector.shape_cast %65 : vector<4x256xf32> to vector<1x1x4x256xf32>
    tpu.vector_store %arg9[%c0_56, %c27, %c0_57, %c0_58], %77 {strides = array<i32>} : memref<1x40x4x256xf32, #tpu.memory_space<vmem>>, vector<1x1x4x256xf32>,
    %c2_59 = arith.constant 2 : index
    %78 = memref.load %arg4[%c2_59] : memref<4xf32, #tpu.memory_space<smem>>
    %79 = vector.broadcast %78 : f32 to vector<4x256xf32>
    %80 = arith.mulf %79, %6 : vector<4x256xf32>
    %81 = math.cos %80 : vector<4x256xf32>
    %82 = math.sin %80 : vector<4x256xf32>
    %c0_60 = arith.constant 0 : index
    %c8 = arith.constant 8 : index
    %c0_61 = arith.constant 0 : index
    %c0_62 = arith.constant 0 : index
    %83 = vector.load %arg9[%c0_60, %c8, %c0_61, %c0_62] : memref<1x40x4x256xf32, #tpu.memory_space<vmem>>, vector<1x1x4x256xf32>
    %84 = vector.shape_cast %83 : vector<1x1x4x256xf32> to vector<4x256xf32>
    %85 = vector.shape_cast %81 : vector<4x256xf32> to vector<1x1x4x256xf32>
    tpu.vector_store %arg9[%c0_60, %c8, %c0_61, %c0_62], %85 {strides = array<i32>} : memref<1x40x4x256xf32, #tpu.memory_space<vmem>>, vector<1x1x4x256xf32>,
    %c0_63 = arith.constant 0 : index
    %c9 = arith.constant 9 : index
    %c0_64 = arith.constant 0 : index
    %c0_65 = arith.constant 0 : index
    %86 = vector.load %arg9[%c0_63, %c9, %c0_64, %c0_65] : memref<1x40x4x256xf32, #tpu.memory_space<vmem>>, vector<1x1x4x256xf32>
    %87 = vector.shape_cast %86 : vector<1x1x4x256xf32> to vector<4x256xf32>
    %88 = vector.shape_cast %81 : vector<4x256xf32> to vector<1x1x4x256xf32>
    tpu.vector_store %arg9[%c0_63, %c9, %c0_64, %c0_65], %88 {strides = array<i32>} : memref<1x40x4x256xf32, #tpu.memory_space<vmem>>, vector<1x1x4x256xf32>,
    %c0_66 = arith.constant 0 : index
    %c28 = arith.constant 28 : index
    %c0_67 = arith.constant 0 : index
    %c0_68 = arith.constant 0 : index
    %89 = vector.load %arg9[%c0_66, %c28, %c0_67, %c0_68] : memref<1x40x4x256xf32, #tpu.memory_space<vmem>>, vector<1x1x4x256xf32>
    %90 = vector.shape_cast %89 : vector<1x1x4x256xf32> to vector<4x256xf32>
    %91 = vector.shape_cast %82 : vector<4x256xf32> to vector<1x1x4x256xf32>
    tpu.vector_store %arg9[%c0_66, %c28, %c0_67, %c0_68], %91 {strides = array<i32>} : memref<1x40x4x256xf32, #tpu.memory_space<vmem>>, vector<1x1x4x256xf32>,
    %c0_69 = arith.constant 0 : index
    %c29 = arith.constant 29 : index
    %c0_70 = arith.constant 0 : index
    %c0_71 = arith.constant 0 : index
    %92 = vector.load %arg9[%c0_69, %c29, %c0_70, %c0_71] : memref<1x40x4x256xf32, #tpu.memory_space<vmem>>, vector<1x1x4x256xf32>
    %93 = vector.shape_cast %92 : vector<1x1x4x256xf32> to vector<4x256xf32>
    %94 = vector.shape_cast %82 : vector<4x256xf32> to vector<1x1x4x256xf32>
    tpu.vector_store %arg9[%c0_69, %c29, %c0_70, %c0_71], %94 {strides = array<i32>} : memref<1x40x4x256xf32, #tpu.memory_space<vmem>>, vector<1x1x4x256xf32>,
    %c3_72 = arith.constant 3 : index
    %95 = memref.load %arg4[%c3_72] : memref<4xf32, #tpu.memory_space<smem>>
    %96 = vector.broadcast %95 : f32 to vector<4x256xf32>
    %97 = arith.mulf %96, %6 : vector<4x256xf32>
    %98 = math.cos %97 : vector<4x256xf32>
    %99 = math.sin %97 : vector<4x256xf32>
    %c0_73 = arith.constant 0 : index
    %c10 = arith.constant 10 : index
    %c0_74 = arith.constant 0 : index
    %c0_75 = arith.constant 0 : index
    %100 = vector.load %arg9[%c0_73, %c10, %c0_74, %c0_75] : memref<1x40x4x256xf32, #tpu.memory_space<vmem>>, vector<1x1x4x256xf32>
    %101 = vector.shape_cast %100 : vector<1x1x4x256xf32> to vector<4x256xf32>
    %102 = vector.shape_cast %98 : vector<4x256xf32> to vector<1x1x4x256xf32>
    tpu.vector_store %arg9[%c0_73, %c10, %c0_74, %c0_75], %102 {strides = array<i32>} : memref<1x40x4x256xf32, #tpu.memory_space<vmem>>, vector<1x1x4x256xf32>,
    %c0_76 = arith.constant 0 : index
    %c11 = arith.constant 11 : index
    %c0_77 = arith.constant 0 : index
    %c0_78 = arith.constant 0 : index
    %103 = vector.load %arg9[%c0_76, %c11, %c0_77, %c0_78] : memref<1x40x4x256xf32, #tpu.memory_space<vmem>>, vector<1x1x4x256xf32>
    %104 = vector.shape_cast %103 : vector<1x1x4x256xf32> to vector<4x256xf32>
    %105 = vector.shape_cast %98 : vector<4x256xf32> to vector<1x1x4x256xf32>
    tpu.vector_store %arg9[%c0_76, %c11, %c0_77, %c0_78], %105 {strides = array<i32>} : memref<1x40x4x256xf32, #tpu.memory_space<vmem>>, vector<1x1x4x256xf32>,
    %c0_79 = arith.constant 0 : index
    %c30 = arith.constant 30 : index
    %c0_80 = arith.constant 0 : index
    %c0_81 = arith.constant 0 : index
    %106 = vector.load %arg9[%c0_79, %c30, %c0_80, %c0_81] : memref<1x40x4x256xf32, #tpu.memory_space<vmem>>, vector<1x1x4x256xf32>
    %107 = vector.shape_cast %106 : vector<1x1x4x256xf32> to vector<4x256xf32>
    %108 = vector.shape_cast %99 : vector<4x256xf32> to vector<1x1x4x256xf32>
    tpu.vector_store %arg9[%c0_79, %c30, %c0_80, %c0_81], %108 {strides = array<i32>} : memref<1x40x4x256xf32, #tpu.memory_space<vmem>>, vector<1x1x4x256xf32>,
    %c0_82 = arith.constant 0 : index
    %c31 = arith.constant 31 : index
    %c0_83 = arith.constant 0 : index
    %c0_84 = arith.constant 0 : index
    %109 = vector.load %arg9[%c0_82, %c31, %c0_83, %c0_84] : memref<1x40x4x256xf32, #tpu.memory_space<vmem>>, vector<1x1x4x256xf32>
    %110 = vector.shape_cast %109 : vector<1x1x4x256xf32> to vector<4x256xf32>
    %111 = vector.shape_cast %99 : vector<4x256xf32> to vector<1x1x4x256xf32>
    tpu.vector_store %arg9[%c0_82, %c31, %c0_83, %c0_84], %111 {strides = array<i32>} : memref<1x40x4x256xf32, #tpu.memory_space<vmem>>, vector<1x1x4x256xf32>,
    %c0_85 = arith.constant 0 : index
    %112 = memref.load %arg5[%c0_85] : memref<4xf32, #tpu.memory_space<smem>>
    %113 = vector.broadcast %112 : f32 to vector<4x256xf32>
    %114 = arith.mulf %113, %9 : vector<4x256xf32>
    %115 = math.cos %114 : vector<4x256xf32>
    %116 = math.sin %114 : vector<4x256xf32>
    %c0_86 = arith.constant 0 : index
    %c12 = arith.constant 12 : index
    %c0_87 = arith.constant 0 : index
    %c0_88 = arith.constant 0 : index
    %117 = vector.load %arg9[%c0_86, %c12, %c0_87, %c0_88] : memref<1x40x4x256xf32, #tpu.memory_space<vmem>>, vector<1x1x4x256xf32>
    %118 = vector.shape_cast %117 : vector<1x1x4x256xf32> to vector<4x256xf32>
    %119 = vector.shape_cast %115 : vector<4x256xf32> to vector<1x1x4x256xf32>
    tpu.vector_store %arg9[%c0_86, %c12, %c0_87, %c0_88], %119 {strides = array<i32>} : memref<1x40x4x256xf32, #tpu.memory_space<vmem>>, vector<1x1x4x256xf32>,
    %c0_89 = arith.constant 0 : index
    %c13 = arith.constant 13 : index
    %c0_90 = arith.constant 0 : index
    %c0_91 = arith.constant 0 : index
    %120 = vector.load %arg9[%c0_89, %c13, %c0_90, %c0_91] : memref<1x40x4x256xf32, #tpu.memory_space<vmem>>, vector<1x1x4x256xf32>
    %121 = vector.shape_cast %120 : vector<1x1x4x256xf32> to vector<4x256xf32>
    %122 = vector.shape_cast %115 : vector<4x256xf32> to vector<1x1x4x256xf32>
    tpu.vector_store %arg9[%c0_89, %c13, %c0_90, %c0_91], %122 {strides = array<i32>} : memref<1x40x4x256xf32, #tpu.memory_space<vmem>>, vector<1x1x4x256xf32>,
    %c0_92 = arith.constant 0 : index
    %c32 = arith.constant 32 : index
    %c0_93 = arith.constant 0 : index
    %c0_94 = arith.constant 0 : index
    %123 = vector.load %arg9[%c0_92, %c32, %c0_93, %c0_94] : memref<1x40x4x256xf32, #tpu.memory_space<vmem>>, vector<1x1x4x256xf32>
    %124 = vector.shape_cast %123 : vector<1x1x4x256xf32> to vector<4x256xf32>
    %125 = vector.shape_cast %116 : vector<4x256xf32> to vector<1x1x4x256xf32>
    tpu.vector_store %arg9[%c0_92, %c32, %c0_93, %c0_94], %125 {strides = array<i32>} : memref<1x40x4x256xf32, #tpu.memory_space<vmem>>, vector<1x1x4x256xf32>,
    %c0_95 = arith.constant 0 : index
    %c33 = arith.constant 33 : index
    %c0_96 = arith.constant 0 : index
    %c0_97 = arith.constant 0 : index
    %126 = vector.load %arg9[%c0_95, %c33, %c0_96, %c0_97] : memref<1x40x4x256xf32, #tpu.memory_space<vmem>>, vector<1x1x4x256xf32>
    %127 = vector.shape_cast %126 : vector<1x1x4x256xf32> to vector<4x256xf32>
    %128 = vector.shape_cast %116 : vector<4x256xf32> to vector<1x1x4x256xf32>
    tpu.vector_store %arg9[%c0_95, %c33, %c0_96, %c0_97], %128 {strides = array<i32>} : memref<1x40x4x256xf32, #tpu.memory_space<vmem>>, vector<1x1x4x256xf32>,
    %c1_98 = arith.constant 1 : index
    %129 = memref.load %arg5[%c1_98] : memref<4xf32, #tpu.memory_space<smem>>
    %130 = vector.broadcast %129 : f32 to vector<4x256xf32>
    %131 = arith.mulf %130, %9 : vector<4x256xf32>
    %132 = math.cos %131 : vector<4x256xf32>
    %133 = math.sin %131 : vector<4x256xf32>
    %c0_99 = arith.constant 0 : index
    %c14 = arith.constant 14 : index
    %c0_100 = arith.constant 0 : index
    %c0_101 = arith.constant 0 : index
    %134 = vector.load %arg9[%c0_99, %c14, %c0_100, %c0_101] : memref<1x40x4x256xf32, #tpu.memory_space<vmem>>, vector<1x1x4x256xf32>
    %135 = vector.shape_cast %134 : vector<1x1x4x256xf32> to vector<4x256xf32>
    %136 = vector.shape_cast %132 : vector<4x256xf32> to vector<1x1x4x256xf32>
    tpu.vector_store %arg9[%c0_99, %c14, %c0_100, %c0_101], %136 {strides = array<i32>} : memref<1x40x4x256xf32, #tpu.memory_space<vmem>>, vector<1x1x4x256xf32>,
    %c0_102 = arith.constant 0 : index
    %c15 = arith.constant 15 : index
    %c0_103 = arith.constant 0 : index
    %c0_104 = arith.constant 0 : index
    %137 = vector.load %arg9[%c0_102, %c15, %c0_103, %c0_104] : memref<1x40x4x256xf32, #tpu.memory_space<vmem>>, vector<1x1x4x256xf32>
    %138 = vector.shape_cast %137 : vector<1x1x4x256xf32> to vector<4x256xf32>
    %139 = vector.shape_cast %132 : vector<4x256xf32> to vector<1x1x4x256xf32>
    tpu.vector_store %arg9[%c0_102, %c15, %c0_103, %c0_104], %139 {strides = array<i32>} : memref<1x40x4x256xf32, #tpu.memory_space<vmem>>, vector<1x1x4x256xf32>,
    %c0_105 = arith.constant 0 : index
    %c34 = arith.constant 34 : index
    %c0_106 = arith.constant 0 : index
    %c0_107 = arith.constant 0 : index
    %140 = vector.load %arg9[%c0_105, %c34, %c0_106, %c0_107] : memref<1x40x4x256xf32, #tpu.memory_space<vmem>>, vector<1x1x4x256xf32>
    %141 = vector.shape_cast %140 : vector<1x1x4x256xf32> to vector<4x256xf32>
    %142 = vector.shape_cast %133 : vector<4x256xf32> to vector<1x1x4x256xf32>
    tpu.vector_store %arg9[%c0_105, %c34, %c0_106, %c0_107], %142 {strides = array<i32>} : memref<1x40x4x256xf32, #tpu.memory_space<vmem>>, vector<1x1x4x256xf32>,
    %c0_108 = arith.constant 0 : index
    %c35 = arith.constant 35 : index
    %c0_109 = arith.constant 0 : index
    %c0_110 = arith.constant 0 : index
    %143 = vector.load %arg9[%c0_108, %c35, %c0_109, %c0_110] : memref<1x40x4x256xf32, #tpu.memory_space<vmem>>, vector<1x1x4x256xf32>
    %144 = vector.shape_cast %143 : vector<1x1x4x256xf32> to vector<4x256xf32>
    %145 = vector.shape_cast %133 : vector<4x256xf32> to vector<1x1x4x256xf32>
    tpu.vector_store %arg9[%c0_108, %c35, %c0_109, %c0_110], %145 {strides = array<i32>} : memref<1x40x4x256xf32, #tpu.memory_space<vmem>>, vector<1x1x4x256xf32>,
    %c2_111 = arith.constant 2 : index
    %146 = memref.load %arg5[%c2_111] : memref<4xf32, #tpu.memory_space<smem>>
    %147 = vector.broadcast %146 : f32 to vector<4x256xf32>
    %148 = arith.mulf %147, %9 : vector<4x256xf32>
    %149 = math.cos %148 : vector<4x256xf32>
    %150 = math.sin %148 : vector<4x256xf32>
    %c0_112 = arith.constant 0 : index
    %c16 = arith.constant 16 : index
    %c0_113 = arith.constant 0 : index
    %c0_114 = arith.constant 0 : index
    %151 = vector.load %arg9[%c0_112, %c16, %c0_113, %c0_114] : memref<1x40x4x256xf32, #tpu.memory_space<vmem>>, vector<1x1x4x256xf32>
    %152 = vector.shape_cast %151 : vector<1x1x4x256xf32> to vector<4x256xf32>
    %153 = vector.shape_cast %149 : vector<4x256xf32> to vector<1x1x4x256xf32>
    tpu.vector_store %arg9[%c0_112, %c16, %c0_113, %c0_114], %153 {strides = array<i32>} : memref<1x40x4x256xf32, #tpu.memory_space<vmem>>, vector<1x1x4x256xf32>,
    %c0_115 = arith.constant 0 : index
    %c17 = arith.constant 17 : index
    %c0_116 = arith.constant 0 : index
    %c0_117 = arith.constant 0 : index
    %154 = vector.load %arg9[%c0_115, %c17, %c0_116, %c0_117] : memref<1x40x4x256xf32, #tpu.memory_space<vmem>>, vector<1x1x4x256xf32>
    %155 = vector.shape_cast %154 : vector<1x1x4x256xf32> to vector<4x256xf32>
    %156 = vector.shape_cast %149 : vector<4x256xf32> to vector<1x1x4x256xf32>
    tpu.vector_store %arg9[%c0_115, %c17, %c0_116, %c0_117], %156 {strides = array<i32>} : memref<1x40x4x256xf32, #tpu.memory_space<vmem>>, vector<1x1x4x256xf32>,
    %c0_118 = arith.constant 0 : index
    %c36 = arith.constant 36 : index
    %c0_119 = arith.constant 0 : index
    %c0_120 = arith.constant 0 : index
    %157 = vector.load %arg9[%c0_118, %c36, %c0_119, %c0_120] : memref<1x40x4x256xf32, #tpu.memory_space<vmem>>, vector<1x1x4x256xf32>
    %158 = vector.shape_cast %157 : vector<1x1x4x256xf32> to vector<4x256xf32>
    %159 = vector.shape_cast %150 : vector<4x256xf32> to vector<1x1x4x256xf32>
    tpu.vector_store %arg9[%c0_118, %c36, %c0_119, %c0_120], %159 {strides = array<i32>} : memref<1x40x4x256xf32, #tpu.memory_space<vmem>>, vector<1x1x4x256xf32>,
    %c0_121 = arith.constant 0 : index
    %c37 = arith.constant 37 : index
    %c0_122 = arith.constant 0 : index
    %c0_123 = arith.constant 0 : index
    %160 = vector.load %arg9[%c0_121, %c37, %c0_122, %c0_123] : memref<1x40x4x256xf32, #tpu.memory_space<vmem>>, vector<1x1x4x256xf32>
    %161 = vector.shape_cast %160 : vector<1x1x4x256xf32> to vector<4x256xf32>
    %162 = vector.shape_cast %150 : vector<4x256xf32> to vector<1x1x4x256xf32>
    tpu.vector_store %arg9[%c0_121, %c37, %c0_122, %c0_123], %162 {strides = array<i32>} : memref<1x40x4x256xf32, #tpu.memory_space<vmem>>, vector<1x1x4x256xf32>,
    %c3_124 = arith.constant 3 : index
    %163 = memref.load %arg5[%c3_124] : memref<4xf32, #tpu.memory_space<smem>>
    %164 = vector.broadcast %163 : f32 to vector<4x256xf32>
    %165 = arith.mulf %164, %9 : vector<4x256xf32>
    %166 = math.cos %165 : vector<4x256xf32>
    %167 = math.sin %165 : vector<4x256xf32>
    %c0_125 = arith.constant 0 : index
    %c18 = arith.constant 18 : index
    %c0_126 = arith.constant 0 : index
    %c0_127 = arith.constant 0 : index
    %168 = vector.load %arg9[%c0_125, %c18, %c0_126, %c0_127] : memref<1x40x4x256xf32, #tpu.memory_space<vmem>>, vector<1x1x4x256xf32>
    %169 = vector.shape_cast %168 : vector<1x1x4x256xf32> to vector<4x256xf32>
    %170 = vector.shape_cast %166 : vector<4x256xf32> to vector<1x1x4x256xf32>
    tpu.vector_store %arg9[%c0_125, %c18, %c0_126, %c0_127], %170 {strides = array<i32>} : memref<1x40x4x256xf32, #tpu.memory_space<vmem>>, vector<1x1x4x256xf32>,
    %c0_128 = arith.constant 0 : index
    %c19 = arith.constant 19 : index
    %c0_129 = arith.constant 0 : index
    %c0_130 = arith.constant 0 : index
    %171 = vector.load %arg9[%c0_128, %c19, %c0_129, %c0_130] : memref<1x40x4x256xf32, #tpu.memory_space<vmem>>, vector<1x1x4x256xf32>
    %172 = vector.shape_cast %171 : vector<1x1x4x256xf32> to vector<4x256xf32>
    %173 = vector.shape_cast %166 : vector<4x256xf32> to vector<1x1x4x256xf32>
    tpu.vector_store %arg9[%c0_128, %c19, %c0_129, %c0_130], %173 {strides = array<i32>} : memref<1x40x4x256xf32, #tpu.memory_space<vmem>>, vector<1x1x4x256xf32>,
    %c0_131 = arith.constant 0 : index
    %c38 = arith.constant 38 : index
    %c0_132 = arith.constant 0 : index
    %c0_133 = arith.constant 0 : index
    %174 = vector.load %arg9[%c0_131, %c38, %c0_132, %c0_133] : memref<1x40x4x256xf32, #tpu.memory_space<vmem>>, vector<1x1x4x256xf32>
    %175 = vector.shape_cast %174 : vector<1x1x4x256xf32> to vector<4x256xf32>
    %176 = vector.shape_cast %167 : vector<4x256xf32> to vector<1x1x4x256xf32>
    tpu.vector_store %arg9[%c0_131, %c38, %c0_132, %c0_133], %176 {strides = array<i32>} : memref<1x40x4x256xf32, #tpu.memory_space<vmem>>, vector<1x1x4x256xf32>,
    %c0_134 = arith.constant 0 : index
    %c39 = arith.constant 39 : index
    %c0_135 = arith.constant 0 : index
    %c0_136 = arith.constant 0 : index
    %177 = vector.load %arg9[%c0_134, %c39, %c0_135, %c0_136] : memref<1x40x4x256xf32, #tpu.memory_space<vmem>>, vector<1x1x4x256xf32>
    %178 = vector.shape_cast %177 : vector<1x1x4x256xf32> to vector<4x256xf32>
    %179 = vector.shape_cast %167 : vector<4x256xf32> to vector<1x1x4x256xf32>
    tpu.vector_store %arg9[%c0_134, %c39, %c0_135, %c0_136], %179 {strides = array<i32>} : memref<1x40x4x256xf32, #tpu.memory_space<vmem>>, vector<1x1x4x256xf32>,
    return
  }
  func.func @transform_0(%arg0: i32, %arg1: i32, %arg2: i32) -> i32 {
    %c0_i32 = arith.constant 0 : i32
    %c0_i32_0 = arith.constant 0 : i32
    return %c0_i32 : i32
  }
  func.func @transform_1(%arg0: i32, %arg1: i32, %arg2: i32) -> i32 {
    %c0_i32 = arith.constant 0 : i32
    %c0_i32_0 = arith.constant 0 : i32
    return %c0_i32 : i32
  }
  func.func @transform_2(%arg0: i32, %arg1: i32, %arg2: i32) -> i32 {
    %c0_i32 = arith.constant 0 : i32
    %c0_i32_0 = arith.constant 0 : i32
    return %c0_i32 : i32
  }
  func.func @transform_3(%arg0: i32, %arg1: i32, %arg2: i32) -> (i32, i32, i32) {
    %c0_i32 = arith.constant 0 : i32
    %c0_i32_0 = arith.constant 0 : i32
    return %arg0, %arg1, %c0_i32 : i32, i32, i32
  }
  func.func @transform_4(%arg0: i32, %arg1: i32, %arg2: i32) -> (i32, i32) {
    %c0_i32 = arith.constant 0 : i32
    %c0_i32_0 = arith.constant 0 : i32
    return %c0_i32, %arg2 : i32, i32
  }
  func.func @transform_5(%arg0: i32, %arg1: i32, %arg2: i32) -> (i32, i32) {
    %c0_i32 = arith.constant 0 : i32
    %c0_i32_0 = arith.constant 0 : i32
    return %c0_i32, %arg2 : i32, i32
  }
  func.func @transform_6(%arg0: i32, %arg1: i32, %arg2: i32) -> (i32, i32, i32, i32) {
    %c0_i32 = arith.constant 0 : i32
    %c0_i32_0 = arith.constant 0 : i32
    return %arg0, %c0_i32, %arg1, %arg2 : i32, i32, i32, i32
  }
}

</mosaic_0001>

<bundles_post_ra>
// kernel: tpu_custom_call.1
= control target key start
LH: loop header
LB: loop body
LE: loop exit
PB: predicated region body
PF: predicated region fallthrough
CT: control target
= control target key end

     0   :  { %11 = vsyncpa [#allocation4], 0  ;;  %s7241_s0 = inlined_call_operand.vmem [shape: f32[2], index: 0, kind: input, shape index: {}]   ;;  %s7242_s1 = inlined_call_operand.vmem [shape: f32[4], index: 1, kind: input, shape index: {}]   ;;  %s7243_s2 = inlined_call_operand.vmem [shape: f32[4], index: 2, kind: input, shape index: {}]   ;;  %s7244_s3 = inlined_call_operand.vmem [shape: f32[2,4,1], index: 3, kind: input, shape index: {}]   ;;  %s7245_s4 = inlined_call_operand.vmem [shape: f32[1,256], index: 4, kind: input, shape index: {}]   ;;  %s7246_s5 = inlined_call_operand.vmem [shape: f32[1,256], index: 5, kind: input, shape index: {}]   ;;  %s7247_s6 = inlined_call_operand.hbm [shape: f32[2,40,4,256], index: 6, kind: output, shape index: {}]  }
   0x1   :  { %12 = vsyncpa [#allocation6], 0 }
   0x2   :  { %13 = vsyncpa [#allocation3], 0 }
   0x3   :  { %15 = vsyncpa [#allocation3 + $0x1], 0  ;;  %s5118_s21 = smov 0   ;;  %s5120_s22 = smov 0  }
   0x4   :  { %s5122_s23 = smov 0   ;;  %s5124_s24 = smov 0  }
   0x5   :  { %s5126_s25 = smov 0   ;;  %s5128_s26 = smov 0  }
   0x6 LB: > { %s4486_s27 = sadd.s32 4294967295, %s5067_s26   ;;  %s4487_s28 = sadd.s32 4294967294, %s5067_s26   ;;  %s5067_s26 = sphi %s5128_s26, %s21_s26   ;;  %s5063_s25 = sphi %s5126_s25, %s7316_s25   ;;  %s5059_s24 = sphi %s5124_s24, %s7315_s24   ;;  %s5055_s23 = sphi %s5122_s23, %s7314_s23   ;;  %s5051_s22 = sphi %s5120_s22, %s7313_s22   ;;  %s5047_s21 = sphi %s5118_s21, %s7312_s21  }
   0x7   : > { %s40_s29 = sadd.s32 1, %s5063_s25  ;;  %s194_s30 = sadd.s32 1, %s5055_s23 }
   0x8   : > { %p42_p0 = scmp.ge.s32.totalorder %s40_s29, 2  ;;  %p204_p1 = scmp.ne.s32.totalorder %s5055_s23, %s5051_s22 }
   0x9   : > { %p205_p2 = scmp.eq.s32.totalorder %s4486_s27, 1  ;;  %p210_p3 = scmp.ne.s32.totalorder %s5051_s22, %s5047_s21 }
   0xa   : > { %s7318_s29 = smov (%p42_p0, %s40_s29), 0  ;;  %p211_p5 = scmp.eq.s32.totalorder %s4487_s28, 1 }
   0xb   : > { %p5158_p4 = por %p205_p2, %p204_p1  ;;  %s187_s8 = ssub.s32 %s5063_s25, %s7318_s29 }
   0xc   : > { %p4488_p6 = scmp.ge.s32.totalorder %s5067_s26, 1  ;;  %p192_p7 = scmp.eq.s32.totalorder %s187_s8, 0 }
   0xd   : > { %s7261_s7 = scalar_select %p5158_p4, 1, 0 }
   0xe   : > { %p5165_p8 = por %p211_p5, %p210_p3  ;;  %p218_p9 = scmp.lt.s32.totalorder %s5067_s26, 3 }
   0xf   : > { %s5171_s10 = scalar_select %p192_p7, %s5055_s23, %s194_s30  }
  0x10   : > { %s7262_s9 = scalar_select %p5165_p8, 1, 0 }
  0x11   : > { %p5173_p10 = pnand %p4488_p6, %p218_p9  ;;  %p5177_p11 = scmp.eq.s32.totalorder %s4486_s27, 0 }
  0x12   : > { %s242_s15 = sshll.u32 %s7242_s1, 4  ;;  %s231_s18 = sshll.u32 %s7241_s0, 4  ;;  %s243_s15 = int_to_ptr.vmem [resolvable:$true] %s242_s15  ;;  %s232_s18 = int_to_ptr.vmem [resolvable:$true] %s231_s18 }
  0x13   : > { %s7263_s11 = scalar_select %p5173_p10, 1, 0 }
  0x14   : > { %s7264_s12 = scalar_select %p5177_p11, 1, 0 }
  0x15   : > { %p4781_p12 = pneg %p5173_p10  ;;  %s253_s28 = sshll.u32 %s7243_s2, 4  ;;  %s254_s28 = int_to_ptr.vmem [resolvable:$true] %s253_s28 }
  0x16   : > { %s4936_s30 = scalar_lea.vmem %s243_s15, 16  ;;  %p4944_p5 = scmp.lt.s32.totalorder %s243_s15, %s243_s15 }
  0x17   : > { %p5191_p13 = pnand %p5177_p11, %p4781_p12  ;;  %p4937_p0 = scmp.ne.s32.totalorder %s243_s15, %s4936_s30 }
  0x18   : > { %p4945_p6 = scmp.lt.s32.totalorder %s4936_s30, %s4936_s30 }
  0x19   : > { %p4938_p1 = pneg %p5191_p13 }
  0x1a   : > { %p4946_p7 = por %p4945_p6, %p4944_p5 }
  0x1b   : > { %p4939_p2 = pnand %p4938_p1, %p4937_p0 }
  0x1d   : > { %p4940_p3 = pneg %p4939_p2 }
  0x1f   : > { %p4947_p9 = pnand %p4946_p7, %p4940_p3 }
  0x21   : > { %4950 = shalt.err (!%p4947_p9)
}
  0x22   : > { %s5069_s8 = smov [#allocation5]   ;;  %s4951_s13 = scalar_lea.vmem %s232_s18, 16 }
  0x23   : > { %4787 = dma.vmem_to_smem (!%p5191_p13), %s243_s15, 16, %s5069_s8, [#allocation6]  }
  0x24   : > { %p4952_p12 = scmp.ne.s32.totalorder %s232_s18, %s4951_s13  ;;  %p4959_p11 = scmp.lt.s32.totalorder %s232_s18, %s232_s18 }
  0x25   : > { %p4960_p10 = scmp.lt.s32.totalorder %s4951_s13, %s4951_s13 }
  0x26   : > { %p4954_p8 = pnand %p4952_p12, %p4938_p1 }
  0x27   : > { %p4961_p0 = por %p4960_p10, %p4959_p11 }
  0x28   : > { %p4955_p4 = pneg %p4954_p8 }
  0x2a   : > { %p4962_p2 = pnand %p4961_p0, %p4955_p4 }
  0x2c   : > { %4965 = shalt.err (!%p4962_p2)
}
  0x2d   : > { %s5070_s14 = smov [#allocation2]   ;;  %s4966_s16 = scalar_lea.vmem %s254_s28, 16 }
  0x2e   : > { %4784 = dma.vmem_to_smem (!%p5191_p13), %s232_s18, 16, %s5070_s14, [#allocation4]  }
  0x2f   : > { %p4967_p3 = scmp.ne.s32.totalorder %s254_s28, %s4966_s16  ;;  %p4974_p7 = scmp.lt.s32.totalorder %s254_s28, %s254_s28 }
  0x30   : > { %p4975_p9 = scmp.lt.s32.totalorder %s4966_s16, %s4966_s16 }
  0x31   : > { %p4969_p5 = pnand %p4967_p3, %p4938_p1 }
  0x32   : > { %p4976_p8 = por %p4975_p9, %p4974_p7 }
  0x33   : > { %p4970_p6 = pneg %p4969_p5 }
  0x35   : > { %p4977_p12 = pnand %p4976_p8, %p4970_p6 }
  0x37   : > { %4980 = shalt.err (!%p4977_p12)
}
  0x38   : > { %s5071_s15 = smov [#allocation7]   ;;  %p7266_p4 = scmp.ne.s32.totalorder %s7263_s11, 0 }
  0x39   : > { %4790 = dma.vmem_to_smem (!%p5191_p13), %s254_s28, 16, %s5071_s15, [#allocation6]  }
  0x3a   : > { %292 = sbr.rel (%p7266_p4) target bundleno = 643 (0x283), region = 44  ;;  %p7267_p10 = scmp.ne.s32.totalorder (!%p7266_p4), %s7264_s12, 0 }
  0x41   : > { %5034 = dma.done.wait (%p7267_p10), [#allocation4], 16  }
  0x42   : > { %5036 = vsyncadd (%p7267_p10), [#allocation4], 4294967280 }
  0x43   : > { %5038 = dma.done.wait (%p7267_p10), [#allocation6], 32  }
  0x44   : > { %5040 = vsyncadd (%p7267_p10), [#allocation6], 4294967264 }
  0x45   : > { %306 = sfence }
  0x46   : > { %p341_p11 = scmp.lt.s32.totalorder %s5059_s24, 1  ;;  %v5072_v0 = vmov 0   ;;  %v367_v2 = vlaneseq  ;;  %v365_v6 = vld [vmem:[%s7245_s4] sm:$0x3]  ;;  %s860_s28 = sld [smem:[#allocation5]] }
  0x47   : > { %4863 = vset.pattern.permute.xlu0 %v5072_v0  ;;  %s4544_s30 = sld [smem:[#allocation5 + $0x1]]  ;;  %s5260_s8 = sld [smem:[#allocation5 + $0x2]]  ;;  %v5073_v42 = vmov 2102212464   ;;  %v7257_v44 = vmov 920167782  }
  0x48   : > { %s342_s11 = scalar_select %p341_p11, %s5059_s24, 1  ;;  %v5230_v3 = vshrl.u32 %v367_v2, 7  ;;  %v5075_v50 = vmov 683565275   ;;  %v5076_v52 = vmov 2475754826  }
  0x49   : > { %v5077_v55 = vmov 2131351028   ;;  %s338_s13 = sand.u32 1, %s5051_s22   ;;  %s5565_s16 = sld [smem:[#allocation2]] }
  0x4a   : > { %s4499_s17 = sshll.u32 %s342_s11, 2  ;;  %v7253_v4 = vsub.s32 0, %v5230_v3  ;;  %v7252_v5 = vsub.s32 1, %v5230_v3  ;;  %s4693_s14 = smul.u32 320, %s338_s13 }
  0x4b   : > { %s347_s20 = scalar_lea.vmem %s7244_s3, %s4499_s17  ;;  %s5568_s15 = sld [smem:[#allocation2 + $0x1]] }
  0x4c   : > { %v359_v1 = vld [vmem:[%s347_s20] sm:$0xf]  ;;  %v5239_v7 = vrot.slane %v365_v6, %v7253_v4  ;;  %v5243_v8 = vrot.slane %v365_v6, %v7252_v5  ;;  %v861_v9 = vstv %s860_s28  ;;  %s5570_s11 = scalar_lea.vmem [#allocation8], %s4693_s14  ;;  %s6007_s17 = sld [smem:[#allocation5 + $0x3]] }
  0x4d   : > { %362 = vperm.xlu0 %4863, %v359_v1   ;;  %v1295_v10 = vstv %s4544_s30  ;;  %v1729_v41 = vstv %s5260_s8  ;;  %v7259_v1 = vmov 1326507024   ;;  %s6105_s18 = sld [smem:[#allocation7]]  ;;  %s6365_s12 = sld [smem:[#allocation7 + $0x1]] }
  0x4e   : > { %v5246_v11 = vmul.f32 %v861_v9, %v5239_v7  ;;  %v5249_v12 = vmul.f32 %v861_v9, %v5243_v8  ;;  %v5252_v13 = vmul.f32 %v1295_v10, %v5239_v7  ;;  %v5258_v22 = vmul.f32 %v1295_v10, %v5243_v8  ;;  %s6537_s27 = sld [smem:[#allocation7 + $0x2]]  ;;  %s6797_s28 = sld [smem:[#allocation7 + $0x3]] }
  0x4f   : > { %s4766_s30 = smul.u32 5120, %s5059_s24  ;;  %s4350_s8 = sshll.u32 %s5570_s11, 4  ;;  %s7187_s8 = int_to_ptr.vmem [resolvable:$true] %s4350_s8 }
  0x50   : > { %v867_v14 = vand.u32 2139095040, %v5246_v11  ;;  %v970_v15 = vand.u32 2139095040, %v5249_v12  ;;  %v1301_v16 = vand.u32 2139095040, %v5252_v13  ;;  %v1404_v27 = vand.u32 2139095040, %v5258_v22  ;;  %p7310_p1 = scmp.ne.s32.totalorder %s7261_s7, 0 }
  0x51   : > { %v864_v38 = vand.u32 2147483647, %v5246_v11  ;;  %v967_v39 = vand.u32 2147483647, %v5249_v12  ;;  %v1298_v40 = vand.u32 2147483647, %v5252_v13 }
  0x52   : > { %v868_v17 = vshrl.u32 %v867_v14, 23  ;;  %v971_v18 = vshrl.u32 %v970_v15, 23  ;;  %v1302_v19 = vshrl.u32 %v1301_v16, 23  ;;  %v5276_v37 = vshrl.u32 %v1404_v27, 23 }
  0x53   : > { %v871_v48 = vand.u32 8388607, %v864_v38 }
  0x54   : > { %v4524_v20 = vadd.s32 4294967169, %v868_v17  ;;  %v4528_v21 = vadd.s32 4294967169, %v971_v18  ;;  %v4545_v23 = vadd.s32 4294967169, %v1302_v19  ;;  %v974_v17 = vand.u32 8388607, %v967_v39 }
  0x55   : > { %v872_v59 = vor.u32 8388608, %v871_v48 }
  0x56   : > { %v874_v24 = vadd.s32 1, %v4524_v20  ;;  %v977_v25 = vadd.s32 1, %v4528_v21  ;;  %v1308_v26 = vadd.s32 1, %v4545_v23 }
  0x57   : > { %v912_v6 = vshll.u32 %v872_v59, 8 }
  0x58   : > { %vm875_vm0 = vcmp.gt.s32.totalorder %v874_v24, 0  ;;  %vm978_vm1 = vcmp.gt.s32.totalorder %v977_v25, 0  ;;  %vm1309_vm2 = vcmp.gt.s32.totalorder %v1308_v26, 0 }
  0x59   : > { %v876_v28 = vsel %vm875_vm0, %v874_v24, 0  ;;  %v979_v29 = vsel %vm978_vm1, %v977_v25, 0  ;;  %v5263_v30 = vsel %vm1309_vm2, %v1308_v26, 0 }
  0x5a   : > { %v878_v31 = vand.u32 31, %v876_v28  ;;  %v5265_v32 = vand.u32 31, %v979_v29  ;;  %v5268_v33 = vand.u32 31, %v5263_v30  ;;  %v877_v49 = vshrl.u32 %v876_v28, 5 }
  0x5b   : > { %v980_v18 = vshrl.u32 %v979_v29, 5 }
  0x5c   : > { %v879_v34 = vsub.s32 32, %v878_v31  ;;  %v5271_v35 = vsub.s32 32, %v5265_v32  ;;  %v5274_v36 = vsub.s32 32, %v5268_v33  ;;  %v890_v43 = vshll.u32 %v5073_v42, %v878_v31 }
  0x5d   : > { %v993_v46 = vshll.u32 %v5073_v42, %v5265_v32  ;;  %v881_v51 = vshll.u32 %v5075_v50, %v878_v31  ;;  %v884_v54 = vshll.u32 %v5076_v52, %v878_v31  ;;  %v887_v57 = vshll.u32 %v5077_v55, %v878_v31 }
  0x5e   : > { %v891_v45 = vshrl.u32 %v7257_v44, %v879_v34  ;;  %v994_v47 = vshrl.u32 %v7257_v44, %v5271_v35  ;;  %v882_v53 = vshrl.u32 %v5076_v52, %v879_v34  ;;  %v885_v56 = vshrl.u32 %v5077_v55, %v879_v34 }
  0x5f   : > { %v888_v58 = vshrl.u32 %v5073_v42, %v879_v34  ;;  %v893_v62 = vshll.u32 %v7257_v44, %v878_v31  ;;  %v894_v2 = vshrl.u32 %v7259_v1, %v879_v34  ;;  %vm896_vm3 = vcmp.lt.s32.totalorder %v877_v49, 1 }
  0x60   : > { %v883_v60 = vor.u32 %v882_v53, %v881_v51  ;;  %v892_v61 = vor.u32 %v891_v45, %v890_v43  ;;  %v886_v63 = vor.u32 %v885_v56, %v884_v54  ;;  %vm897_vm4 = vcmp.lt.s32.totalorder %v877_v49, 2 }
  0x61   : > { %v889_v0 = vor.u32 %v888_v58, %v887_v57  ;;  %vm898_vm5 = vcmp.lt.s32.totalorder %v877_v49, 3  ;;  %vm899_vm6 = vcmp.lt.s32.totalorder %v877_v49, 4  ;;  %v895_v9 = vor.u32 %v894_v2, %v893_v62 }
  0x62   : > { %v904_v10 = vsel %vm896_vm3, %v883_v60, %v886_v63  ;;  %v905_v14 = vsel %vm899_vm6, %v892_v61, 920167782  ;;  %v984_v19 = vshll.u32 %v5075_v50, %v5265_v32  ;;  %v880_v20 = vshrl.u32 %v5075_v50, %v879_v34 }
  0x63   : > { %v908_v15 = vsel %vm896_vm3, %v886_v63, %v889_v0  ;;  %v906_v16 = vsel %vm898_vm5, %v889_v0, %v905_v14  ;;  %v909_v23 = vsel %vm899_vm6, %v895_v9, 1326507024  ;;  %v983_v24 = vshrl.u32 %v5075_v50, %v5271_v35 }
  0x64   : > { %v907_v21 = vsel %vm897_vm4, %v904_v10, %v906_v16  ;;  %v901_v25 = vsel %vm899_vm6, %v889_v0, 2102212464  ;;  %v910_v26 = vsel %vm898_vm5, %v892_v61, %v909_v23  ;;  %v900_v29 = vsel %vm896_vm3, %v880_v20, %v883_v60 }
  0x65   : > { %v5310_v27 = vmul.u32.u64.low %v912_v6, %v907_v21  ;;  %v5311_v28 = vmul.u32.u64.high %v912_v6, %v907_v21, %v5310_v27  ;;  %v902_v31 = vsel %vm898_vm5, %v886_v63, %v901_v25  ;;  %v911_v43 = vsel %vm897_vm4, %v908_v15, %v910_v26 }
  0x66   : > { %v975_v34 = vor.u32 8388608, %v974_v17  ;;  %v903_v45 = vsel %vm897_vm4, %v900_v29, %v902_v31  ;;  %v5318_v48 = vmul.u32.u64.low %v912_v6, %v911_v43  ;;  %v5319_v51 = vmul.u32.u64.high %v912_v6, %v911_v43, %v5318_v48 }
  0x67   : > { %v985_v53 = vshrl.u32 %v5076_v52, %v5271_v35  ;;  %v919_v54 = vmul.u32 %v912_v6, %v903_v45  ;;  %v987_v56 = vshll.u32 %v5076_v52, %v5265_v32  ;;  %v988_v57 = vshrl.u32 %v5077_v55, %v5271_v35 }
  0x68   : > { %v990_v58 = vshll.u32 %v5077_v55, %v5265_v32  ;;  %v922_v59 = vadd.s32 1, %v5311_v28  ;;  %v991_v60 = vshrl.u32 %v5073_v42, %v5271_v35  ;;  %v995_v61 = vor.u32 %v994_v47, %v993_v46 }
  0x69   : > { %v986_v49 = vor.u32 %v985_v53, %v984_v19  ;;  %v989_v62 = vor.u32 %v988_v57, %v987_v56  ;;  %v996_v63 = vshll.u32 %v7257_v44, %v5265_v32  ;;  %v997_v0 = vshrl.u32 %v7259_v1, %v5271_v35 }
  0x6a   : > { %vm999_vm7 = vcmp.lt.s32.totalorder %v980_v18, 1  ;;  %vm921_vm8 = vc.u32 %v5319_v51, %v5310_v27  ;;  %v992_v2 = vor.u32 %v991_v60, %v990_v58  ;;  %vm1000_vm9 = vcmp.lt.s32.totalorder %v980_v18, 2 }
  0x6b   : > { %vm1001_vm10 = vcmp.lt.s32.totalorder %v980_v18, 3  ;;  %v923_v6 = vsel %vm921_vm8, %v922_v59, %v5311_v28  ;;  %v998_v9 = vor.u32 %v997_v0, %v996_v63  ;;  %vm1002_vm11 = vcmp.lt.s32.totalorder %v980_v18, 4 }
  0x6c   : > { %v1003_v10 = vsel %vm999_vm7, %v983_v24, %v986_v49  ;;  %v924_v46 = vadd.s32 %v923_v6, %v919_v54  ;;  %v1004_v47 = vsel %vm1002_vm11, %v992_v2, 2102212464  ;;  %v1007_v14 = vsel %vm999_vm7, %v986_v49, %v989_v62 }
  0x6d   : > { %v1008_v15 = vsel %vm1002_vm11, %v995_v61, 920167782  ;;  %v1005_v32 = vsel %vm1001_vm10, %v989_v62, %v1004_v47  ;;  %v1011_v16 = vsel %vm999_vm7, %v989_v62, %v992_v2  ;;  %v1012_v17 = vsel %vm1002_vm11, %v998_v9, 1326507024 }
  0x6e   : > { %v1009_v35 = vsel %vm1001_vm10, %v992_v2, %v1008_v15  ;;  %v925_v19 = vadd.s32 536870912, %v924_v46  ;;  %v1006_v20 = vsel %vm1000_vm9, %v1003_v10, %v1005_v32  ;;  %v1013_v23 = vsel %vm1001_vm10, %v995_v61, %v1012_v17 }
  0x6f   : > { %v1010_v21 = vsel %vm1000_vm9, %v1007_v14, %v1009_v35  ;;  %v1014_v25 = vsel %vm1000_vm9, %v1011_v16, %v1013_v23  ;;  %v1015_v24 = vshll.u32 %v975_v34, 8  ;;  %v1305_v26 = vand.u32 8388607, %v1298_v40 }
  0x70   : > { %v1311_v28 = vshrl.u32 %v5263_v30, 5  ;;  %v5348_v29 = vshrl.u32 %v925_v19, 30  ;;  %v1314_v31 = vshrl.u32 %v5075_v50, %v5274_v36  ;;  %v1315_v43 = vshll.u32 %v5075_v50, %v5268_v33 }
  0x71   : > { %v1316_v45 = vshrl.u32 %v5076_v52, %v5274_v36  ;;  %v5356_v48 = vmul.u32.u64.low %v1015_v24, %v1014_v25  ;;  %v5357_v18 = vmul.u32.u64.high %v1015_v24, %v1014_v25, %v5356_v48  ;;  %v1022_v54 = vmul.u32 %v1015_v24, %v1006_v20 }
  0x72   : > { %v5359_v34 = vmul.u32.u64.low %v1015_v24, %v1010_v21  ;;  %v5360_v53 = vmul.u32.u64.high %v1015_v24, %v1010_v21, %v5359_v34  ;;  %v927_v30 = vshll.u32 %v5348_v29, 30  ;;  %v1306_v56 = vor.u32 8388608, %v1305_v26 }
  0x73   : > { %v1317_v57 = vor.u32 %v1316_v45, %v1315_v43  ;;  %v1318_v58 = vshll.u32 %v5076_v52, %v5268_v33  ;;  %v1319_v59 = vshrl.u32 %v5077_v55, %v5274_v36  ;;  %v1321_v49 = vshll.u32 %v5077_v55, %v5268_v33 }
  0x74   : > { %v1322_v60 = vshrl.u32 %v5073_v42, %v5274_v36  ;;  %v928_v61 = vsub.s32 %v924_v46, %v927_v30  ;;  %v1324_v62 = vshll.u32 %v5073_v42, %v5268_v33  ;;  %v1325_v63 = vshrl.u32 %v7257_v44, %v5274_v36 }
  0x75   : > { %v1327_v0 = vshll.u32 %v7257_v44, %v5268_v33  ;;  %vm1024_vm12 = vc.u32 %v5357_v18, %v5359_v34  ;;  %v1025_v2 = vadd.s32 1, %v5360_v53  ;;  %v1320_v6 = vor.u32 %v1319_v59, %v1318_v58 }
  0x76   : > { %v1323_v9 = vor.u32 %v1322_v60, %v1321_v49  ;;  %v930_v10 = vsub.s32 0, %v928_v61  ;;  %v1326_v47 = vor.u32 %v1325_v63, %v1324_v62  ;;  %v1328_v46 = vshrl.u32 %v7259_v1, %v5274_v36 }
  0x77   : > { %vm1330_vm13 = vcmp.lt.s32.totalorder %v1311_v28, 1  ;;  %v1026_v14 = vsel %vm1024_vm12, %v1025_v2, %v5360_v53  ;;  %vm1331_vm14 = vcmp.lt.s32.totalorder %v1311_v28, 2  ;;  %vm1332_vm15 = vcmp.lt.s32.totalorder %v1311_v28, 3 }
  0x78   : > { %vm1333_vm0 = vcmp.lt.s32.totalorder %v1311_v28, 4  ;;  %v4525_v15 = vmin.u32 %v930_v10, %v928_v61  ;;  %v1027_v33 = vadd.s32 %v1026_v14, %v1022_v54  ;;  %v1329_v32 = vor.u32 %v1328_v46, %v1327_v0 }
  0x79   : > { %v1334_v35 = vsel %vm1330_vm13, %v1314_v31, %v1317_v57  ;;  %v1335_v16 = vsel %vm1333_vm0, %v1323_v9, 2102212464  ;;  %v1338_v17 = vsel %vm1330_vm13, %v1317_v57, %v1320_v6  ;;  %v1339_v19 = vsel %vm1333_vm0, %v1326_v47, 920167782 }
  0x7a   : > { %v1342_v20 = vsel %vm1330_vm13, %v1320_v6, %v1323_v9  ;;  %v932_v21 = vclz %v4525_v15  ;;  %v1028_v23 = vadd.s32 536870912, %v1027_v33  ;;  %v1336_v25 = vsel %vm1332_vm15, %v1320_v6, %v1335_v16 }
  0x7b   : > { %v1340_v36 = vsel %vm1332_vm15, %v1323_v9, %v1339_v19  ;;  %v1343_v26 = vsel %vm1333_vm0, %v1329_v32, 1326507024  ;;  %v1346_v43 = vshll.u32 %v1306_v56, 8  ;;  %v4549_v45 = vadd.s32 4294967169, %v5276_v37 }
  0x7c   : > { %v1341_v24 = vsel %vm1331_vm14, %v1338_v17, %v1340_v36  ;;  %v4526_v48 = vadd.s32 4294967294, %v932_v21  ;;  %v5388_v53 = vshrl.u32 %v1028_v23, 30  ;;  %v1344_v31 = vsel %vm1332_vm15, %v1326_v47, %v1343_v26 }
  0x7d   : > { %v5394_v30 = vmul.f32 %v1729_v41, %v5239_v7  ;;  %v1337_v54 = vsel %vm1331_vm14, %v1334_v35, %v1336_v25  ;;  %v1345_v57 = vsel %vm1331_vm14, %v1342_v20, %v1344_v31  ;;  %v920_v60 = vadd.s32 %v5310_v27, %v5319_v51 }
  0x7e   : > { %v5398_v58 = vmul.u32.u64.low %v1346_v43, %v1341_v24  ;;  %v5399_v59 = vmul.u32.u64.high %v1346_v43, %v1341_v24, %v5398_v58  ;;  %vm4527_vm1 = vcmp.lt.s32.totalorder %v4526_v48, 0  ;;  %v1030_v37 = vshll.u32 %v5388_v53, 30 }
  0x7f   : > { %v5403_v56 = vmul.u32.u64.low %v1346_v43, %v1345_v57  ;;  %v5404_v49 = vmul.u32.u64.high %v1346_v43, %v1345_v57, %v5403_v56  ;;  %v935_v62 = vsel %vm4527_vm1, 0, %v4526_v48  ;;  %v1411_v63 = vadd.s32 1, %v4549_v45 }
  0x80   : > { %v936_v0 = vsub.s32 32, %v935_v62  ;;  %v940_v2 = vsub.s32 4294967266, %v935_v62  ;;  %v1031_v6 = vsub.s32 %v1027_v33, %v1030_v37  ;;  %v937_v28 = vshll.u32 %v928_v61, %v935_v62 }
  0x81   : > { %v1353_v9 = vmul.u32 %v1346_v43, %v1337_v54  ;;  %v1356_v10 = vadd.s32 1, %v5399_v59  ;;  %v1735_v15 = vand.u32 2139095040, %v5394_v30  ;;  %vm1355_vm2 = vc.u32 %v5404_v49, %v5398_v58 }
  0x82   : > { %v938_v47 = vshrl.u32 %v920_v60, %v936_v0  ;;  %v941_v46 = vadd.s32 127, %v940_v2  ;;  %v1033_v14 = vsub.s32 0, %v1031_v6  ;;  %vm1412_vm3 = vcmp.gt.s32.totalorder %v1411_v63, 0 }
  0x83   : > { %v1357_v35 = vsel %vm1355_vm2, %v1356_v10, %v5399_v59  ;;  %v1736_v19 = vshrl.u32 %v1735_v15, 23  ;;  %v1413_v21 = vsel %vm1412_vm3, %v1411_v63, 0  ;;  %v1401_v36 = vand.u32 2147483647, %v5258_v22 }
  0x84   : > { %v939_v32 = vor.u32 %v938_v47, %v937_v28  ;;  %v942_v27 = vshll.u32 %v941_v46, 23  ;;  %v4529_v51 = vmin.u32 %v1033_v14, %v1031_v6  ;;  %v1358_v16 = vadd.s32 %v1357_v35, %v1353_v9 }
  0x85   : > { %v1415_v43 = vand.u32 31, %v1413_v21  ;;  %v4566_v45 = vadd.s32 4294967169, %v1736_v19  ;;  %vm866_vm4 = vcmp.lt.s32.totalorder %v5246_v11, 0  ;;  %v1023_v48 = vadd.s32 %v5359_v34, %v5357_v18 }
  0x86   : > { %v943_v33 = vor.u32 4788187, %v942_v27  ;;  %v946_v61 = vcvt.s32.f32 %v939_v32  ;;  %v1035_v17 = vclz %v4529_v51  ;;  %v1359_v20 = vadd.s32 536870912, %v1358_v16 }
  0x87   : > { %vm5421_vm6 = vcmp.le.f32.partialorder %v864_v38, 0.7853982  ;;  %v5427_v59 = vand.u32 8388607, %v1401_v36  ;;  %v1416_v34 = vsub.s32 32, %v1415_v43  ;;  %v5432_v63 = vadd.s32 1, %v4566_v45 }
  0x88   : > { %v944_v23 = vand.u32 2147483647, %v943_v33  ;;  %v4530_v25 = vadd.s32 4294967294, %v1035_v17  ;;  %v5414_v26 = vshrl.u32 %v1359_v20, 30  ;;  %v5437_v28 = vshrl.u32 %v1413_v21, 5 }
  0x89   : > { %v1418_v10 = vshll.u32 %v5075_v50, %v1415_v43  ;;  %v950_v47 = vsub.s32 4, %v5348_v29  ;;  %v1053_v15 = vsub.s32 4, %v5388_v53  ;;  %v1419_v27 = vshrl.u32 %v5076_v52, %v1416_v34 }
  0x8a   : > { %v947_v24 = vmul.f32 %v946_v61, %v944_v23  ;;  %vm4531_vm5 = vcmp.lt.s32.totalorder %v4530_v25, 0  ;;  %v1361_v18 = vshll.u32 %v5414_v26, 30  ;;  %v1424_v51 = vshll.u32 %v5077_v55, %v1415_v43 }
  0x8b   : > { %v1038_v57 = vsel %vm4531_vm5, 0, %v4530_v25  ;;  %v951_v35 = vsel %vm866_vm4, %v950_v47, %v5348_v29  ;;  %vm969_vm7 = vcmp.lt.s32.totalorder %v5249_v12, 0  ;;  %v1425_v20 = vshrl.u32 %v5073_v42, %v1416_v34 }
  0x8c   : > { %v948_v54 = vxor.u32 2147483648, %v947_v24  ;;  %v1039_v37 = vsub.s32 32, %v1038_v57  ;;  %v1040_v56 = vshll.u32 %v1031_v6, %v1038_v57  ;;  %v1043_v60 = vsub.s32 4294967266, %v1038_v57 }
  0x8d   : > { %v5439_v9 = vsub.s32 %v1358_v16, %v1361_v18  ;;  %v1409_v6 = vor.u32 8388608, %v5427_v59  ;;  %v953_v61 = vsel %vm5421_vm6, 0, %v951_v35  ;;  %v1054_v17 = vsel %vm969_vm7, %v1053_v15, %v5388_v53 }
  0x8e   : > { %v949_v62 = vsel %vm866_vm4, %v948_v54, %v947_v24  ;;  %v1041_v0 = vshrl.u32 %v1023_v48, %v1039_v37  ;;  %v1044_v2 = vadd.s32 127, %v1043_v60  ;;  %vm5461_vm8 = vcmp.le.f32.partialorder %v967_v39, 0.7853982 }
  0x8f   : > { %v952_v38 = vsel %vm5421_vm6, %v5246_v11, %v949_v62  ;;  %v1364_v32 = vsub.s32 0, %v5439_v9  ;;  %v1421_v23 = vshll.u32 %v5076_v52, %v1415_v43  ;;  %v1422_v25 = vshrl.u32 %v5077_v55, %v1416_v34 }
  0x90   : > { %4864 = vcosq.f32 %v952_v38  ;;  %v1042_v46 = vor.u32 %v1041_v0, %v1040_v56  ;;  %v1045_v14 = vshll.u32 %v1044_v2, 23  ;;  %v1056_v24 = vsel %vm5461_vm8, 0, %v1054_v17 }
  0x91   : > { %4866 = vsinq.f32 %v952_v38  ;;  %v4546_v19 = vmin.u32 %v1364_v32, %v5439_v9  ;;  %v1427_v53 = vshll.u32 %v5073_v42, %v1415_v43  ;;  %v1428_v45 = vshrl.u32 %v7257_v44, %v1416_v34 }
  0x92   : > { %v1046_v16 = vor.u32 4788187, %v1045_v14  ;;  %v1049_v33 = vcvt.s32.f32 %v1042_v46  ;;  %v1430_v48 = vshll.u32 %v7257_v44, %v1415_v43  ;;  %v1163_v54 = vadd.s32 3, %v953_v61 }
  0x93   : > { %v1366_v39 = vclz %v4546_v19  ;;  %v1431_v57 = vshrl.u32 %v7259_v1, %v1416_v34  ;;  %v1354_v37 = vadd.s32 %v5398_v58, %v5404_v49  ;;  %v1417_v56 = vshrl.u32 %v5075_v50, %v1416_v34 }
  0x94   : > { %v1047_v29 = vand.u32 2147483647, %v1046_v16  ;;  %v1420_v60 = vor.u32 %v1419_v27, %v1418_v10  ;;  %v1426_v62 = vor.u32 %v1425_v20, %v1424_v51  ;;  %v1267_v38 = vadd.s32 3, %v1056_v24 }
  0x95   : > { %v1423_v0 = vor.u32 %v1422_v25, %v1421_v23  ;;  %vm1436_vm9 = vcmp.lt.s32.totalorder %v5437_v28, 4  ;;  %v5477_v47 = vand.u32 3, %v953_v61  ;;  %v1429_v43 = vor.u32 %v1428_v45, %v1427_v53 }
  0x96   : > { %v1050_v31 = vmul.f32 %v1049_v33, %v1047_v29  ;;  %vm1433_vm10 = vcmp.lt.s32.totalorder %v5437_v28, 1  ;;  %v1438_v46 = vsel %vm1436_vm9, %v1426_v62, 2102212464  ;;  %v1164_v49 = vand.u32 3, %v1163_v54 }
  0x97   : > { %v4547_v34 = vadd.s32 4294967294, %v1366_v39  ;;  %v1432_v10 = vor.u32 %v1431_v57, %v1430_v48  ;;  %v5487_v32 = vand.u32 3, %v1056_v24  ;;  %vm1434_vm11 = vcmp.lt.s32.totalorder %v5437_v28, 2 }
  0x98   : > { %v1051_v18 = vxor.u32 2147483648, %v1050_v31  ;;  %vm1435_vm12 = vcmp.lt.s32.totalorder %v5437_v28, 3  ;;  %v5491_v27 = vand.u32 3, %v1267_v38  ;;  %v1437_v51 = vsel %vm1433_vm10, %v1417_v56, %v1420_v60 }
  0x99   : > { %v1439_v35 = vsel %vm1435_vm12, %v1423_v0, %v1438_v46  ;;  %vm959_vm13 = vcmp.eq.s32.totalorder %v5477_v47, 0  ;;  %vm958_vm14 = vcmp.lt.s32.totalorder %v5477_v47, 2  ;;  %vm962_vm15 = vcmp.eq.s32.totalorder %v5477_v47, 2 }
  0x9a   : > { %v4865_v2 = vpop.eup %4864  ;;  %v1052_v58 = vsel %vm969_vm7, %v1051_v18, %v1050_v31  ;;  %vm1169_vm0 = vcmp.eq.s32.totalorder %v1164_v49, 2  ;;  %vm4548_vm1 = vcmp.lt.s32.totalorder %v4547_v34, 0  ;;  %vm956_vm2 = vweird.f32 %v5246_v11 }
  0x9b   : > { %v4867_v14 = vpop.eup %4866  ;;  %v1055_v15 = vsel %vm5461_vm8, %v5249_v12, %v1052_v58  ;;  %v963_v33 = vxor.u32 2147483648, %v4865_v2  ;;  %vm1062_vm3 = vcmp.eq.s32.totalorder %v5487_v32, 0  ;;  %vm1065_vm4 = vcmp.eq.s32.totalorder %v5487_v32, 2 }
  0x9c   : > { %4868 = vcosq.f32 %v1055_v15  ;;  %v960_v16 = vxor.u32 2147483648, %v4867_v14  ;;  %vm1165_vm5 = vcmp.lt.s32.totalorder %v1164_v49, 2  ;;  %v1369_v61 = vsel %vm4548_vm1, 0, %v4547_v34 }
  0x9d   : > { %4870 = vsinq.f32 %v1055_v15  ;;  %vm1061_vm6 = vcmp.lt.s32.totalorder %v5487_v32, 2  ;;  %vm1166_vm7 = vcmp.eq.s32.totalorder %v1164_v49, 0  ;;  %v1370_v17 = vsub.s32 32, %v1369_v61 }
  0x9e   : > { %v1371_v19 = vshll.u32 %v5439_v9, %v1369_v61  ;;  %v1374_v20 = vsub.s32 4294967266, %v1369_v61  ;;  %v961_v21 = vsel %vm959_vm13, %v4865_v2, %v960_v16  ;;  %v964_v29 = vsel %vm962_vm15, %v963_v33, %v4867_v14 }
  0x9f   : > { %vm1059_vm8 = vweird.f32 %v5249_v12  ;;  %v1171_v23 = vsel %vm1169_vm0, %v963_v33, %v4867_v14  ;;  %v1441_v25 = vsel %vm1433_vm10, %v1420_v60, %v1423_v0  ;;  %v1372_v24 = vshrl.u32 %v1354_v37, %v1370_v17 }
  0xa0   : > { %v1375_v53 = vadd.s32 127, %v1374_v20  ;;  %v1442_v45 = vsel %vm1436_vm9, %v1429_v43, 920167782  ;;  %v1445_v9 = vsel %vm1433_vm10, %v1423_v0, %v1426_v62  ;;  %v1168_v48 = vsel %vm1166_vm7, %v4865_v2, %v960_v16 }
  0xa1   : > { %v1443_v31 = vsel %vm1435_vm12, %v1426_v62, %v1442_v45  ;;  %v1446_v54 = vsel %vm1436_vm9, %v1432_v10, 1326507024  ;;  %v1449_v39 = vshll.u32 %v1409_v6, 8  ;;  %v1373_v57 = vor.u32 %v1372_v24, %v1371_v19 }
  0xa2   : > { %v1376_v56 = vshll.u32 %v1375_v53, 23  ;;  %v1444_v37 = vsel %vm1434_vm11, %v1441_v25, %v1443_v31  ;;  %v1447_v60 = vsel %vm1435_vm12, %v1429_v43, %v1446_v54  ;;  %vm1273_vm10 = vcmp.eq.s32.totalorder %v5491_v27, 2 }
  0xa3   : > { %v1448_v62 = vsel %vm1434_vm11, %v1445_v9, %v1447_v60  ;;  %v5528_v18 = vmul.u32.u64.low %v1449_v39, %v1444_v37  ;;  %v5529_v38 = vmul.u32.u64.high %v1449_v39, %v1444_v37, %v5528_v18  ;;  %v1440_v0 = vsel %vm1434_vm11, %v1437_v51, %v1439_v35 }
  0xa4   : > { %v1377_v6 = vor.u32 4788187, %v1376_v56  ;;  %v5534_v2 = vmul.u32.u64.low %v1449_v39, %v1448_v62  ;;  %v5535_v46 = vmul.u32.u64.high %v1449_v39, %v1448_v62, %v5534_v2  ;;  %v965_v43 = vsel %vm958_vm14, %v961_v21, %v964_v29 }
  0xa5   : > { %v1172_v34 = vsel %vm1165_vm5, %v1168_v48, %v1171_v23  ;;  %vm1270_vm9 = vcmp.eq.s32.totalorder %v5491_v27, 0  ;;  %vm1269_vm12 = vcmp.lt.s32.totalorder %v5491_v27, 2  ;;  %v1380_v28 = vcvt.s32.f32 %v1373_v57 }
  0xa6   : > { %v4869_v59 = vpop.eup %4868  ;;  %v1378_v15 = vand.u32 2147483647, %v1377_v6  ;;  %v1456_v47 = vmul.u32 %v1449_v39, %v1440_v0  ;;  %v1459_v16 = vadd.s32 1, %v5529_v38  ;;  %v966_v49 = vsel %vm956_vm2, nan, %v965_v43 }
  0xa7   : > { %v4871_v14 = vpop.eup %4870  ;;  %v1066_v58 = vxor.u32 2147483648, %v4869_v59  ;;  %v1173_v61 = vsel %vm956_vm2, nan, %v1172_v34  ;;  %v1384_v27 = vsub.s32 4, %v5414_v26  ;;  %vm1458_vm11 = vc.u32 %v5535_v46, %v5528_v18 }
  0xa8   : > { %v1063_v10 = vxor.u32 2147483648, %v4871_v14  ;;  %v1381_v23 = vmul.f32 %v1380_v28, %v1378_v15  ;;  %v1460_v11 = vsel %vm1458_vm11, %v1459_v16, %v5529_v38  ;;  %vm1300_vm13 = vcmp.lt.s32.totalorder %v5252_v13, 0 }
  0xa9   : > { %v1067_v51 = vsel %vm1065_vm4, %v1066_v58, %v4871_v14  ;;  %v1275_v35 = vsel %vm1273_vm10, %v1066_v58, %v4871_v14  ;;  %v1461_v53 = vadd.s32 %v1460_v11, %v1456_v47  ;;  %v1385_v12 = vsel %vm1300_vm13, %v1384_v27, %v5414_v26 }
  0xaa   : > { %v1064_v33 = vsel %vm1062_vm3, %v4869_v59, %v1063_v10  ;;  %v1272_v17 = vsel %vm1270_vm9, %v4869_v59, %v1063_v10  ;;  %vm1743_vm14 = vcmp.gt.s32.totalorder %v5432_v63, 0  ;;  %v5079_v45 = vmov 839922192  }
  0xab   : > { %v1068_v19 = vsel %vm1061_vm6, %v1064_v33, %v1067_v51  ;;  %v1276_v20 = vsel %vm1269_vm12, %v1272_v17, %v1275_v35  ;;  %v1462_v32 = vadd.s32 536870912, %v1461_v53  ;;  %v601_v9 = vunpack.c.l.s4 %v5079_v45 }
  0xac   : > { %v1069_v21 = vsel %vm1059_vm8, nan, %v1068_v19  ;;  %v1277_v29 = vsel %vm1059_vm8, nan, %v1276_v20  ;;  %v1382_v48 = vxor.u32 2147483648, %v1381_v23  ;;  %vm1299_vm15 = vcmp.le.f32.partialorder %v1298_v40, 0.7853982 }
  0xad   : > { %v1280_v25 = vcombine.low %v966_v49, %v1069_v21  ;;  %v1288_v24 = vcombine.low %v1173_v61, %v1277_v29  ;;  %v1463_v31 = vshrl.u32 %v1462_v32, 30  ;;  %v1387_v54 = vsel %vm1299_vm15, 0, %v1385_v12 }
  0xae   : > { %v7254_v39 = vand.u32 2147483647, %v5394_v30  ;;  %v1744_v57 = vsel %vm1743_vm14, %v5432_v63, 0  ;;  %v602_v26 = vunpack.c.0.s8 %v601_v9  ;;  %v1383_v37 = vsel %vm1300_vm13, %v1382_v48, %v1381_v23 }
  0xaf   : > { %4540 = vst [vmem:[%s5570_s11 + $0x20] sm:$0xff] %v1280_v25  ;;  %4541 = vst [vmem:[%s5570_s11 + $0x28] sm:$0xff] %v1280_v25  ;;  %v1464_v56 = vshll.u32 %v1463_v31, 30  ;;  %v1597_v62 = vadd.s32 3, %v1387_v54  ;;  %v1746_v38 = vand.u32 31, %v1744_v57  ;;  %v390_v59 = vstv %s5565_s16  ;;  %s7185_s16 = scalar_lea.hbm %s7247_s6, %s4766_s30 }
  0xb0   : > { %4542 = vst [vmem:[%s5570_s11 + $0xc0] sm:$0xff] %v1288_v24  ;;  %4543 = vst [vmem:[%s5570_s11 + $0xc8] sm:$0xff] %v1288_v24  ;;  %v5591_v40 = vand.u32 8388607, %v7254_v39  ;;  %v625_v6 = vstv %s5568_s15  ;;  %v1386_v0 = vsel %vm1299_vm15, %v5252_v13, %v1383_v37  ;;  %v5599_v63 = vmul.f32 %v1729_v41, %v5243_v8  ;;  %s7195_s15 = scalar_lea.sflag [#allocation3], %s338_s13 }
  0xb1   : > { %v5586_v60 = vsub.s32 %v1461_v53, %v1464_v56  ;;  %v5602_v14 = vsub.s32 %v602_v26, %v5230_v3  ;;  %v5604_v43 = vand.u32 3, %v1387_v54  ;;  %vm5608_vm0 = vcmp.le.f32.partialorder %v1401_v36, 0.7853982 }
  0xb2   : > { %vm1403_vm1 = vcmp.lt.s32.totalorder %v5258_v22, 0  ;;  %v5615_v34 = vadd.s32 %v5528_v18, %v5535_v46  ;;  %v5618_v10 = vand.u32 3, %v1597_v62  ;;  %v1747_v15 = vsub.s32 32, %v1746_v38 }
  0xb3   : > { %v1467_v2 = vsub.s32 0, %v5586_v60  ;;  %4872 = vcosq.f32 %v1386_v0  ;;  %v1487_v51 = vsub.s32 4, %v1463_v31  ;;  %v5626_v49 = vshrl.u32 %v1744_v57, 5 }
  0xb4   : > { %4874 = vsinq.f32 %v1386_v0  ;;  %v1749_v18 = vshll.u32 %v5075_v50, %v1746_v38  ;;  %v1752_v46 = vshll.u32 %v5076_v52, %v1746_v38  ;;  %v1755_v33 = vshll.u32 %v5077_v55, %v1746_v38 }
  0xb5   : > { %v4550_v41 = vmin.u32 %v1467_v2, %v5586_v60  ;;  %v1758_v61 = vshll.u32 %v5073_v42, %v1746_v38  ;;  %v1750_v27 = vshrl.u32 %v5076_v52, %v1747_v15  ;;  %v1488_v23 = vsel %vm1403_vm1, %v1487_v51, %v1463_v31 }
  0xb6   : > { %v1753_v11 = vshrl.u32 %v5077_v55, %v1747_v15  ;;  %v1756_v53 = vshrl.u32 %v5073_v42, %v1747_v15  ;;  %v5644_v12 = vshll.u32 %v7257_v44, %v1746_v38  ;;  %v5649_v9 = vshrl.u32 %v5075_v50, %v1747_v15 }
  0xb7   : > { %v1469_v20 = vclz %v4550_v41  ;;  %v1759_v48 = vshrl.u32 %v7257_v44, %v1747_v15  ;;  %v1490_v57 = vsel %vm5608_vm0, 0, %v1488_v23  ;;  %v5655_v56 = vshrl.u32 %v7259_v1, %v1747_v15 }
  0xb8   : > { %v5657_v62 = vor.u32 %v1750_v27, %v1749_v18  ;;  %v5659_v38 = vor.u32 %v1753_v11, %v1752_v46  ;;  %v5661_v0 = vor.u32 %v1756_v53, %v1755_v33  ;;  %v5667_v51 = vand.u32 3, %v1490_v57 }
  0xb9   : > { %v4551_v54 = vadd.s32 4294967294, %v1469_v20  ;;  %v5669_v15 = vadd.s32 3, %v1490_v57  ;;  %v5675_v20 = vor.u32 %v1759_v48, %v1758_v61  ;;  %vm1764_vm10 = vcmp.lt.s32.totalorder %v5626_v49, 1 }
  0xba   : > { %vm1766_vm11 = vcmp.lt.s32.totalorder %v5626_v49, 3  ;;  %vm1765_vm15 = vcmp.lt.s32.totalorder %v5626_v49, 2 }
  0xbb   : > { %vm4552_vm2 = vcmp.lt.s32.totalorder %v4551_v54, 0 }
  0xbd   : > { %v5663_v2 = vpop.eup %4872 }
  0xcc   : > { %v363_v28 = vpop.permute.xlu0 %362 }
  0xcd   : > { %v5622_v47 = vmul.f32 %v390_v59, %v363_v28  ;;  %v5624_v16 = vmul.f32 %v625_v6, %v363_v28  ;;  %v5665_v28 = vsel %vm4552_vm2, 0, %v4551_v54 }
  0xce   : > { %v1473_v18 = vsub.s32 32, %v5665_v28  ;;  %v1477_v46 = vsub.s32 4294967266, %v5665_v28 }
  0xcf   : > { %v7256_v17 = vand.u32 2147483647, %v5622_v47  ;;  %v395_v19 = vand.u32 2139095040, %v5622_v47  ;;  %v7255_v21 = vand.u32 2147483647, %v5624_v16  ;;  %v630_v29 = vand.u32 2139095040, %v5624_v16 }
  0xd0   : > { %v5688_v61 = vshrl.u32 %v5615_v34, %v1473_v18  ;;  %v5692_v57 = vadd.s32 127, %v1477_v46 }
  0xd1   : > { %v396_v25 = vshrl.u32 %v395_v19, 23  ;;  %v399_v24 = vand.u32 8388607, %v7256_v17  ;;  %v631_v32 = vshrl.u32 %v630_v29, 23  ;;  %v634_v45 = vand.u32 8388607, %v7255_v21  ;;  %v5671_v19 = vpop.eup %4874 }
  0xd3   : > { %v4500_v31 = vadd.s32 4294967169, %v396_v25  ;;  %v400_v26 = vor.u32 8388608, %v399_v24  ;;  %v4512_v37 = vadd.s32 4294967169, %v631_v32  ;;  %v635_v6 = vor.u32 8388608, %v634_v45 }
  0xd5   : > { %v402_v59 = vadd.s32 1, %v4500_v31  ;;  %v637_v41 = vadd.s32 1, %v4512_v37  ;;  %v5677_v27 = vshll.u32 %v400_v26, 8  ;;  %v5681_v24 = vshll.u32 %v635_v6, 8 }
  0xd7   : > { %vm403_vm3 = vcmp.gt.s32.totalorder %v402_v59, 0  ;;  %vm638_vm4 = vcmp.gt.s32.totalorder %v637_v41, 0 }
  0xd8   : > { %v404_v33 = vsel %vm403_vm3, %v402_v59, 0  ;;  %v639_v25 = vsel %vm638_vm4, %v637_v41, 0  ;;  %vm1393_vm3 = vcmp.eq.s32.totalorder %v5604_v43, 0  ;;  %vm1396_vm4 = vcmp.eq.s32.totalorder %v5604_v43, 2 }
  0xd9   : > { %v405_v23 = vshrl.u32 %v404_v33, 5  ;;  %v406_v11 = vand.u32 31, %v404_v33  ;;  %v5683_v53 = vshrl.u32 %v639_v25, 5  ;;  %v641_v32 = vand.u32 31, %v639_v25 }
  0xdb   : > { %v407_v48 = vsub.s32 32, %v406_v11  ;;  %v409_v31 = vshll.u32 %v5075_v50, %v406_v11  ;;  %v412_v54 = vshll.u32 %v5076_v52, %v406_v11  ;;  %v415_v26 = vshll.u32 %v5077_v55, %v406_v11 }
  0xdc   : > { %v418_v37 = vshll.u32 %v5073_v42, %v406_v11  ;;  %v421_v59 = vshll.u32 %v7257_v44, %v406_v11  ;;  %vm424_vm5 = vcmp.lt.s32.totalorder %v405_v23, 1  ;;  %vm425_vm6 = vcmp.lt.s32.totalorder %v405_v23, 2 }
  0xdd   : > { %v410_v6 = vshrl.u32 %v5076_v52, %v407_v48  ;;  %v413_v41 = vshrl.u32 %v5077_v55, %v407_v48  ;;  %v416_v34 = vshrl.u32 %v5073_v42, %v407_v48  ;;  %v408_v18 = vshrl.u32 %v5075_v50, %v407_v48 }
  0xde   : > { %v419_v33 = vshrl.u32 %v7257_v44, %v407_v48  ;;  %v422_v46 = vshrl.u32 %v7259_v1, %v407_v48  ;;  %vm426_vm7 = vcmp.lt.s32.totalorder %v405_v23, 3  ;;  %v642_v39 = vsub.s32 32, %v641_v32 }
  0xdf   : > { %v411_v25 = vor.u32 %v410_v6, %v409_v31  ;;  %v414_v5 = vor.u32 %v413_v41, %v412_v54  ;;  %v417_v4 = vor.u32 %v416_v34, %v415_v26  ;;  %vm427_vm8 = vcmp.lt.s32.totalorder %v405_v23, 4 }
  0xe0   : > { %v420_v11 = vor.u32 %v419_v33, %v418_v37  ;;  %v423_v36 = vor.u32 %v422_v46, %v421_v59  ;;  %v644_v21 = vshll.u32 %v5075_v50, %v641_v32  ;;  %v647_v31 = vshll.u32 %v5076_v52, %v641_v32 }
  0xe1   : > { %v428_v17 = vsel %vm424_vm5, %v408_v18, %v411_v25  ;;  %v429_v35 = vsel %vm427_vm8, %v417_v4, 2102212464  ;;  %v432_v29 = vsel %vm424_vm5, %v411_v25, %v414_v5  ;;  %v436_v45 = vsel %vm424_vm5, %v414_v5, %v417_v4 }
  0xe2   : > { %v430_v44 = vsel %vm426_vm7, %v414_v5, %v429_v35  ;;  %v433_v48 = vsel %vm427_vm8, %v420_v11, 920167782  ;;  %v437_v1 = vsel %vm427_vm8, %v423_v36, 1326507024  ;;  %v643_v37 = vshrl.u32 %v5075_v50, %v642_v39 }
  0xe3   : > { %v434_v54 = vsel %vm426_vm7, %v417_v4, %v433_v48  ;;  %v438_v26 = vsel %vm426_vm7, %v420_v11, %v437_v1  ;;  %v645_v59 = vshrl.u32 %v5076_v52, %v642_v39  ;;  %v431_v6 = vsel %vm425_vm6, %v428_v17, %v430_v44 }
  0xe4   : > { %v435_v41 = vsel %vm425_vm6, %v432_v29, %v434_v54  ;;  %v439_v34 = vsel %vm425_vm6, %v436_v45, %v438_v26  ;;  %v648_v5 = vshrl.u32 %v5077_v55, %v642_v39  ;;  %v650_v44 = vshll.u32 %v5077_v55, %v641_v32 }
  0xe5   : > { %v5718_v35 = vmul.u32.u64.low %v5677_v27, %v439_v34  ;;  %v5719_v36 = vmul.u32.u64.high %v5677_v27, %v439_v34, %v5718_v35  ;;  %v5722_v4 = vmul.u32.u64.low %v5677_v27, %v435_v41  ;;  %v5723_v18 = vmul.u32.u64.high %v5677_v27, %v435_v41, %v5722_v4 }
  0xe6   : > { %v646_v1 = vor.u32 %v645_v59, %v644_v21  ;;  %v649_v33 = vor.u32 %v648_v5, %v647_v31  ;;  %v651_v17 = vshrl.u32 %v5073_v42, %v642_v39  ;;  %v447_v29 = vmul.u32 %v5677_v27, %v431_v6 }
  0xe7   : > { %v653_v23 = vshll.u32 %v5073_v42, %v641_v32  ;;  %v7274_v45 = vmov 920167782   ;;  %v7275_v25 = vmov 1326507024   ;;  %vm659_vm9 = vcmp.lt.s32.totalorder %v5683_v53, 1 }
  0xe8   : > { %v654_v46 = vshrl.u32 %v7274_v45, %v642_v39  ;;  %v657_v11 = vshrl.u32 %v7275_v25, %v642_v39  ;;  %v652_v48 = vor.u32 %v651_v17, %v650_v44  ;;  %v656_v54 = vshll.u32 %v7274_v45, %v641_v32 }
  0xe9   : > { %vm660_vm12 = vcmp.lt.s32.totalorder %v5683_v53, 2  ;;  %vm449_vm13 = vc.u32 %v5719_v36, %v5722_v4  ;;  %v450_v21 = vadd.s32 1, %v5723_v18  ;;  %vm661_vm14 = vcmp.lt.s32.totalorder %v5683_v53, 3 }
  0xea   : > { %v655_v27 = vor.u32 %v654_v46, %v653_v23  ;;  %v658_v39 = vor.u32 %v657_v11, %v656_v54  ;;  %vm662_vm2 = vcmp.lt.s32.totalorder %v5683_v53, 4  ;;  %v663_v32 = vsel %vm659_vm9, %v643_v37, %v646_v1 }
  0xeb   : > { %v667_v31 = vsel %vm659_vm9, %v646_v1, %v649_v33  ;;  %v451_v26 = vsel %vm449_vm13, %v450_v21, %v5723_v18  ;;  %v664_v59 = vsel %vm662_vm2, %v652_v48, 2102212464  ;;  %v671_v41 = vsel %vm659_vm9, %v649_v33, %v652_v48 }
  0xec   : > { %v668_v6 = vsel %vm662_vm2, %v655_v27, 920167782  ;;  %v452_v34 = vadd.s32 %v451_v26, %v447_v29  ;;  %v665_v5 = vsel %vm661_vm14, %v649_v33, %v664_v59  ;;  %v672_v44 = vsel %vm662_vm2, %v658_v39, 1326507024 }
  0xed   : > { %v669_v35 = vsel %vm661_vm14, %v652_v48, %v668_v6  ;;  %v673_v23 = vsel %vm661_vm14, %v655_v27, %v672_v44  ;;  %v7276_v37 = vshll.u32 %v5586_v60, %v5665_v28  ;;  %vm1767_vm5 = vcmp.lt.s32.totalorder %v5626_v49, 4 }
  0xee   : > { %v670_v17 = vsel %vm660_vm12, %v667_v31, %v669_v35  ;;  %v453_v1 = vadd.s32 536870912, %v452_v34  ;;  %v674_v33 = vsel %vm660_vm12, %v671_v41, %v673_v23  ;;  %v666_v11 = vsel %vm660_vm12, %v663_v32, %v665_v5 }
  0xef   : > { %v1476_v18 = vor.u32 %v5688_v61, %v7276_v37  ;;  %v5756_v29 = vmul.u32.u64.low %v5681_v24, %v670_v17  ;;  %v5757_v46 = vmul.u32.u64.high %v5681_v24, %v670_v17, %v5756_v29  ;;  %v1479_v60 = vshll.u32 %v5692_v57, 23 }
  0xf0   : > { %v5763_v48 = vmul.u32.u64.low %v5681_v24, %v674_v33  ;;  %v5764_v54 = vmul.u32.u64.high %v5681_v24, %v674_v33, %v5763_v48  ;;  %v5767_v28 = vshrl.u32 %v453_v1, 30  ;;  %vm1392_vm6 = vcmp.lt.s32.totalorder %v5604_v43, 2 }
  0xf1   : > { %v5771_v61 = vand.u32 3, %v5669_v15  ;;  %v1772_v21 = vsel %vm1764_vm10, %v5657_v62, %v5659_v38  ;;  %v1773_v53 = vsel %vm1767_vm5, %v5675_v20, 920167782  ;;  %v1480_v27 = vor.u32 4788187, %v1479_v60 }
  0xf2   : > { %v1483_v39 = vcvt.s32.f32 %v1476_v18  ;;  %vm1600_vm7 = vcmp.eq.s32.totalorder %v5618_v10, 0  ;;  %v1776_v57 = vsel %vm1764_vm10, %v5659_v38, %v5661_v0  ;;  %v7277_v15 = vor.u32 %v5655_v56, %v5644_v12 }
  0xf3   : > { %v455_v31 = vshll.u32 %v5767_v28, 30  ;;  %v682_v26 = vmul.u32 %v5681_v24, %v666_v11  ;;  %v685_v59 = vadd.s32 1, %v5757_v46  ;;  %v1397_v6 = vxor.u32 2147483648, %v5663_v2 }
  0xf4   : > { %v1777_v32 = vsel %vm1767_vm5, %v7277_v15, 1326507024  ;;  %vm1603_vm8 = vcmp.eq.s32.totalorder %v5618_v10, 2  ;;  %vm684_vm9 = vc.u32 %v5764_v54, %v5756_v29  ;;  %v1481_v41 = vand.u32 2147483647, %v1480_v27 }
  0xf5   : > { %v1774_v12 = vsel %vm1766_vm11, %v5661_v0, %v1773_v53  ;;  %v1778_v56 = vsel %vm1766_vm11, %v5675_v20, %v1777_v32  ;;  %v5803_v5 = vsub.s32 %v452_v34, %v455_v31  ;;  %v686_v24 = vsel %vm684_vm9, %v685_v59, %v5757_v46 }
  0xf6   : > { %v1394_v35 = vxor.u32 2147483648, %v5671_v19  ;;  %v1779_v44 = vsel %vm1765_vm15, %v1776_v57, %v1778_v56  ;;  %v687_v17 = vadd.s32 %v686_v24, %v682_v26  ;;  %v1484_v23 = vmul.f32 %v1483_v39, %v1481_v41 }
  0xf7   : > { %v1769_v37 = vsel %vm1767_vm5, %v5661_v0, 2102212464  ;;  %v7278_v18 = vor.u32 8388608, %v5591_v40  ;;  %vm394_vm12 = vcmp.lt.s32.totalorder %v5622_v47, 0  ;;  %v458_v20 = vsub.s32 0, %v5803_v5 }
  0xf8   : > { %vm1599_vm13 = vcmp.lt.s32.totalorder %v5618_v10, 2  ;;  %v1768_v34 = vsel %vm1764_vm10, %v5649_v9, %v5657_v62  ;;  %v1775_v33 = vsel %vm1765_vm15, %v1772_v21, %v1774_v12  ;;  %v688_v46 = vadd.s32 536870912, %v687_v17 }
  0xf9   : > { %v5814_v1 = vshll.u32 %v7278_v18, 8  ;;  %v1485_v0 = vxor.u32 2147483648, %v1484_v23  ;;  %v4501_v48 = vmin.u32 %v458_v20, %v5803_v5  ;;  %vm1390_vm14 = vweird.f32 %v5252_v13 }
  0xfa   : > { %v1395_v60 = vsel %vm1393_vm3, %v5663_v2, %v1394_v35  ;;  %v1398_v9 = vsel %vm1396_vm4, %v1397_v6, %v5671_v19  ;;  %v1770_v62 = vsel %vm1766_vm11, %v5659_v38, %v1769_v37  ;;  %v478_v21 = vsub.s32 4, %v5767_v28 }
  0xfb   : > { %v5826_v40 = vmul.u32.u64.low %v5814_v1, %v1779_v44  ;;  %v5827_v11 = vmul.u32.u64.high %v5814_v1, %v1779_v44, %v5826_v40  ;;  %v689_v53 = vshrl.u32 %v688_v46, 30  ;;  %v1486_v27 = vsel %vm1403_vm1, %v1485_v0, %v1484_v23 }
  0xfc   : > { %v1838_v39 = vand.u32 2139095040, %v5599_v63  ;;  %v460_v57 = vclz %v4501_v48  ;;  %v1489_v15 = vsel %vm5608_vm0, %v5258_v22, %v1486_v27  ;;  %v7279_v38 = vand.u32 2147483647, %v5622_v47 }
  0xfd   : > { %v5848_v32 = vmul.u32.u64.low %v5814_v1, %v1775_v33  ;;  %v5849_v31 = vmul.u32.u64.high %v5814_v1, %v1775_v33, %v5848_v32  ;;  %vm629_vm1 = vcmp.lt.s32.totalorder %v5624_v16, 0  ;;  %v690_v59 = vshll.u32 %v689_v53, 30 }
  0xfe   : > { %vm5854_vm10 = vcmp.le.f32.partialorder %v7279_v38, 0.7853982  ;;  %v1399_v41 = vsel %vm1392_vm6, %v1395_v60, %v1398_v9  ;;  %v4502_v12 = vadd.s32 4294967294, %v460_v57  ;;  %4876 = vcosq.f32 %v1489_v15 }
  0xff   : > { %v1602_v58 = vsel %vm1600_vm7, %v5663_v2, %v1394_v35  ;;  %v1771_v56 = vsel %vm1765_vm15, %v1768_v34, %v1770_v62  ;;  %v5866_v24 = vsub.s32 %v687_v17, %v690_v59  ;;  %4878 = vsinq.f32 %v1489_v15 }
 0x100   : > { %v1605_v44 = vsel %vm1603_vm8, %v1397_v6, %v5671_v19  ;;  %v1839_v23 = vshrl.u32 %v1838_v39, 23  ;;  %vm4503_vm0 = vcmp.lt.s32.totalorder %v4502_v12, 0  ;;  %v479_v43 = vsel %vm394_vm12, %v478_v21, %v5767_v28 }
 0x101   : > { %vm1499_vm11 = vcmp.eq.s32.totalorder %v5667_v51, 2  ;;  %vm1789_vm2 = vc.u32 %v5827_v11, %v5848_v32  ;;  %v1790_v49 = vadd.s32 1, %v5849_v31  ;;  %v463_v2 = vsel %vm4503_vm0, 0, %v4502_v12 }
 0x102   : > { %v693_v35 = vsub.s32 0, %v5866_v24  ;;  %v713_v17 = vsub.s32 4, %v689_v53  ;;  %vm1496_vm15 = vcmp.eq.s32.totalorder %v5667_v51, 0  ;;  %vm1704_vm3 = vcmp.eq.s32.totalorder %v5771_v61, 0 }
 0x103   : > { %vm1707_vm4 = vcmp.eq.s32.totalorder %v5771_v61, 2  ;;  %v1787_v19 = vmul.u32 %v5814_v1, %v1771_v56  ;;  %v448_v28 = vadd.s32 %v5722_v4, %v5719_v36  ;;  %v464_v6 = vsub.s32 32, %v463_v2 }
 0x104   : > { %v468_v37 = vsub.s32 4294967266, %v463_v2  ;;  %vm1495_vm5 = vcmp.lt.s32.totalorder %v5667_v51, 2  ;;  %vm1703_vm6 = vcmp.lt.s32.totalorder %v5771_v61, 2  ;;  %v4570_v18 = vadd.s32 4294967169, %v1839_v23 }
 0x105   : > { %v7282_v20 = vand.u32 2147483647, %v5624_v16  ;;  %v4513_v33 = vmin.u32 %v693_v35, %v5866_v24  ;;  %vm1493_vm8 = vweird.f32 %v5258_v22  ;;  %v1606_v36 = vsel %vm1599_vm13, %v1602_v58, %v1605_v44 }
 0x106   : > { %v1791_v4 = vsel %vm1789_vm2, %v1790_v49, %v5849_v31  ;;  %v465_v1 = vshll.u32 %v5803_v5, %v463_v2  ;;  %v466_v46 = vshrl.u32 %v448_v28, %v464_v6  ;;  %v469_v0 = vadd.s32 127, %v468_v37 }
 0x107   : > { %vm5889_vm7 = vcmp.le.f32.partialorder %v7282_v20, 0.7853982  ;;  %v481_v40 = vsel %vm5854_vm10, 0, %v479_v43  ;;  %v695_v48 = vclz %v4513_v33  ;;  %v714_v60 = vsel %vm629_vm1, %v713_v17, %v689_v53 }
 0x108   : > { %v1400_v10 = vsel %vm1390_vm14, nan, %v1399_v41  ;;  %v1792_v9 = vadd.s32 %v1791_v4, %v1787_v19  ;;  %v467_v62 = vor.u32 %v466_v46, %v465_v1  ;;  %v470_v21 = vshll.u32 %v469_v0, 23  ;;  %v4877_v53 = vpop.eup %4876 }
 0x109   : > { %v1607_v27 = vsel %vm1390_vm14, nan, %v1606_v36  ;;  %v1845_v39 = vadd.s32 1, %v4570_v18  ;;  %v588_v5 = vadd.s32 3, %v481_v40  ;;  %v683_v57 = vadd.s32 %v5756_v29, %v5764_v54  ;;  %v4879_v58 = vpop.eup %4878 }
 0x10a   : > { %v4514_v15 = vadd.s32 4294967294, %v695_v48  ;;  %v7285_v31 = vand.u32 2147483647, %v5599_v63  ;;  %v471_v59 = vor.u32 4788187, %v470_v21  ;;  %v716_v41 = vsel %vm5889_vm7, 0, %v714_v60 }
 0x10b   : > { %v1793_v12 = vadd.s32 536870912, %v1792_v9  ;;  %vm1846_vm9 = vcmp.gt.s32.totalorder %v1845_v39, 0  ;;  %v474_v13 = vcvt.s32.f32 %v467_v62  ;;  %v1500_v56 = vxor.u32 2147483648, %v4877_v53 }
 0x10c   : > { %v5914_v38 = vand.u32 8388607, %v7285_v31  ;;  %vm4515_vm13 = vcmp.lt.s32.totalorder %v4514_v15, 0  ;;  %v1847_v44 = vsel %vm1846_vm9, %v1845_v39, 0  ;;  %v472_v23 = vand.u32 2147483647, %v471_v59 }
 0x10d   : > { %v698_v43 = vsel %vm4515_vm13, 0, %v4514_v15  ;;  %v1497_v29 = vxor.u32 2147483648, %v4879_v58  ;;  %v5918_v54 = vshrl.u32 %v1793_v12, 30  ;;  %v1501_v17 = vsel %vm1499_vm11, %v1500_v56, %v4879_v58 }
 0x10e   : > { %v699_v49 = vsub.s32 32, %v698_v43  ;;  %v700_v2 = vshll.u32 %v5866_v24, %v698_v43  ;;  %v703_v35 = vsub.s32 4294967266, %v698_v43  ;;  %v475_v19 = vmul.f32 %v474_v13, %v472_v23 }
 0x10f   : > { %v1498_v28 = vsel %vm1496_vm15, %v4877_v53, %v1497_v29  ;;  %v1706_v6 = vsel %vm1704_vm3, %v4877_v53, %v1497_v29  ;;  %v1709_v37 = vsel %vm1707_vm4, %v1500_v56, %v4879_v58  ;;  %v1795_v46 = vshll.u32 %v5918_v54, 30 }
 0x110   : > { %v701_v18 = vshrl.u32 %v683_v57, %v699_v49  ;;  %v704_v20 = vadd.s32 127, %v703_v35  ;;  %v1502_v33 = vsel %vm1495_vm5, %v1498_v28, %v1501_v17  ;;  %v1710_v24 = vsel %vm1703_vm6, %v1706_v6, %v1709_v37 }
 0x111   : > { %v476_v36 = vxor.u32 2147483648, %v475_v19  ;;  %v1503_v4 = vsel %vm1493_vm8, nan, %v1502_v33  ;;  %v1711_v1 = vsel %vm1493_vm8, nan, %v1710_v24  ;;  %v5940_v62 = vand.u32 3, %v481_v40 }
 0x112   : > { %v702_v0 = vor.u32 %v701_v18, %v700_v2  ;;  %v705_v48 = vshll.u32 %v704_v20, 23  ;;  %v1714_v51 = vcombine.low %v1400_v10, %v1503_v4  ;;  %v1722_v60 = vcombine.low %v1607_v27, %v1711_v1 }
 0x113   : > { %v477_v61 = vsel %vm394_vm12, %v476_v36, %v475_v19  ;;  %v5942_v21 = vand.u32 3, %v588_v5  ;;  %v5944_v39 = vsub.s32 %v1792_v9, %v1795_v46  ;;  %v823_v15 = vadd.s32 3, %v716_v41 }
 0x114   : > { %v480_v22 = vsel %vm5854_vm10, %v5622_v47, %v477_v61  ;;  %v706_v57 = vor.u32 4788187, %v705_v48  ;;  %4561 = vst [vmem:[%s5570_s11 + $0x30] sm:$0xff] %v1714_v51  ;;  %4562 = vst [vmem:[%s5570_s11 + $0x38] sm:$0xff] %v1714_v51  ;;  %v1849_v10 = vand.u32 31, %v1847_v44  ;;  %v1843_v40 = vor.u32 8388608, %v5914_v38 }
 0x115   : > { %4563 = vst [vmem:[%s5570_s11 + $0xd0] sm:$0xff] %v1722_v60  ;;  %4564 = vst [vmem:[%s5570_s11 + $0xd8] sm:$0xff] %v1722_v60  ;;  %4880 = vcosq.f32 %v480_v22  ;;  %v1798_v27 = vsub.s32 0, %v5944_v39  ;;  %v5955_v5 = vshrl.u32 %v1847_v44, 5  ;;  %v709_v31 = vcvt.s32.f32 %v702_v0 }
 0x116   : > { %4882 = vsinq.f32 %v480_v22  ;;  %v707_v9 = vand.u32 2147483647, %v706_v57  ;;  %v1850_v53 = vsub.s32 32, %v1849_v10  ;;  %v5957_v26 = vand.u32 3, %v716_v41 }
 0x117   : > { %v1788_v59 = vadd.s32 %v5848_v32, %v5827_v11  ;;  %v4567_v12 = vmin.u32 %v1798_v27, %v5944_v39  ;;  %v1852_v58 = vshll.u32 %v5075_v50, %v1849_v10  ;;  %v1855_v38 = vshll.u32 %v5076_v52, %v1849_v10 }
 0x118   : > { %v710_v13 = vmul.f32 %v709_v31, %v707_v9  ;;  %v1853_v56 = vshrl.u32 %v5076_v52, %v1850_v53  ;;  %v1856_v44 = vshrl.u32 %v5077_v55, %v1850_v53  ;;  %vm490_vm12 = vcmp.eq.s32.totalorder %v5940_v62, 2 }
 0x119   : > { %vm594_vm14 = vcmp.eq.s32.totalorder %v5942_v21, 2  ;;  %v5968_v41 = vand.u32 3, %v823_v15  ;;  %v1800_v23 = vclz %v4567_v12  ;;  %vm1867_vm10 = vcmp.lt.s32.totalorder %v5955_v5, 1 }
 0x11a   : > { %v5971_v11 = vshll.u32 %v1843_v40, 8  ;;  %vm487_vm0 = vcmp.eq.s32.totalorder %v5940_v62, 0  ;;  %vm591_vm11 = vcmp.eq.s32.totalorder %v5942_v21, 0  ;;  %v711_v32 = vxor.u32 2147483648, %v710_v13 }
 0x11b   : > { %v1851_v43 = vshrl.u32 %v5075_v50, %v1850_v53  ;;  %v1854_v29 = vor.u32 %v1853_v56, %v1852_v58  ;;  %v1858_v49 = vshll.u32 %v5077_v55, %v1849_v10  ;;  %vm486_vm2 = vcmp.lt.s32.totalorder %v5940_v62, 2 }
 0x11c   : > { %vm590_vm15 = vcmp.lt.s32.totalorder %v5942_v21, 2  ;;  %v4568_v2 = vadd.s32 4294967294, %v1800_v23  ;;  %v1859_v35 = vshrl.u32 %v5073_v42, %v1850_v53  ;;  %v1861_v17 = vshll.u32 %v5073_v42, %v1849_v10 }
 0x11d   : > { %v1862_v19 = vshrl.u32 %v7274_v45, %v1850_v53  ;;  %vm484_vm3 = vweird.f32 %v5622_v47  ;;  %v712_v28 = vsel %vm629_vm1, %v711_v32, %v710_v13  ;;  %v1857_v6 = vor.u32 %v1856_v44, %v1855_v38 }
 0x11e   : > { %v1864_v37 = vshll.u32 %v7274_v45, %v1849_v10  ;;  %v1865_v18 = vshrl.u32 %v7275_v25, %v1850_v53  ;;  %v715_v20 = vsel %vm5889_vm7, %v5624_v16, %v712_v28  ;;  %vm4569_vm4 = vcmp.lt.s32.totalorder %v4568_v2, 0 }
 0x11f   : > { %v1860_v33 = vor.u32 %v1859_v35, %v1858_v49  ;;  %vm1868_vm5 = vcmp.lt.s32.totalorder %v5955_v5, 2  ;;  %4884 = vcosq.f32 %v715_v20  ;;  %v1803_v24 = vsel %vm4569_vm4, 0, %v4568_v2  ;;  %v4881_v1 = vpop.eup %4880 }
 0x120   : > { %v1863_v36 = vor.u32 %v1862_v19, %v1861_v17  ;;  %v1866_v4 = vor.u32 %v1865_v18, %v1864_v37  ;;  %4886 = vsinq.f32 %v715_v20  ;;  %v1804_v46 = vsub.s32 32, %v1803_v24  ;;  %v4883_v51 = vpop.eup %4882 }
 0x121   : > { %v1805_v0 = vshll.u32 %v5944_v39, %v1803_v24  ;;  %v1808_v48 = vsub.s32 4294967266, %v1803_v24  ;;  %v491_v60 = vxor.u32 2147483648, %v4881_v1  ;;  %vm1869_vm1 = vcmp.lt.s32.totalorder %v5955_v5, 3 }
 0x122   : > { %vm1870_vm6 = vcmp.lt.s32.totalorder %v5955_v5, 4  ;;  %v1871_v34 = vsel %vm1867_vm10, %v1851_v43, %v1854_v29  ;;  %v488_v61 = vxor.u32 2147483648, %v4883_v51  ;;  %v1806_v22 = vshrl.u32 %v1788_v59, %v1804_v46 }
 0x123   : > { %v1809_v57 = vadd.s32 127, %v1808_v48  ;;  %v1872_v15 = vsel %vm1870_vm6, %v1860_v33, 2102212464  ;;  %v492_v10 = vsel %vm490_vm12, %v491_v60, %v4883_v51  ;;  %v596_v39 = vsel %vm594_vm14, %v491_v60, %v4883_v51 }
 0x124   : > { %vm1734_vm7 = vcmp.lt.s32.totalorder %v5394_v30, 0  ;;  %v1875_v27 = vsel %vm1867_vm10, %v1854_v29, %v1857_v6  ;;  %v1876_v40 = vsel %vm1870_vm6, %v1863_v36, 920167782  ;;  %v489_v9 = vsel %vm487_vm0, %v4881_v1, %v488_v61 }
 0x125   : > { %v593_v31 = vsel %vm591_vm11, %v4881_v1, %v488_v61  ;;  %vm722_vm8 = vcmp.eq.s32.totalorder %v5957_v26, 0  ;;  %v7286_v53 = vand.u32 2147483647, %v5394_v30  ;;  %v1807_v12 = vor.u32 %v1806_v22, %v1805_v0 }
 0x126   : > { %v1810_v58 = vshll.u32 %v1809_v57, 23  ;;  %v493_v13 = vsel %vm486_vm2, %v489_v9, %v492_v10  ;;  %v597_v56 = vsel %vm590_vm15, %v593_v31, %v596_v39  ;;  %vm721_vm13 = vcmp.lt.s32.totalorder %v5957_v26, 2 }
 0x127   : > { %vm6016_vm9 = vcmp.le.f32.partialorder %v7286_v53, 0.7853982  ;;  %v1873_v38 = vsel %vm1869_vm1, %v1857_v6, %v1872_v15  ;;  %v1877_v44 = vsel %vm1869_vm1, %v1860_v33, %v1876_v40  ;;  %v494_v23 = vsel %vm484_vm3, nan, %v493_v13 }
 0x128   : > { %v598_v62 = vsel %vm484_vm3, nan, %v597_v56  ;;  %vm719_vm12 = vweird.f32 %v5624_v16  ;;  %v1811_v21 = vor.u32 4788187, %v1810_v58  ;;  %v1814_v32 = vcvt.s32.f32 %v1807_v12  ;;  %v377_v56 = vld [vmem:[%s7246_s5] sm:$0x3] }
 0x129   : > { %v606_v43 = vrot.slane %v494_v23, %v5602_v14  ;;  %v618_v29 = vrot.slane %v598_v62, %v5602_v14  ;;  %v1878_v49 = vsel %vm1868_vm5, %v1875_v27, %v1877_v44  ;;  %v1879_v2 = vsel %vm1867_vm10, %v1857_v6, %v1860_v33  ;;  %v4885_v28 = vpop.eup %4884 }
 0x12a   : > { %v1812_v35 = vand.u32 2147483647, %v1811_v21  ;;  %v1880_v47 = vsel %vm1870_vm6, %v1866_v4, 1326507024  ;;  %v6043_v17 = vmul.u32.u64.low %v5971_v11, %v1878_v49  ;;  %v6044_v19 = vmul.u32.u64.high %v5971_v11, %v1878_v49, %v6043_v17  ;;  %v4887_v37 = vpop.eup %4886 }
 0x12b   : > { %608 = vst [vmem:[%s5570_s11] sm:$0xff] %v606_v43  ;;  %4508 = vst [vmem:[%s5570_s11 + $0x8] sm:$0xff] %v606_v43  ;;  %vm725_vm14 = vcmp.eq.s32.totalorder %v5957_v26, 2  ;;  %vm825_vm0 = vcmp.lt.s32.totalorder %v5968_v41, 2  ;;  %vm829_vm10 = vcmp.eq.s32.totalorder %v5968_v41, 2  ;;  %v1881_v6 = vsel %vm1869_vm1, %v1863_v36, %v1880_v47 }
 0x12c   : > { %4509 = vst [vmem:[%s5570_s11 + $0xa0] sm:$0xff] %v618_v29  ;;  %4510 = vst [vmem:[%s5570_s11 + $0xa8] sm:$0xff] %v618_v29  ;;  %v726_v18 = vxor.u32 2147483648, %v4885_v28  ;;  %v1815_v20 = vmul.f32 %v1814_v32, %v1812_v35  ;;  %v1874_v33 = vsel %vm1868_vm5, %v1871_v34, %v1873_v38  ;;  %v1882_v24 = vsel %vm1868_vm5, %v1879_v2, %v1881_v6 }
 0x12d   : > { %v723_v4 = vxor.u32 2147483648, %v4887_v37  ;;  %v6061_v1 = vmul.u32.u64.low %v5971_v11, %v1882_v24  ;;  %v6062_v46 = vmul.u32.u64.high %v5971_v11, %v1882_v24, %v6061_v1  ;;  %v2163_v0 = vstv %s6007_s17  ;;  %s4981_s17 = scalar_lea.vmem %s7187_s8, 5120 }
 0x12e   : > { %v727_v48 = vsel %vm725_vm14, %v726_v18, %v4887_v37  ;;  %vm826_vm11 = vcmp.eq.s32.totalorder %v5968_v41, 0  ;;  %v831_v51 = vsel %vm829_vm10, %v726_v18, %v4887_v37  ;;  %v1816_v36 = vxor.u32 2147483648, %v1815_v20  ;;  %p4982_p13 = scmp.ne.s32.totalorder %s7187_s8, %s4981_s17 }
 0x12f   : > { %v724_v60 = vsel %vm722_vm8, %v4885_v28, %v723_v4  ;;  %v828_v61 = vsel %vm826_vm11, %v4885_v28, %v723_v4  ;;  %v1890_v34 = vmul.u32 %v5971_v11, %v1874_v33  ;;  %v1893_v5 = vadd.s32 1, %v6044_v19 }
 0x130   : > { %v728_v22 = vsel %vm721_vm13, %v724_v60, %v727_v48  ;;  %v832_v57 = vsel %vm825_vm0, %v828_v61, %v831_v51  ;;  %v1817_v15 = vsel %vm1734_vm7, %v1816_v36, %v1815_v20  ;;  %v6077_v10 = vmul.f32 %v2163_v0, %v5239_v7  ;;  %p4983_p0 = pnand %p4982_p13, %p7310_p1 }
 0x131   : > { %v729_v11 = vsel %vm719_vm12, nan, %v728_v22  ;;  %v833_v39 = vsel %vm719_vm12, nan, %v832_v57  ;;  %v1818_v26 = vsub.s32 4, %v5918_v54  ;;  %v1820_v41 = vsel %vm6016_vm9, %v5394_v30, %v1817_v15 }
 0x132   : > { %v841_v27 = vrot.slane %v729_v11, %v5602_v14  ;;  %v854_v40 = vrot.slane %v833_v39, %v5602_v14  ;;  %4888 = vcosq.f32 %v1820_v41  ;;  %vm1892_vm2 = vc.u32 %v6062_v46, %v6043_v17  ;;  %p4984_p2 = pneg %p4983_p0 }
 0x133   : > { %v1894_v7 = vsel %vm1892_vm2, %v1893_v5, %v6044_v19  ;;  %v6093_v9 = vmul.f32 %v2163_v0, %v5243_v8  ;;  %v2169_v31 = vand.u32 2139095040, %v6077_v10  ;;  %v1819_v14 = vsel %vm1734_vm7, %v1818_v26, %v5918_v54 }
 0x134   : > { %4520 = vst [vmem:[%s5570_s11 + $0x10] sm:$0xff] %v841_v27  ;;  %4521 = vst [vmem:[%s5570_s11 + $0x18] sm:$0xff] %v841_v27  ;;  %v1895_v16 = vadd.s32 %v1894_v7, %v1890_v34  ;;  %v2166_v53 = vand.u32 2147483647, %v6077_v10  ;;  %4890 = vsinq.f32 %v1820_v41  ;;  %v1821_v54 = vsel %vm6016_vm9, 0, %v1819_v14 }
 0x135   : > { %4522 = vst [vmem:[%s5570_s11 + $0xb0] sm:$0xff] %v854_v40  ;;  %4523 = vst [vmem:[%s5570_s11 + $0xb8] sm:$0xff] %v854_v40  ;;  %v2269_v12 = vand.u32 2147483647, %v6093_v9  ;;  %v2170_v58 = vshrl.u32 %v2169_v31, 23  ;;  %v2272_v13 = vand.u32 2139095040, %v6093_v9  ;;  %v2597_v18 = vstv %s6105_s18 }
 0x136   : > { %v1896_v8 = vadd.s32 536870912, %v1895_v16  ;;  %v2173_v23 = vand.u32 8388607, %v2166_v53  ;;  %v7289_v29 = vsub.s32 0, %v5230_v3  ;;  %v6121_v2 = vand.u32 3, %v1821_v54  ;;  %s5080_s18 = smov [#allocation8]  }
 0x137   : > { %v4587_v44 = vadd.s32 4294967169, %v2170_v58  ;;  %v2276_v62 = vand.u32 8388607, %v2269_v12  ;;  %v2273_v43 = vshrl.u32 %v2272_v13, 23  ;;  %v2031_v19 = vadd.s32 3, %v1821_v54  ;;  %s4985_s19 = sshll.u32 %s5080_s18, 4  ;;  %s4986_s19 = int_to_ptr.vmem [resolvable:$false] %s4985_s19 }
 0x138   : > { %v1897_v38 = vshrl.u32 %v1896_v8, 30  ;;  %v6119_v49 = vrot.slane %v377_v56, %v7289_v29  ;;  %v2174_v28 = vor.u32 8388608, %v2173_v23  ;;  %v7290_v20 = vsub.s32 1, %v5230_v3  ;;  %s4987_s20 = scalar_lea.vmem %s4986_s19, 10240  ;;  %p4988_p3 = scmp.lt.s32.totalorder %s7187_s8, %s4986_s19 }
 0x139   : > { %v2176_v32 = vadd.s32 1, %v4587_v44  ;;  %v2277_v37 = vor.u32 8388608, %v2276_v62  ;;  %v4591_v4 = vadd.s32 4294967169, %v2273_v43  ;;  %v7291_v0 = vand.u32 2147483647, %v5599_v63  ;;  %p4989_p5 = scmp.lt.s32.totalorder %s4987_s20, %s4981_s17 }
 0x13a   : > { %v1898_v21 = vshll.u32 %v1897_v38, 30  ;;  %v1921_v47 = vsub.s32 4, %v1897_v38  ;;  %v6130_v33 = vrot.slane %v377_v56, %v7290_v20  ;;  %vm1837_vm4 = vcmp.lt.s32.totalorder %v5599_v63, 0 }
 0x13b   : > { %vm2177_vm15 = vcmp.gt.s32.totalorder %v2176_v32, 0  ;;  %vm6136_vm3 = vcmp.le.f32.partialorder %v7291_v0, 0.7853982  ;;  %vm1830_vm5 = vcmp.eq.s32.totalorder %v6121_v2, 2  ;;  %v6150_v61 = vmul.f32 %v2597_v18, %v6119_v49  ;;  %p4990_p6 = por %p4989_p5, %p4988_p3 }
 0x13c   : > { %v6123_v35 = vpop.eup %4888  ;;  %v6125_v59 = vsub.s32 %v1895_v16, %v1898_v21  ;;  %v2178_v6 = vsel %vm2177_vm15, %v2176_v32, 0  ;;  %v1922_v60 = vsel %vm1837_vm4, %v1921_v47, %v1897_v38  ;;  %v1891_v34 = vadd.s32 %v6043_v17, %v6062_v46 }
 0x13d   : > { %v1831_v1 = vxor.u32 2147483648, %v6123_v35  ;;  %v2180_v51 = vand.u32 31, %v2178_v6  ;;  %v6154_v5 = vand.u32 3, %v2031_v19  ;;  %v6156_v22 = vshll.u32 %v2174_v28, 8  ;;  %p4991_p7 = pnand %p4990_p6, %p4984_p2 }
 0x13e   : > { %v1901_v24 = vsub.s32 0, %v6125_v59  ;;  %v6141_v36 = vpop.eup %4890  ;;  %v6158_v57 = vshll.u32 %v2277_v37, 8  ;;  %vm1827_vm1 = vcmp.eq.s32.totalorder %v6121_v2, 0  ;;  %v2279_v39 = vadd.s32 1, %v4591_v4 }
 0x13f   : > { %v2181_v11 = vsub.s32 32, %v2180_v51  ;;  %v2600_v26 = vand.u32 2147483647, %v6150_v61  ;;  %v1828_v41 = vxor.u32 2147483648, %v6141_v36  ;;  %v1832_v27 = vsel %vm1830_vm5, %v1831_v1, %v6141_v36 }
 0x140   : > { %v4571_v3 = vmin.u32 %v1901_v24, %v6125_v59  ;;  %v1924_v17 = vsel %vm6136_vm3, 0, %v1922_v60  ;;  %v2179_v46 = vshrl.u32 %v2178_v6, 5  ;;  %v2183_v16 = vshll.u32 %v5075_v50, %v2180_v51 }
 0x141   : > { %v2182_v7 = vshrl.u32 %v5075_v50, %v2181_v11  ;;  %v2184_v31 = vshrl.u32 %v5076_v52, %v2181_v11  ;;  %v2186_v14 = vshll.u32 %v5076_v52, %v2180_v51  ;;  %v2187_v8 = vshrl.u32 %v5077_v55, %v2181_v11 }
 0x142   : > { %v1903_v15 = vclz %v4571_v3  ;;  %v2189_v58 = vshll.u32 %v5077_v55, %v2180_v51  ;;  %v2190_v13 = vshrl.u32 %v5073_v42, %v2181_v11  ;;  %v2192_v38 = vshll.u32 %v5073_v42, %v2180_v51 }
 0x143   : > { %v2185_v56 = vor.u32 %v2184_v31, %v2183_v16  ;;  %v2193_v44 = vshrl.u32 %v7274_v45, %v2181_v11  ;;  %vm1826_vm7 = vcmp.lt.s32.totalorder %v6121_v2, 2  ;;  %vm2037_vm8 = vcmp.eq.s32.totalorder %v6154_v5, 2 }
 0x144   : > { %v4572_v40 = vadd.s32 4294967294, %v1903_v15  ;;  %v2188_v23 = vor.u32 %v2187_v8, %v2186_v14  ;;  %v2191_v62 = vor.u32 %v2190_v13, %v2189_v58  ;;  %v2195_v21 = vshll.u32 %v7274_v45, %v2180_v51 }
 0x145   : > { %v2194_v47 = vor.u32 %v2193_v44, %v2192_v38  ;;  %v2196_v19 = vshrl.u32 %v7275_v25, %v2181_v11  ;;  %vm2198_vm9 = vcmp.lt.s32.totalorder %v2179_v46, 1  ;;  %vm2199_vm13 = vcmp.lt.s32.totalorder %v2179_v46, 2 }
 0x146   : > { %vm4573_vm6 = vcmp.lt.s32.totalorder %v4572_v40, 0  ;;  %vm2200_vm12 = vcmp.lt.s32.totalorder %v2179_v46, 3  ;;  %vm2201_vm14 = vcmp.lt.s32.totalorder %v2179_v46, 4  ;;  %v2202_v37 = vsel %vm2198_vm9, %v2182_v7, %v2185_v56 }
 0x147   : > { %v1906_v54 = vsel %vm4573_vm6, 0, %v4572_v40  ;;  %v2197_v20 = vor.u32 %v2196_v19, %v2195_v21  ;;  %v2203_v24 = vsel %vm2201_vm14, %v2191_v62, 2102212464  ;;  %v2206_v4 = vsel %vm2198_vm9, %v2185_v56, %v2188_v23 }
 0x148   : > { %v1907_v32 = vsub.s32 32, %v1906_v54  ;;  %v1908_v43 = vshll.u32 %v6125_v59, %v1906_v54  ;;  %v1911_v29 = vsub.s32 4294967266, %v1906_v54  ;;  %v2207_v0 = vsel %vm2201_vm14, %v2194_v47, 920167782 }
 0x149   : > { %v2204_v59 = vsel %vm2200_vm12, %v2188_v23, %v2203_v24  ;;  %v2208_v60 = vsel %vm2200_vm12, %v2191_v62, %v2207_v0  ;;  %v2210_v11 = vsel %vm2198_vm9, %v2188_v23, %v2191_v62  ;;  %v2211_v40 = vsel %vm2201_vm14, %v2197_v20, 1326507024 }
 0x14a   : > { %v1909_v28 = vshrl.u32 %v1891_v34, %v1907_v32  ;;  %v1912_v6 = vadd.s32 127, %v1911_v29  ;;  %v1829_v34 = vsel %vm1827_vm1, %v6123_v35, %v1828_v41  ;;  %v2209_v15 = vsel %vm2199_vm13, %v2206_v4, %v2208_v60 }
 0x14b   : > { %v2205_v31 = vsel %vm2199_vm13, %v2202_v37, %v2204_v59  ;;  %v2212_v14 = vsel %vm2200_vm12, %v2194_v47, %v2211_v40  ;;  %vm2034_vm0 = vcmp.eq.s32.totalorder %v6154_v5, 0  ;;  %vm2280_vm10 = vcmp.gt.s32.totalorder %v2279_v39, 0 }
 0x14c   : > { %v1910_v51 = vor.u32 %v1909_v28, %v1908_v43  ;;  %v1913_v3 = vshll.u32 %v1912_v6, 23  ;;  %v2213_v8 = vsel %vm2199_vm13, %v2210_v11, %v2212_v14  ;;  %v2281_v54 = vsel %vm2280_vm10, %v2279_v39, 0 }
 0x14d   : > { %v6198_v58 = vmul.u32.u64.low %v6156_v22, %v2209_v15  ;;  %v6199_v13 = vmul.u32.u64.high %v6156_v22, %v2209_v15, %v6198_v58  ;;  %v6203_v38 = vmul.u32.u64.low %v6156_v22, %v2213_v8  ;;  %v6204_v44 = vmul.u32.u64.high %v6156_v22, %v2213_v8, %v6203_v38 }
 0x14e   : > { %v1914_v7 = vor.u32 4788187, %v1913_v3  ;;  %v1917_v16 = vcvt.s32.f32 %v1910_v51  ;;  %v6206_v23 = vand.u32 3, %v1924_v17  ;;  %v2135_v62 = vadd.s32 3, %v1924_v17 }
 0x14f   : > { %v2283_v21 = vand.u32 31, %v2281_v54  ;;  %v2603_v32 = vand.u32 2139095040, %v6150_v61  ;;  %v6211_v46 = vsel %vm1826_vm7, %v1829_v34, %v1832_v27  ;;  %v2039_v29 = vsel %vm2037_vm8, %v1831_v1, %v6141_v36 }
 0x150   : > { %v1915_v56 = vand.u32 2147483647, %v1914_v7  ;;  %v2221_v47 = vmul.u32 %v6156_v22, %v2205_v31  ;;  %v2224_v39 = vadd.s32 1, %v6199_v13  ;;  %vm2223_vm11 = vc.u32 %v6204_v44, %v6198_v58 }
 0x151   : > { %v2284_v19 = vsub.s32 32, %v2283_v21  ;;  %v2286_v17 = vshll.u32 %v5075_v50, %v2283_v21  ;;  %v2289_v28 = vshll.u32 %v5076_v52, %v2283_v21  ;;  %v2282_v2 = vshrl.u32 %v2281_v54, 5 }
 0x152   : > { %v1918_v43 = vmul.f32 %v1917_v16, %v1915_v56  ;;  %v2292_v27 = vshll.u32 %v5077_v55, %v2283_v21  ;;  %vm2033_vm2 = vcmp.lt.s32.totalorder %v6154_v5, 2  ;;  %v2225_v1 = vsel %vm2223_vm11, %v2224_v39, %v6199_v13 }
 0x153   : > { %v2285_v22 = vshrl.u32 %v5075_v50, %v2284_v19  ;;  %v2287_v37 = vshrl.u32 %v5076_v52, %v2284_v19  ;;  %v2290_v20 = vshrl.u32 %v5077_v55, %v2284_v19  ;;  %v2226_v4 = vadd.s32 %v2225_v1, %v2221_v47 }
 0x154   : > { %v1919_v6 = vxor.u32 2147483648, %v1918_v43  ;;  %v2293_v0 = vshrl.u32 %v5073_v42, %v2284_v19  ;;  %v2295_v51 = vshll.u32 %v5073_v42, %v2283_v21  ;;  %vm1824_vm15 = vweird.f32 %v5394_v30 }
 0x155   : > { %v2288_v59 = vor.u32 %v2287_v37, %v2286_v17  ;;  %v2291_v60 = vor.u32 %v2290_v20, %v2289_v28  ;;  %v2296_v34 = vshrl.u32 %v7274_v45, %v2284_v19  ;;  %v2227_v15 = vadd.s32 536870912, %v2226_v4 }
 0x156   : > { %v1920_v24 = vsel %vm1837_vm4, %v1919_v6, %v1918_v43  ;;  %v2294_v11 = vor.u32 %v2293_v0, %v2292_v27  ;;  %v2298_v40 = vshll.u32 %v7274_v45, %v2283_v21  ;;  %v2299_v16 = vshrl.u32 %v7275_v25, %v2284_v19 }
 0x157   : > { %v1923_v3 = vsel %vm6136_vm3, %v5599_v63, %v1920_v24  ;;  %v2297_v7 = vor.u32 %v2296_v34, %v2295_v51  ;;  %vm2301_vm4 = vcmp.lt.s32.totalorder %v2282_v2, 1  ;;  %v2036_v48 = vsel %vm2034_vm0, %v6123_v35, %v1828_v41 }
 0x158   : > { %4892 = vcosq.f32 %v1923_v3  ;;  %v6246_v31 = vshrl.u32 %v2227_v15, 30  ;;  %vm2303_vm3 = vcmp.lt.s32.totalorder %v2282_v2, 3  ;;  %vm2304_vm5 = vcmp.lt.s32.totalorder %v2282_v2, 4 }
 0x159   : > { %4894 = vsinq.f32 %v1923_v3  ;;  %v2300_v14 = vor.u32 %v2299_v16, %v2298_v40  ;;  %vm2302_vm1 = vcmp.lt.s32.totalorder %v2282_v2, 2  ;;  %v2306_v8 = vsel %vm2304_vm5, %v2294_v11, 2102212464 }
 0x15a   : > { %v2309_v13 = vsel %vm2301_vm4, %v2288_v59, %v2291_v60  ;;  %v2229_v56 = vshll.u32 %v6246_v31, 30  ;;  %v2305_v38 = vsel %vm2301_vm4, %v2285_v22, %v2288_v59  ;;  %v2307_v54 = vsel %vm2303_vm3, %v2291_v60, %v2306_v8 }
 0x15b   : > { %v2310_v21 = vsel %vm2304_vm5, %v2297_v7, 920167782  ;;  %vm1927_vm6 = vweird.f32 %v5599_v63  ;;  %v2313_v43 = vsel %vm2301_vm4, %v2291_v60, %v2294_v11  ;;  %v2314_v35 = vsel %vm2304_vm5, %v2300_v14, 1326507024 }
 0x15c   : > { %v2311_v36 = vsel %vm2303_vm3, %v2294_v11, %v2310_v21  ;;  %v2604_v41 = vshrl.u32 %v2603_v32, 23  ;;  %v2136_v47 = vand.u32 3, %v2135_v62  ;;  %v6252_v39 = vsub.s32 %v2226_v4, %v2229_v56 }
 0x15d   : > { %v2312_v19 = vsel %vm2302_vm1, %v2309_v13, %v2311_v36  ;;  %v2315_v17 = vsel %vm2303_vm3, %v2297_v7, %v2314_v35  ;;  %v2308_v28 = vsel %vm2302_vm1, %v2305_v38, %v2307_v54  ;;  %v2040_v22 = vsel %vm2033_vm2, %v2036_v48, %v2039_v29 }
 0x15e   : > { %v2316_v6 = vsel %vm2302_vm1, %v2313_v43, %v2315_v17  ;;  %v6259_v27 = vmul.u32.u64.low %v6158_v57, %v2312_v19  ;;  %v6260_v1 = vmul.u32.u64.high %v6158_v57, %v2312_v19, %v6259_v27  ;;  %v2232_v62 = vsub.s32 0, %v6252_v39 }
 0x15f   : > { %v6267_v32 = vmul.u32.u64.low %v6158_v57, %v2316_v6  ;;  %v6268_v37 = vmul.u32.u64.high %v6158_v57, %v2316_v6, %v6267_v32  ;;  %vm1929_vm7 = vcmp.lt.s32.totalorder %v6206_v23, 2  ;;  %vm1930_vm8 = vcmp.eq.s32.totalorder %v6206_v23, 0 }
 0x160   : > { %vm1933_vm9 = vcmp.eq.s32.totalorder %v6206_v23, 2  ;;  %v4607_v2 = vadd.s32 4294967169, %v2604_v41  ;;  %v1834_v24 = vsel %vm1824_vm15, nan, %v6211_v46  ;;  %vm2141_vm13 = vcmp.eq.s32.totalorder %v2136_v47, 2 }
 0x161   : > { %v4588_v5 = vmin.u32 %v2232_v62, %v6252_v39  ;;  %v2324_v29 = vmul.u32 %v6158_v57, %v2308_v28  ;;  %v2041_v51 = vsel %vm1824_vm15, nan, %v2040_v22  ;;  %vm2138_vm12 = vcmp.eq.s32.totalorder %v2136_v47, 0 }
 0x162   : > { %v4893_v20 = vpop.eup %4892  ;;  %v2327_v3 = vadd.s32 1, %v6260_v1  ;;  %vm2137_vm14 = vcmp.lt.s32.totalorder %v2136_v47, 2  ;;  %vm2326_vm0 = vc.u32 %v6268_v37, %v6259_v27  ;;  %v2610_v15 = vadd.s32 1, %v4607_v2 }
 0x163   : > { %v4895_v4 = vpop.eup %4894  ;;  %v1934_v0 = vxor.u32 2147483648, %v4893_v20  ;;  %v2234_v60 = vclz %v4588_v5  ;;  %v2222_v14 = vadd.s32 %v6198_v58, %v6204_v44  ;;  %v2252_v8 = vsub.s32 4, %v6246_v31 }
 0x164   : > { %v1931_v59 = vxor.u32 2147483648, %v4895_v4  ;;  %v2328_v57 = vsel %vm2326_vm0, %v2327_v3, %v6260_v1  ;;  %vm2611_vm11 = vcmp.gt.s32.totalorder %v2610_v15, 0  ;;  %vm2168_vm2 = vcmp.lt.s32.totalorder %v6077_v10, 0 }
 0x165   : > { %v1935_v46 = vsel %vm1933_vm9, %v1934_v0, %v4895_v4  ;;  %v2143_v34 = vsel %vm2141_vm13, %v1934_v0, %v4895_v4  ;;  %v4589_v40 = vadd.s32 4294967294, %v2234_v60  ;;  %v2329_v7 = vadd.s32 %v2328_v57, %v2324_v29 }
 0x166   : > { %v1932_v30 = vsel %vm1930_vm8, %v4893_v20, %v1931_v59  ;;  %v2140_v11 = vsel %vm2138_vm12, %v4893_v20, %v1931_v59  ;;  %v6308_v63 = vmul.f32 %v2597_v18, %v6130_v33  ;;  %v2607_v35 = vand.u32 8388607, %v2600_v26 }
 0x167   : > { %v1936_v16 = vsel %vm1929_vm7, %v1932_v30, %v1935_v46  ;;  %v2144_v48 = vsel %vm2137_vm14, %v2140_v11, %v2143_v34  ;;  %vm4590_vm10 = vcmp.lt.s32.totalorder %v4589_v40, 0  ;;  %v2330_v23 = vadd.s32 536870912, %v2329_v7 }
 0x168   : > { %v1937_v13 = vsel %vm1927_vm6, nan, %v1936_v16  ;;  %v2145_v56 = vsel %vm1927_vm6, nan, %v2144_v48  ;;  %v2237_v21 = vsel %vm4590_vm10, 0, %v4589_v40  ;;  %v2612_v41 = vsel %vm2611_vm11, %v2610_v15, 0 }
 0x169   : > { %v2148_v38 = vcombine.low %v1834_v24, %v1937_v13  ;;  %v2156_v54 = vcombine.low %v2041_v51, %v2145_v56  ;;  %v2238_v36 = vsub.s32 32, %v2237_v21  ;;  %v2239_v58 = vshll.u32 %v6252_v39, %v2237_v21 }
 0x16a   : > { %v2242_v44 = vsub.s32 4294967266, %v2237_v21  ;;  %v6298_v43 = vshrl.u32 %v2330_v23, 30  ;;  %v2253_v39 = vsel %vm2168_vm2, %v2252_v8, %v6246_v31  ;;  %v2614_v28 = vand.u32 31, %v2612_v41 }
 0x16b   : > { %4582 = vst [vmem:[%s5570_s11 + $0x40] sm:$0xff] %v2148_v38  ;;  %4583 = vst [vmem:[%s5570_s11 + $0x48] sm:$0xff] %v2148_v38  ;;  %v2240_v47 = vshrl.u32 %v2222_v14, %v2238_v36  ;;  %vm6318_vm15 = vcmp.le.f32.partialorder %v2166_v53, 0.7853982  ;;  %v2608_v32 = vor.u32 8388608, %v2607_v35  ;;  %v2706_v31 = vand.u32 2139095040, %v6308_v63 }
 0x16c   : > { %4584 = vst [vmem:[%s5570_s11 + $0xe0] sm:$0xff] %v2156_v54  ;;  %4585 = vst [vmem:[%s5570_s11 + $0xe8] sm:$0xff] %v2156_v54  ;;  %v2243_v19 = vadd.s32 127, %v2242_v44  ;;  %v2332_v17 = vshll.u32 %v6298_v43, 30  ;;  %v2255_v62 = vsel %vm6318_vm15, 0, %v2253_v39  ;;  %v2615_v2 = vsub.s32 32, %v2614_v28 }
 0x16d   : > { %v2241_v18 = vor.u32 %v2240_v47, %v2239_v58  ;;  %v6327_v5 = vand.u32 3, %v2255_v62  ;;  %v2617_v29 = vshll.u32 %v5075_v50, %v2614_v28  ;;  %v2620_v0 = vshll.u32 %v5076_v52, %v2614_v28 }
 0x16e   : > { %v2244_v1 = vshll.u32 %v2243_v19, 23  ;;  %v6322_v22 = vsub.s32 %v2329_v7, %v2332_v17  ;;  %v2618_v4 = vshrl.u32 %v5076_v52, %v2615_v2  ;;  %v2621_v51 = vshrl.u32 %v5077_v55, %v2615_v2 }
 0x16f   : > { %v2248_v24 = vcvt.s32.f32 %v2241_v18  ;;  %v2325_v59 = vadd.s32 %v6259_v27, %v6268_v37  ;;  %v6337_v46 = vadd.s32 3, %v2255_v62  ;;  %v2355_v34 = vsub.s32 4, %v6298_v43 }
 0x170   : > { %v2245_v20 = vor.u32 4788187, %v2244_v1  ;;  %v2335_v53 = vsub.s32 0, %v6322_v22  ;;  %v2613_v57 = vshrl.u32 %v2612_v41, 5  ;;  %v6340_v15 = vshll.u32 %v2608_v32, 8 }
 0x171   : > { %v2707_v30 = vshrl.u32 %v2706_v31, 23  ;;  %vm2271_vm4 = vcmp.lt.s32.totalorder %v6093_v9, 0  ;;  %v2623_v7 = vshll.u32 %v5077_v55, %v2614_v28  ;;  %v2624_v16 = vshrl.u32 %v5073_v42, %v2615_v2 }
 0x172   : > { %v2246_v3 = vand.u32 2147483647, %v2245_v20  ;;  %v4592_v60 = vmin.u32 %v2335_v53, %v6322_v22  ;;  %v2616_v27 = vshrl.u32 %v5075_v50, %v2615_v2  ;;  %v2619_v37 = vor.u32 %v2618_v4, %v2617_v29 }
 0x173   : > { %v2622_v48 = vor.u32 %v2621_v51, %v2620_v0  ;;  %v2626_v14 = vshll.u32 %v5073_v42, %v2614_v28  ;;  %v2625_v56 = vor.u32 %v2624_v16, %v2623_v7  ;;  %v2627_v23 = vshrl.u32 %v7274_v45, %v2615_v2 }
 0x174   : > { %v2249_v11 = vmul.f32 %v2248_v24, %v2246_v3  ;;  %v2337_v40 = vclz %v4592_v60  ;;  %v2629_v38 = vshll.u32 %v7274_v45, %v2614_v28  ;;  %v2630_v54 = vshrl.u32 %v7275_v25, %v2615_v2 }
 0x175   : > { %vm2632_vm3 = vcmp.lt.s32.totalorder %v2613_v57, 1  ;;  %vm2633_vm5 = vcmp.lt.s32.totalorder %v2613_v57, 2  ;;  %vm6354_vm1 = vcmp.le.f32.partialorder %v2269_v12, 0.7853982  ;;  %v2628_v58 = vor.u32 %v2627_v23, %v2626_v14 }
 0x176   : > { %v2250_v8 = vxor.u32 2147483648, %v2249_v11  ;;  %v4593_v13 = vadd.s32 4294967294, %v2337_v40  ;;  %vm2634_vm7 = vcmp.lt.s32.totalorder %v2613_v57, 3  ;;  %v2631_v41 = vor.u32 %v2630_v54, %v2629_v38 }
 0x177   : > { %vm2635_vm8 = vcmp.lt.s32.totalorder %v2613_v57, 4  ;;  %v2636_v12 = vsel %vm2632_vm3, %v2616_v27, %v2619_v37  ;;  %v2640_v28 = vsel %vm2632_vm3, %v2619_v37, %v2622_v48  ;;  %v2644_v2 = vsel %vm2632_vm3, %v2622_v48, %v2625_v56 }
 0x178   : > { %v2251_v21 = vsel %vm2168_vm2, %v2250_v8, %v2249_v11  ;;  %vm4594_vm6 = vcmp.lt.s32.totalorder %v4593_v13, 0  ;;  %v2637_v17 = vsel %vm2635_vm8, %v2625_v56, 2102212464  ;;  %v2641_v62 = vsel %vm2635_vm8, %v2628_v58, 920167782 }
 0x179   : > { %v2254_v44 = vsel %vm6318_vm15, %v6077_v10, %v2251_v21  ;;  %v2340_v35 = vsel %vm4594_vm6, 0, %v4593_v13  ;;  %v2638_v1 = vsel %vm2634_vm7, %v2622_v48, %v2637_v17  ;;  %v2642_v32 = vsel %vm2634_vm7, %v2625_v56, %v2641_v62 }
 0x17a   : > { %4896 = vcosq.f32 %v2254_v44  ;;  %v2341_v47 = vsub.s32 32, %v2340_v35  ;;  %v2342_v19 = vshll.u32 %v6322_v22, %v2340_v35  ;;  %v2345_v39 = vsub.s32 4294967266, %v2340_v35 }
 0x17b   : > { %4898 = vsinq.f32 %v2254_v44  ;;  %v2356_v22 = vsel %vm2271_vm4, %v2355_v34, %v6298_v43  ;;  %v2645_v31 = vsel %vm2635_vm8, %v2631_v41, 1326507024  ;;  %v2643_v53 = vsel %vm2633_vm5, %v2640_v28, %v2642_v32 }
 0x17c   : > { %v2343_v18 = vshrl.u32 %v2325_v59, %v2341_v47  ;;  %v2346_v6 = vadd.s32 127, %v2345_v39  ;;  %v2646_v29 = vsel %vm2634_vm7, %v2628_v58, %v2645_v31  ;;  %v2639_v4 = vsel %vm2633_vm5, %v2636_v12, %v2638_v1 }
 0x17d   : > { %v2647_v0 = vsel %vm2633_vm5, %v2644_v2, %v2646_v29  ;;  %v6380_v51 = vmul.u32.u64.low %v6340_v15, %v2643_v53  ;;  %v6381_v43 = vmul.u32.u64.high %v6340_v15, %v2643_v53, %v6380_v51  ;;  %v2358_v11 = vsel %vm6354_vm1, 0, %v2356_v22 }
 0x17e   : > { %v2344_v20 = vor.u32 %v2343_v18, %v2342_v19  ;;  %v2347_v24 = vshll.u32 %v2346_v6, 23  ;;  %v6385_v60 = vmul.u32.u64.low %v6340_v15, %v2647_v0  ;;  %v6386_v34 = vmul.u32.u64.high %v6340_v15, %v2647_v0, %v6385_v60 }
 0x17f   : > { %v4611_v40 = vadd.s32 4294967169, %v2707_v30  ;;  %v2655_v16 = vmul.u32 %v6340_v15, %v2639_v4  ;;  %v2703_v57 = vand.u32 2147483647, %v6308_v63  ;;  %v6393_v27 = vand.u32 3, %v6337_v46 }
 0x180   : > { %v2348_v3 = vor.u32 4788187, %v2347_v24  ;;  %v2351_v59 = vcvt.s32.f32 %v2344_v20  ;;  %v2658_v37 = vadd.s32 1, %v6381_v43  ;;  %v3031_v14 = vstv %s6365_s12 }
 0x181   : > { %v2713_v48 = vadd.s32 1, %v4611_v40  ;;  %vm2260_vm9 = vcmp.lt.s32.totalorder %v6327_v5, 2  ;;  %v2569_v56 = vadd.s32 3, %v2358_v11  ;;  %vm2657_vm13 = vc.u32 %v6386_v34, %v6380_v51 }
 0x182   : > { %v2349_v7 = vand.u32 2147483647, %v2348_v3  ;;  %vm2261_vm12 = vcmp.eq.s32.totalorder %v6327_v5, 0  ;;  %vm2264_vm14 = vcmp.eq.s32.totalorder %v6327_v5, 2  ;;  %v2659_v46 = vsel %vm2657_vm13, %v2658_v37, %v6381_v43 }
 0x183   : > { %vm2714_vm0 = vcmp.gt.s32.totalorder %v2713_v48, 0  ;;  %v2660_v23 = vadd.s32 %v2659_v46, %v2655_v16  ;;  %v2710_v38 = vand.u32 8388607, %v2703_v57  ;;  %v6405_v58 = vand.u32 3, %v2358_v11 }
 0x184   : > { %v4897_v8 = vpop.eup %4896  ;;  %v2352_v13 = vmul.f32 %v2351_v59, %v2349_v7  ;;  %v2715_v54 = vsel %vm2714_vm0, %v2713_v48, 0  ;;  %vm2467_vm10 = vcmp.lt.s32.totalorder %v6393_v27, 2  ;;  %vm2258_vm11 = vweird.f32 %v6077_v10 }
 0x185   : > { %v4899_v30 = vpop.eup %4898  ;;  %v2265_v21 = vxor.u32 2147483648, %v4897_v8  ;;  %v2717_v44 = vand.u32 31, %v2715_v54  ;;  %v6411_v47 = vand.u32 3, %v2569_v56  ;;  %v2661_v19 = vadd.s32 536870912, %v2660_v23 }
 0x186   : > { %v2353_v15 = vxor.u32 2147483648, %v2352_v13  ;;  %v2262_v35 = vxor.u32 2147483648, %v4899_v30  ;;  %vm2468_vm2 = vcmp.eq.s32.totalorder %v6393_v27, 0  ;;  %vm2471_vm15 = vcmp.eq.s32.totalorder %v6393_v27, 2 }
 0x187   : > { %v2718_v12 = vsub.s32 32, %v2717_v44  ;;  %v6418_v17 = vshrl.u32 %v2661_v19, 30  ;;  %v2711_v28 = vor.u32 8388608, %v2710_v38  ;;  %v6423_v18 = vmul.f32 %v3031_v14, %v6119_v49 }
 0x188   : > { %v2354_v41 = vsel %vm2271_vm4, %v2353_v15, %v2352_v13  ;;  %v2266_v6 = vsel %vm2264_vm14, %v2265_v21, %v4899_v30  ;;  %v2720_v36 = vshll.u32 %v5075_v50, %v2717_v44  ;;  %v2263_v62 = vsel %vm2261_vm12, %v4897_v8, %v2262_v35 }
 0x189   : > { %v2357_v39 = vsel %vm6354_vm1, %v6093_v9, %v2354_v41  ;;  %v2721_v1 = vshrl.u32 %v5076_v52, %v2718_v12  ;;  %vm2367_vm4 = vcmp.eq.s32.totalorder %v6405_v58, 2  ;;  %vm2575_vm3 = vcmp.eq.s32.totalorder %v6411_v47, 2 }
 0x18a   : > { %4900 = vcosq.f32 %v2357_v39  ;;  %v2663_v22 = vshll.u32 %v6418_v17, 30  ;;  %v2723_v32 = vshll.u32 %v5076_v52, %v2717_v44  ;;  %v2724_v2 = vshrl.u32 %v5077_v55, %v2718_v12 }
 0x18b   : > { %4902 = vsinq.f32 %v2357_v39  ;;  %vm2364_vm5 = vcmp.eq.s32.totalorder %v6405_v58, 0  ;;  %vm2572_vm1 = vcmp.eq.s32.totalorder %v6411_v47, 0  ;;  %v6438_v31 = vshrl.u32 %v2715_v54, 5 }
 0x18c   : > { %v2726_v20 = vshll.u32 %v5077_v55, %v2717_v44  ;;  %v2727_v24 = vshrl.u32 %v5073_v42, %v2718_v12  ;;  %v2729_v53 = vshll.u32 %v5073_v42, %v2717_v44  ;;  %vm2363_vm6 = vcmp.lt.s32.totalorder %v6405_v58, 2 }
 0x18d   : > { %v2470_v29 = vsel %vm2468_vm2, %v4897_v8, %v2262_v35  ;;  %v2473_v4 = vsel %vm2471_vm15, %v2265_v21, %v4899_v30  ;;  %vm2571_vm7 = vcmp.lt.s32.totalorder %v6411_v47, 2  ;;  %v6449_v0 = vsub.s32 %v2660_v23, %v2663_v22 }
 0x18e   : > { %v2730_v43 = vshrl.u32 %v7274_v45, %v2718_v12  ;;  %v2267_v3 = vsel %vm2260_vm9, %v2263_v62, %v2266_v6  ;;  %vm2361_vm8 = vweird.f32 %v6093_v9  ;;  %v2722_v59 = vor.u32 %v2721_v1, %v2720_v36 }
 0x18f   : > { %v2732_v60 = vshll.u32 %v7274_v45, %v2717_v44  ;;  %v2733_v11 = vshrl.u32 %v7275_v25, %v2718_v12  ;;  %v2666_v40 = vsub.s32 0, %v6449_v0  ;;  %v2725_v7 = vor.u32 %v2724_v2, %v2723_v32 }
 0x190   : > { %v2728_v16 = vor.u32 %v2727_v24, %v2726_v20  ;;  %v2731_v37 = vor.u32 %v2730_v43, %v2729_v53  ;;  %vm2735_vm13 = vcmp.lt.s32.totalorder %v6438_v31, 1  ;;  %vm2737_vm12 = vcmp.lt.s32.totalorder %v6438_v31, 3 }
 0x191   : > { %v2734_v48 = vor.u32 %v2733_v11, %v2732_v60  ;;  %vm2738_vm14 = vcmp.lt.s32.totalorder %v6438_v31, 4  ;;  %v2474_v5 = vsel %vm2467_vm10, %v2470_v29, %v2473_v4  ;;  %v4608_v8 = vmin.u32 %v2666_v40, %v6449_v0 }
 0x192   : > { %v2719_v13 = vshrl.u32 %v5075_v50, %v2718_v12  ;;  %v6465_v56 = vshll.u32 %v2711_v28, 8  ;;  %v2268_v30 = vsel %vm2258_vm11, nan, %v2267_v3  ;;  %v2656_v46 = vadd.s32 %v6380_v51, %v6386_v34 }
 0x193   : > { %vm2736_vm9 = vcmp.lt.s32.totalorder %v6438_v31, 2  ;;  %v2744_v15 = vsel %vm2738_vm14, %v2731_v37, 920167782  ;;  %v2668_v27 = vclz %v4608_v8  ;;  %v2740_v38 = vsel %vm2738_vm14, %v2728_v16, 2102212464 }
 0x194   : > { %v4901_v23 = vpop.eup %4900  ;;  %v2743_v54 = vsel %vm2735_vm13, %v2722_v59, %v2725_v7  ;;  %v2745_v21 = vsel %vm2737_vm12, %v2728_v16, %v2744_v15  ;;  %v2475_v51 = vsel %vm2258_vm11, nan, %v2474_v5  ;;  %v2747_v34 = vsel %vm2735_vm13, %v2725_v7, %v2728_v16 }
 0x195   : > { %v4903_v44 = vpop.eup %4902  ;;  %v2368_v35 = vxor.u32 2147483648, %v4901_v23  ;;  %v2748_v41 = vsel %vm2738_vm14, %v2734_v48, 1326507024  ;;  %v4609_v39 = vadd.s32 4294967294, %v2668_v27  ;;  %v2739_v12 = vsel %vm2735_vm13, %v2719_v13, %v2722_v59 }
 0x196   : > { %v2365_v19 = vxor.u32 2147483648, %v4903_v44  ;;  %v2749_v28 = vsel %vm2737_vm12, %v2731_v37, %v2748_v41  ;;  %v2741_v36 = vsel %vm2737_vm12, %v2725_v7, %v2740_v38  ;;  %v2746_v1 = vsel %vm2736_vm9, %v2743_v54, %v2745_v21 }
 0x197   : > { %v2369_v6 = vsel %vm2367_vm4, %v2368_v35, %v4903_v44  ;;  %v2577_v10 = vsel %vm2575_vm3, %v2368_v35, %v4903_v44  ;;  %vm4610_vm0 = vcmp.lt.s32.totalorder %v4609_v39, 0  ;;  %v2750_v32 = vsel %vm2736_vm9, %v2747_v34, %v2749_v28 }
 0x198   : > { %v2366_v62 = vsel %vm2364_vm5, %v4901_v23, %v2365_v19  ;;  %v2574_v22 = vsel %vm2572_vm1, %v4901_v23, %v2365_v19  ;;  %v2671_v24 = vsel %vm4610_vm0, 0, %v4609_v39  ;;  %v3037_v53 = vand.u32 2139095040, %v6423_v18 }
 0x199   : > { %v2370_v2 = vsel %vm2363_vm6, %v2366_v62, %v2369_v6  ;;  %v2578_v20 = vsel %vm2571_vm7, %v2574_v22, %v2577_v10  ;;  %v2672_v43 = vsub.s32 32, %v2671_v24  ;;  %v2673_v3 = vshll.u32 %v6449_v0, %v2671_v24 }
 0x19a   : > { %v2371_v29 = vsel %vm2361_vm8, nan, %v2370_v2  ;;  %v2579_v4 = vsel %vm2361_vm8, nan, %v2578_v20  ;;  %v2676_v60 = vsub.s32 4294967266, %v2671_v24  ;;  %v2742_v9 = vsel %vm2736_vm9, %v2739_v12, %v2741_v36 }
 0x19b   : > { %v2582_v58 = vcombine.low %v2268_v30, %v2371_v29  ;;  %v2590_v59 = vcombine.low %v2475_v51, %v2579_v4  ;;  %v2674_v11 = vshrl.u32 %v2656_v46, %v2672_v43  ;;  %v6531_v48 = vmul.f32 %v3031_v14, %v6130_v33 }
 0x19c   : > { %v6515_v47 = vmul.u32.u64.low %v6465_v56, %v2750_v32  ;;  %v6516_v40 = vmul.u32.u64.high %v6465_v56, %v2750_v32, %v6515_v47  ;;  %v2677_v7 = vadd.s32 127, %v2676_v60  ;;  %v3038_v5 = vshrl.u32 %v3037_v53, 23 }
 0x19d   : > { %4603 = vst [vmem:[%s5570_s11 + $0x50] sm:$0xff] %v2582_v58  ;;  %4604 = vst [vmem:[%s5570_s11 + $0x58] sm:$0xff] %v2582_v58  ;;  %v6525_v16 = vmul.u32.u64.low %v6465_v56, %v2746_v1  ;;  %v6526_v37 = vmul.u32.u64.high %v6465_v56, %v2746_v1, %v6525_v16  ;;  %v2675_v0 = vor.u32 %v2674_v11, %v2673_v3  ;;  %v2758_v13 = vmul.u32 %v6465_v56, %v2742_v9 }
 0x19e   : > { %4605 = vst [vmem:[%s5570_s11 + $0xf0] sm:$0xff] %v2590_v59  ;;  %4606 = vst [vmem:[%s5570_s11 + $0xf8] sm:$0xff] %v2590_v59  ;;  %v2678_v8 = vshll.u32 %v2677_v7, 23  ;;  %v4628_v30 = vadd.s32 4294967169, %v3038_v5  ;;  %v2686_v31 = vsub.s32 4, %v6418_v17  ;;  %v3140_v38 = vand.u32 2139095040, %v6531_v48 }
 0x19f   : > { %vm2760_vm10 = vc.u32 %v6516_v40, %v6525_v16  ;;  %v2682_v15 = vcvt.s32.f32 %v2675_v0  ;;  %v2761_v23 = vadd.s32 1, %v6526_v37  ;;  %vm2602_vm11 = vcmp.lt.s32.totalorder %v6150_v61, 0 }
 0x1a0   : > { %v2679_v46 = vor.u32 4788187, %v2678_v8  ;;  %v3044_v27 = vadd.s32 1, %v4628_v30  ;;  %v2687_v44 = vsel %vm2602_vm11, %v2686_v31, %v6418_v17  ;;  %v3034_v34 = vand.u32 2147483647, %v6423_v18 }
 0x1a1   : > { %v2762_v54 = vsel %vm2760_vm10, %v2761_v23, %v6526_v37  ;;  %v3141_v19 = vshrl.u32 %v3140_v38, 23  ;;  %vm2601_vm15 = vcmp.le.f32.partialorder %v2600_v26, 0.7853982  ;;  %v3465_v1 = vstv %s6537_s27 }
 0x1a2   : > { %v2680_v14 = vand.u32 2147483647, %v2679_v46  ;;  %v2763_v56 = vadd.s32 %v2762_v54, %v2758_v13  ;;  %vm3045_vm2 = vcmp.gt.s32.totalorder %v3044_v27, 0  ;;  %v2689_v12 = vsel %vm2601_vm15, 0, %v2687_v44 }
 0x1a3   : > { %v3046_v35 = vsel %vm3045_vm2, %v3044_v27, 0  ;;  %v6546_v36 = vand.u32 3, %v2689_v12  ;;  %v3041_v17 = vand.u32 8388607, %v3034_v34  ;;  %v3137_v22 = vand.u32 2147483647, %v6531_v48 }
 0x1a4   : > { %v2683_v21 = vmul.f32 %v2682_v15, %v2680_v14  ;;  %v2764_v51 = vadd.s32 536870912, %v2763_v56  ;;  %v3048_v41 = vand.u32 31, %v3046_v35  ;;  %v4632_v32 = vadd.s32 4294967169, %v3141_v19 }
 0x1a5   : > { %v3047_v20 = vshrl.u32 %v3046_v35, 5  ;;  %vm2705_vm4 = vcmp.lt.s32.totalorder %v6308_v63, 0  ;;  %v2899_v47 = vadd.s32 3, %v2689_v12  ;;  %v3144_v7 = vand.u32 8388607, %v3137_v22 }
 0x1a6   : > { %v2684_v39 = vxor.u32 2147483648, %v2683_v21  ;;  %v2765_v28 = vshrl.u32 %v2764_v51, 30  ;;  %v3049_v6 = vsub.s32 32, %v3048_v41  ;;  %v3051_v26 = vshll.u32 %v5075_v50, %v3048_v41 }
 0x1a7   : > { %v3060_v24 = vshll.u32 %v5073_v42, %v3048_v41  ;;  %v3057_v29 = vshll.u32 %v5077_v55, %v3048_v41  ;;  %v3054_v58 = vshll.u32 %v5076_v52, %v3048_v41  ;;  %v3063_v60 = vshll.u32 %v7274_v45, %v3048_v41 }
 0x1a8   : > { %v2685_v10 = vsel %vm2602_vm11, %v2684_v39, %v2683_v21  ;;  %v2766_v62 = vshll.u32 %v2765_v28, 30  ;;  %v3058_v4 = vshrl.u32 %v5073_v42, %v3049_v6  ;;  %v3061_v43 = vshrl.u32 %v7274_v45, %v3049_v6 }
 0x1a9   : > { %v2688_v2 = vsel %vm2601_vm15, %v6150_v61, %v2685_v10  ;;  %v3052_v3 = vshrl.u32 %v5076_v52, %v3049_v6  ;;  %v3055_v59 = vshrl.u32 %v5077_v55, %v3049_v6  ;;  %v2759_v9 = vadd.s32 %v6525_v16, %v6516_v40 }
 0x1aa   : > { %v6555_v53 = vsub.s32 %v2763_v56, %v2766_v62  ;;  %4904 = vcosq.f32 %v2688_v2  ;;  %v3042_v37 = vor.u32 8388608, %v3041_v17  ;;  %v3062_v0 = vor.u32 %v3061_v43, %v3060_v24 }
 0x1ab   : > { %v3064_v5 = vshrl.u32 %v7275_v25, %v3049_v6  ;;  %v3050_v13 = vshrl.u32 %v5075_v50, %v3049_v6  ;;  %v3059_v30 = vor.u32 %v3058_v4, %v3057_v29  ;;  %v3147_v46 = vadd.s32 1, %v4632_v32 }
 0x1ac   : > { %v2769_v11 = vsub.s32 0, %v6555_v53  ;;  %vm6574_vm3 = vcmp.le.f32.partialorder %v2703_v57, 0.7853982  ;;  %v3053_v31 = vor.u32 %v3052_v3, %v3051_v26  ;;  %v3056_v23 = vor.u32 %v3055_v59, %v3054_v58 }
 0x1ad   : > { %v3065_v27 = vor.u32 %v3064_v5, %v3063_v60  ;;  %vm3069_vm5 = vcmp.lt.s32.totalorder %v3047_v20, 4  ;;  %vm3066_vm1 = vcmp.lt.s32.totalorder %v3047_v20, 1  ;;  %v3145_v38 = vor.u32 8388608, %v3144_v7 }
 0x1ae   : > { %v4612_v8 = vmin.u32 %v2769_v11, %v6555_v53  ;;  %v3071_v16 = vsel %vm3069_vm5, %v3059_v30, 2102212464  ;;  %4906 = vsinq.f32 %v2688_v2  ;;  %v2789_v14 = vsub.s32 4, %v2765_v28 }
 0x1af   : > { %vm3068_vm6 = vcmp.lt.s32.totalorder %v3047_v20, 3  ;;  %v3075_v54 = vsel %vm3069_vm5, %v3062_v0, 920167782  ;;  %vm3067_vm7 = vcmp.lt.s32.totalorder %v3047_v20, 2  ;;  %v3070_v21 = vsel %vm3066_vm1, %v3050_v13, %v3053_v31 }
 0x1b0   : > { %v2771_v40 = vclz %v4612_v8  ;;  %v3072_v44 = vsel %vm3068_vm6, %v3056_v23, %v3071_v16  ;;  %v3074_v57 = vsel %vm3066_vm1, %v3053_v31, %v3056_v23  ;;  %v3078_v35 = vsel %vm3066_vm1, %v3056_v23, %v3059_v30 }
 0x1b1   : > { %v3079_v51 = vsel %vm3069_vm5, %v3065_v27, 1326507024  ;;  %vm3148_vm8 = vcmp.gt.s32.totalorder %v3147_v46, 0  ;;  %v3076_v41 = vsel %vm3068_vm6, %v3059_v30, %v3075_v54  ;;  %v2790_v6 = vsel %vm2705_vm4, %v2789_v14, %v2765_v28 }
 0x1b2   : > { %v4613_v56 = vadd.s32 4294967294, %v2771_v40  ;;  %v3080_v19 = vsel %vm3068_vm6, %v3062_v0, %v3079_v51  ;;  %v3149_v39 = vsel %vm3148_vm8, %v3147_v46, 0  ;;  %v3073_v10 = vsel %vm3067_vm7, %v3070_v21, %v3072_v44 }
 0x1b3   : > { %v3082_v62 = vshll.u32 %v3042_v37, 8  ;;  %v3081_v24 = vsel %vm3067_vm7, %v3078_v35, %v3080_v19  ;;  %v6585_v29 = vand.u32 3, %v2899_v47  ;;  %v3077_v4 = vsel %vm3067_vm7, %v3074_v57, %v3076_v41 }
 0x1b4   : > { %vm4614_vm13 = vcmp.lt.s32.totalorder %v4613_v56, 0  ;;  %v6581_v17 = vpop.eup %4904  ;;  %v3151_v43 = vand.u32 31, %v3149_v39  ;;  %v6591_v3 = vmul.f32 %v3465_v1, %v6119_v49  ;;  %v6595_v59 = vsel %vm6574_vm3, 0, %v2790_v6 }
 0x1b5   : > { %v2774_v12 = vsel %vm4614_vm13, 0, %v4613_v56  ;;  %v6597_v60 = vshll.u32 %v3145_v38, 8  ;;  %v6600_v11 = vmul.u32.u64.low %v3082_v62, %v3081_v24  ;;  %v6601_v47 = vmul.u32.u64.high %v3082_v62, %v3081_v24, %v6600_v11 }
 0x1b6   : > { %v2775_v32 = vsub.s32 32, %v2774_v12  ;;  %v2776_v2 = vshll.u32 %v6555_v53, %v2774_v12  ;;  %v2779_v26 = vsub.s32 4294967266, %v2774_v12  ;;  %v2699_v53 = vxor.u32 2147483648, %v6581_v17 }
 0x1b7   : > { %v3089_v20 = vmul.u32 %v3082_v62, %v3073_v10  ;;  %v6603_v0 = vmul.u32.u64.low %v3082_v62, %v3077_v4  ;;  %v6604_v5 = vmul.u32.u64.high %v3082_v62, %v3077_v4, %v6603_v0  ;;  %v6609_v8 = vshrl.u32 %v3149_v39, 5 }
 0x1b8   : > { %v2777_v28 = vshrl.u32 %v2759_v9, %v2775_v32  ;;  %v2780_v58 = vadd.s32 127, %v2779_v26  ;;  %v6607_v9 = vpop.eup %4906  ;;  %v3152_v13 = vsub.s32 32, %v3151_v43  ;;  %v3154_v30 = vshll.u32 %v5075_v50, %v3151_v43 }
 0x1b9   : > { %v3157_v46 = vshll.u32 %v5076_v52, %v3151_v43  ;;  %v3160_v27 = vshll.u32 %v5077_v55, %v3151_v43  ;;  %v3163_v40 = vshll.u32 %v5073_v42, %v3151_v43  ;;  %vm2698_vm12 = vcmp.eq.s32.totalorder %v6546_v36, 2 }
 0x1ba   : > { %v2778_v7 = vor.u32 %v2777_v28, %v2776_v2  ;;  %v2781_v37 = vshll.u32 %v2780_v58, 23  ;;  %vm3091_vm14 = vc.u32 %v6601_v47, %v6603_v0  ;;  %v3153_v16 = vshrl.u32 %v5075_v50, %v3152_v13 }
 0x1bb   : > { %v3155_v38 = vshrl.u32 %v5076_v52, %v3152_v13  ;;  %v3166_v14 = vshll.u32 %v7274_v45, %v3151_v43  ;;  %v3092_v56 = vadd.s32 1, %v6604_v5  ;;  %v3158_v21 = vshrl.u32 %v5077_v55, %v3152_v13 }
 0x1bc   : > { %v2782_v31 = vor.u32 4788187, %v2781_v37  ;;  %v2785_v23 = vcvt.s32.f32 %v2778_v7  ;;  %v3161_v44 = vshrl.u32 %v5073_v42, %v3152_v13  ;;  %vm2695_vm9 = vcmp.eq.s32.totalorder %v6546_v36, 0 }
 0x1bd   : > { %vm2902_vm0 = vcmp.eq.s32.totalorder %v6585_v29, 0  ;;  %vm2905_vm10 = vcmp.eq.s32.totalorder %v6585_v29, 2  ;;  %v3156_v57 = vor.u32 %v3155_v38, %v3154_v30  ;;  %v3164_v35 = vshrl.u32 %v7274_v45, %v3152_v13 }
 0x1be   : > { %v2783_v54 = vand.u32 2147483647, %v2782_v31  ;;  %v3167_v51 = vshrl.u32 %v7275_v25, %v3152_v13  ;;  %vm3169_vm11 = vcmp.lt.s32.totalorder %v6609_v8, 1  ;;  %v3093_v19 = vsel %vm3091_vm14, %v3092_v56, %v6604_v5 }
 0x1bf   : > { %v3159_v39 = vor.u32 %v3158_v21, %v3157_v46  ;;  %v3162_v12 = vor.u32 %v3161_v44, %v3160_v27  ;;  %v2696_v6 = vxor.u32 2147483648, %v6607_v9  ;;  %v3094_v10 = vadd.s32 %v3093_v19, %v3089_v20 }
 0x1c0   : > { %v2786_v41 = vmul.f32 %v2785_v23, %v2783_v54  ;;  %v3165_v62 = vor.u32 %v3164_v35, %v3163_v40  ;;  %v3168_v32 = vor.u32 %v3167_v51, %v3166_v14  ;;  %vm2694_vm2 = vcmp.lt.s32.totalorder %v6546_v36, 2 }
 0x1c1   : > { %vm2901_vm15 = vcmp.lt.s32.totalorder %v6585_v29, 2  ;;  %vm3170_vm5 = vcmp.lt.s32.totalorder %v6609_v8, 2  ;;  %vm3171_vm1 = vcmp.lt.s32.totalorder %v6609_v8, 3  ;;  %vm3172_vm6 = vcmp.lt.s32.totalorder %v6609_v8, 4 }
 0x1c2   : > { %v2787_v2 = vxor.u32 2147483648, %v2786_v41  ;;  %v3095_v26 = vadd.s32 536870912, %v3094_v10  ;;  %v3174_v24 = vsel %vm3172_vm6, %v3162_v12, 2102212464  ;;  %v3177_v4 = vsel %vm3169_vm11, %v3156_v57, %v3159_v39 }
 0x1c3   : > { %v3178_v43 = vsel %vm3172_vm6, %v3165_v62, 920167782  ;;  %v3173_v58 = vsel %vm3169_vm11, %v3153_v16, %v3156_v57  ;;  %v3175_v11 = vsel %vm3171_vm1, %v3159_v39, %v3174_v24  ;;  %vm2692_vm7 = vweird.f32 %v6150_v61 }
 0x1c4   : > { %v2788_v28 = vsel %vm2705_vm4, %v2787_v2, %v2786_v41  ;;  %v3179_v20 = vsel %vm3171_vm1, %v3162_v12, %v3178_v43  ;;  %v3096_v37 = vshrl.u32 %v3095_v26, 30  ;;  %v3181_v13 = vsel %vm3169_vm11, %v3159_v39, %v3162_v12 }
 0x1c5   : > { %v2791_v7 = vsel %vm6574_vm3, %v6308_v63, %v2788_v28  ;;  %v3180_v5 = vsel %vm3170_vm5, %v3177_v4, %v3179_v20  ;;  %v3182_v30 = vsel %vm3172_vm6, %v3168_v32, 1326507024  ;;  %v3003_v23 = vadd.s32 3, %v6595_v59 }
 0x1c6   : > { %4908 = vcosq.f32 %v2791_v7  ;;  %v6659_v46 = vmul.u32.u64.low %v6597_v60, %v3180_v5  ;;  %v6660_v31 = vmul.u32.u64.high %v6597_v60, %v3180_v5, %v6659_v46  ;;  %v3097_v27 = vshll.u32 %v3096_v37, 30 }
 0x1c7   : > { %4910 = vsinq.f32 %v2791_v7  ;;  %v3183_v15 = vsel %vm3171_vm1, %v3165_v62, %v3182_v30  ;;  %v2700_v40 = vsel %vm2698_vm12, %v2699_v53, %v6607_v9  ;;  %v2796_v16 = vand.u32 3, %v6595_v59 }
 0x1c8   : > { %v3184_v38 = vsel %vm3170_vm5, %v3181_v13, %v3183_v15  ;;  %v3471_v14 = vand.u32 2139095040, %v6591_v3  ;;  %vm3036_vm4 = vcmp.lt.s32.totalorder %v6423_v18, 0  ;;  %v6676_v54 = vsub.s32 %v3094_v10, %v3097_v27 }
 0x1c9   : > { %v3176_v56 = vsel %vm3170_vm5, %v3173_v58, %v3175_v11  ;;  %v6681_v21 = vmul.u32.u64.low %v6597_v60, %v3184_v38  ;;  %v6682_v44 = vmul.u32.u64.high %v6597_v60, %v3184_v38, %v6681_v21  ;;  %v2697_v59 = vsel %vm2695_vm9, %v6581_v17, %v2696_v6 }
 0x1ca   : > { %v2904_v57 = vsel %vm2902_vm0, %v6581_v17, %v2696_v6  ;;  %v2907_v35 = vsel %vm2905_vm10, %v2699_v53, %v6607_v9  ;;  %v3472_v8 = vshrl.u32 %v3471_v14, 23  ;;  %vm2795_vm3 = vweird.f32 %v6308_v63 }
 0x1cb   : > { %v3004_v51 = vand.u32 3, %v3003_v23  ;;  %v3100_v41 = vsub.s32 0, %v6676_v54  ;;  %v3195_v19 = vadd.s32 1, %v6660_v31  ;;  %v6701_v39 = vmul.f32 %v3465_v1, %v6130_v33 }
 0x1cc   : > { %vm2797_vm8 = vcmp.lt.s32.totalorder %v2796_v16, 2  ;;  %v3192_v12 = vmul.u32 %v6597_v60, %v3176_v56  ;;  %v3468_v17 = vand.u32 2147483647, %v6591_v3  ;;  %v4649_v6 = vadd.s32 4294967169, %v3472_v8 }
 0x1cd   : > { %v2701_v53 = vsel %vm2694_vm2, %v2697_v59, %v2700_v40  ;;  %vm2798_vm13 = vcmp.eq.s32.totalorder %v2796_v16, 0  ;;  %v2908_v9 = vsel %vm2901_vm15, %v2904_v57, %v2907_v35  ;;  %v4629_v10 = vmin.u32 %v3100_v41, %v6676_v54 }
 0x1ce   : > { %vm2801_vm12 = vcmp.eq.s32.totalorder %v2796_v16, 2  ;;  %v3120_v62 = vsub.s32 4, %v3096_v37  ;;  %vm3194_vm14 = vc.u32 %v6682_v44, %v6659_v46  ;;  %v3478_v1 = vadd.s32 1, %v4649_v6 }
 0x1cf   : > { %vm3005_vm9 = vcmp.lt.s32.totalorder %v3004_v51, 2  ;;  %vm3006_vm0 = vcmp.eq.s32.totalorder %v3004_v51, 0  ;;  %vm6714_vm10 = vcmp.le.f32.partialorder %v3034_v34, 0.7853982  ;;  %v3102_v36 = vclz %v4629_v10 }
 0x1d0   : > { %v3196_v29 = vsel %vm3194_vm14, %v3195_v19, %v6660_v31  ;;  %v4909_v32 = vpop.eup %4908  ;;  %v2702_v2 = vsel %vm2692_vm7, nan, %v2701_v53  ;;  %v2909_v26 = vsel %vm2692_vm7, nan, %v2908_v9  ;;  %vm3009_vm11 = vcmp.eq.s32.totalorder %v3004_v51, 2 }
 0x1d1   : > { %v3197_v24 = vadd.s32 %v3196_v29, %v3192_v12  ;;  %v4911_v4 = vpop.eup %4910  ;;  %v2802_v43 = vxor.u32 2147483648, %v4909_v32  ;;  %v3090_v34 = vadd.s32 %v6603_v0, %v6601_v47  ;;  %v4630_v28 = vadd.s32 4294967294, %v3102_v36 }
 0x1d2   : > { %vm3479_vm2 = vcmp.gt.s32.totalorder %v3478_v1, 0  ;;  %v2799_v58 = vxor.u32 2147483648, %v4911_v4  ;;  %v3121_v11 = vsel %vm3036_vm4, %v3120_v62, %v3096_v37  ;;  %v3475_v7 = vand.u32 8388607, %v3468_v17 }
 0x1d3   : > { %v3198_v20 = vadd.s32 536870912, %v3197_v24  ;;  %v2803_v61 = vsel %vm2801_vm12, %v2802_v43, %v4911_v4  ;;  %v3011_v5 = vsel %vm3009_vm11, %v2802_v43, %v4911_v4  ;;  %vm4631_vm15 = vcmp.lt.s32.totalorder %v4630_v28, 0 }
 0x1d4   : > { %v3480_v13 = vsel %vm3479_vm2, %v3478_v1, 0  ;;  %v2800_v30 = vsel %vm2798_vm13, %v4909_v32, %v2799_v58  ;;  %v3008_v31 = vsel %vm3006_vm0, %v4909_v32, %v2799_v58  ;;  %v3105_v47 = vsel %vm4631_vm15, 0, %v4630_v28 }
 0x1d5   : > { %v3199_v0 = vshrl.u32 %v3198_v20, 30  ;;  %v2804_v23 = vsel %vm2797_vm8, %v2800_v30, %v2803_v61  ;;  %v3012_v37 = vsel %vm3005_vm9, %v3008_v31, %v3011_v5  ;;  %v3106_v27 = vsub.s32 32, %v3105_v47 }
 0x1d6   : > { %v3107_v15 = vshll.u32 %v6676_v54, %v3105_v47  ;;  %v2805_v40 = vsel %vm2795_vm3, nan, %v2804_v23  ;;  %v3013_v38 = vsel %vm2795_vm3, nan, %v3012_v37  ;;  %v3110_v14 = vsub.s32 4294967266, %v3105_v47 }
 0x1d7   : > { %v3200_v56 = vshll.u32 %v3199_v0, 30  ;;  %v3016_v21 = vcombine.low %v2702_v2, %v2805_v40  ;;  %v3024_v16 = vcombine.low %v2909_v26, %v3013_v38  ;;  %v3108_v59 = vshrl.u32 %v3090_v34, %v3106_v27 }
 0x1d8   : > { %v3476_v57 = vor.u32 8388608, %v3475_v7  ;;  %v3111_v35 = vadd.s32 127, %v3110_v14  ;;  %v6741_v8 = vsel %vm6714_vm10, 0, %v3121_v11  ;;  %v3482_v54 = vand.u32 31, %v3480_v13 }
 0x1d9   : > { %v6743_v51 = vsub.s32 %v3197_v24, %v3200_v56  ;;  %4623 = vst [vmem:[%s5570_s11 + $0x60] sm:$0xff] %v3016_v21  ;;  %4624 = vst [vmem:[%s5570_s11 + $0x68] sm:$0xff] %v3016_v21  ;;  %v3109_v63 = vor.u32 %v3108_v59, %v3107_v15  ;;  %v6749_v41 = vshrl.u32 %v3480_v13, 5  ;;  %v3574_v19 = vand.u32 2139095040, %v6701_v39 }
 0x1da   : > { %4625 = vst [vmem:[%s5570_s11 + $0x100] sm:$0xff] %v3024_v16  ;;  %4626 = vst [vmem:[%s5570_s11 + $0x108] sm:$0xff] %v3024_v16  ;;  %v3112_v12 = vshll.u32 %v3111_v35, 23  ;;  %v3223_v53 = vsub.s32 4, %v3199_v0  ;;  %v3483_v9 = vsub.s32 32, %v3482_v54  ;;  %vm3139_vm5 = vcmp.lt.s32.totalorder %v6531_v48, 0 }
 0x1db   : > { %v3203_v6 = vsub.s32 0, %v6743_v51  ;;  %v6755_v10 = vadd.s32 3, %v6741_v8  ;;  %v6757_v62 = vshll.u32 %v3476_v57, 8  ;;  %v3116_v36 = vcvt.s32.f32 %v3109_v63 }
 0x1dc   : > { %v3113_v1 = vor.u32 4788187, %v3112_v12  ;;  %v3193_v29 = vadd.s32 %v6659_v46, %v6682_v44  ;;  %v3485_v2 = vshll.u32 %v5075_v50, %v3482_v54  ;;  %v3486_v26 = vshrl.u32 %v5076_v52, %v3483_v9 }
 0x1dd   : > { %v4633_v32 = vmin.u32 %v3203_v6, %v6743_v51  ;;  %vm3500_vm1 = vcmp.lt.s32.totalorder %v6749_v41, 1  ;;  %v3575_v24 = vshrl.u32 %v3574_v19, 23  ;;  %v3224_v34 = vsel %vm3139_vm5, %v3223_v53, %v3199_v0 }
 0x1de   : > { %v3114_v4 = vand.u32 2147483647, %v3113_v1  ;;  %v3488_v28 = vshll.u32 %v5076_v52, %v3482_v54  ;;  %v3484_v58 = vshrl.u32 %v5075_v50, %v3483_v9  ;;  %v3489_v46 = vshrl.u32 %v5077_v55, %v3483_v9 }
 0x1df   : > { %v3205_v43 = vclz %v4633_v32  ;;  %vm3501_vm6 = vcmp.lt.s32.totalorder %v6749_v41, 2  ;;  %vm3502_vm7 = vcmp.lt.s32.totalorder %v6749_v41, 3  ;;  %vm6774_vm3 = vcmp.le.f32.partialorder %v3137_v22, 0.7853982 }
 0x1e0   : > { %v3117_v44 = vmul.f32 %v3116_v36, %v3114_v4  ;;  %v3491_v7 = vshll.u32 %v5077_v55, %v3482_v54  ;;  %v3492_v61 = vshrl.u32 %v5073_v42, %v3483_v9  ;;  %v3487_v5 = vor.u32 %v3486_v26, %v3485_v2 }
 0x1e1   : > { %v4634_v20 = vadd.s32 4294967294, %v3205_v43  ;;  %v3494_v13 = vshll.u32 %v5073_v42, %v3482_v54  ;;  %v3495_v30 = vshrl.u32 %v7274_v45, %v3483_v9  ;;  %v3497_v31 = vshll.u32 %v7274_v45, %v3482_v54 }
 0x1e2   : > { %v3118_v47 = vxor.u32 2147483648, %v3117_v44  ;;  %v3490_v0 = vor.u32 %v3489_v46, %v3488_v28  ;;  %v3498_v22 = vshrl.u32 %v7275_v25, %v3483_v9  ;;  %v3493_v37 = vor.u32 %v3492_v61, %v3491_v7 }
 0x1e3   : > { %vm4635_vm8 = vcmp.lt.s32.totalorder %v4634_v20, 0  ;;  %v3496_v27 = vor.u32 %v3495_v30, %v3494_v13  ;;  %vm3503_vm13 = vcmp.lt.s32.totalorder %v6749_v41, 4  ;;  %v3504_v16 = vsel %vm3500_vm1, %v3484_v58, %v3487_v5 }
 0x1e4   : > { %v3208_v23 = vsel %vm4635_vm8, 0, %v4634_v20  ;;  %v3119_v15 = vsel %vm3036_vm4, %v3118_v47, %v3117_v44  ;;  %v3499_v21 = vor.u32 %v3498_v22, %v3497_v31  ;;  %v3505_v59 = vsel %vm3503_vm13, %v3493_v37, 2102212464 }
 0x1e5   : > { %v3209_v40 = vsub.s32 32, %v3208_v23  ;;  %v3210_v38 = vshll.u32 %v6743_v51, %v3208_v23  ;;  %v3213_v14 = vsub.s32 4294967266, %v3208_v23  ;;  %v3122_v56 = vsel %vm6714_vm10, %v6423_v18, %v3119_v15 }
 0x1e6   : > { %4912 = vcosq.f32 %v3122_v56  ;;  %v3508_v54 = vsel %vm3500_vm1, %v3487_v5, %v3490_v0  ;;  %v3506_v60 = vsel %vm3502_vm7, %v3490_v0, %v3505_v59  ;;  %v3509_v51 = vsel %vm3503_vm13, %v3496_v27, 920167782 }
 0x1e7   : > { %v3211_v57 = vshrl.u32 %v3193_v29, %v3209_v40  ;;  %v3214_v35 = vadd.s32 127, %v3213_v14  ;;  %4914 = vsinq.f32 %v3122_v56  ;;  %v3512_v63 = vsel %vm3500_vm1, %v3490_v0, %v3493_v37 }
 0x1e8   : > { %v3510_v6 = vsel %vm3502_vm7, %v3493_v37, %v3509_v51  ;;  %v3513_v53 = vsel %vm3503_vm13, %v3499_v21, 1326507024  ;;  %v3226_v9 = vsel %vm6774_vm3, 0, %v3224_v34  ;;  %v4653_v29 = vadd.s32 4294967169, %v3575_v24 }
 0x1e9   : > { %v3212_v19 = vor.u32 %v3211_v57, %v3210_v38  ;;  %v3215_v12 = vshll.u32 %v3214_v35, 23  ;;  %v3511_v1 = vsel %vm3501_vm6, %v3508_v54, %v3510_v6  ;;  %v3514_v36 = vsel %vm3502_vm7, %v3496_v27, %v3513_v53 }
 0x1ea   : > { %v3507_v26 = vsel %vm3501_vm6, %v3504_v16, %v3506_v60  ;;  %v3515_v4 = vsel %vm3501_vm6, %v3512_v63, %v3514_v36  ;;  %v6824_v34 = vmul.u32.u64.low %v6757_v62, %v3511_v1  ;;  %v6825_v58 = vmul.u32.u64.high %v6757_v62, %v3511_v1, %v6824_v34 }
 0x1eb   : > { %v3216_v32 = vor.u32 4788187, %v3215_v12  ;;  %v3219_v2 = vcvt.s32.f32 %v3212_v19  ;;  %v6820_v43 = vmul.u32.u64.low %v6757_v62, %v3515_v4  ;;  %v6821_v28 = vmul.u32.u64.high %v6757_v62, %v3515_v4, %v6820_v43 }
 0x1ec   : > { %v3127_v46 = vand.u32 3, %v6741_v8  ;;  %v6830_v44 = vand.u32 3, %v6755_v10  ;;  %v3581_v20 = vadd.s32 1, %v4653_v29  ;;  %v3437_v7 = vadd.s32 3, %v3226_v9 }
 0x1ed   : > { %v3217_v24 = vand.u32 2147483647, %v3216_v32  ;;  %v3523_v41 = vmul.u32 %v6757_v62, %v3507_v26  ;;  %v3899_v5 = vstv %s6797_s28  ;;  %vm3525_vm12 = vc.u32 %v6821_v28, %v6824_v34 }
 0x1ee   : > { %vm3582_vm4 = vcmp.gt.s32.totalorder %v3581_v20, 0  ;;  %v3526_v13 = vadd.s32 1, %v6825_v58  ;;  %v3571_v30 = vand.u32 2147483647, %v6701_v39  ;;  %vm3132_vm14 = vcmp.eq.s32.totalorder %v3127_v46, 2 }
 0x1ef   : > { %v3220_v61 = vmul.f32 %v3219_v2, %v3217_v24  ;;  %v3583_v31 = vsel %vm3582_vm4, %v3581_v20, 0  ;;  %vm3339_vm9 = vcmp.eq.s32.totalorder %v6830_v44, 2  ;;  %v6839_v23 = vand.u32 3, %v3226_v9 }
 0x1f0   : > { %v4913_v8 = vpop.eup %4912  ;;  %v3585_v10 = vand.u32 31, %v3583_v31  ;;  %v6841_v62 = vand.u32 3, %v3437_v7  ;;  %v3527_v37 = vsel %vm3525_vm12, %v3526_v13, %v6825_v58  ;;  %vm3126_vm0 = vweird.f32 %v6423_v18 }
 0x1f1   : > { %v3221_v47 = vxor.u32 2147483648, %v3220_v61  ;;  %v4915_v0 = vpop.eup %4914  ;;  %v3133_v22 = vxor.u32 2147483648, %v4913_v8  ;;  %v3528_v40 = vadd.s32 %v3527_v37, %v3523_v41  ;;  %vm3128_vm10 = vcmp.lt.s32.totalorder %v3127_v46, 2 }
 0x1f2   : > { %v3130_v27 = vxor.u32 2147483648, %v4915_v0  ;;  %v3586_v38 = vsub.s32 32, %v3585_v10  ;;  %vm3129_vm11 = vcmp.eq.s32.totalorder %v3127_v46, 0  ;;  %vm3336_vm2 = vcmp.eq.s32.totalorder %v6830_v44, 0 }
 0x1f3   : > { %v3222_v15 = vsel %vm3139_vm5, %v3221_v47, %v3220_v61  ;;  %vm3335_vm15 = vcmp.lt.s32.totalorder %v6830_v44, 2  ;;  %v3529_v56 = vadd.s32 536870912, %v3528_v40  ;;  %v3578_v21 = vand.u32 8388607, %v3571_v30 }
 0x1f4   : > { %v3225_v14 = vsel %vm6774_vm3, %v6531_v48, %v3222_v15  ;;  %v3134_v16 = vsel %vm3132_vm14, %v3133_v22, %v4915_v0  ;;  %v3341_v59 = vsel %vm3339_vm9, %v3133_v22, %v4915_v0  ;;  %v3588_v57 = vshll.u32 %v5075_v50, %v3585_v10 }
 0x1f5   : > { %4916 = vcosq.f32 %v3225_v14  ;;  %v3131_v35 = vsel %vm3129_vm11, %v4913_v8, %v3130_v27  ;;  %vm3235_vm5 = vcmp.eq.s32.totalorder %v6839_v23, 2  ;;  %v3338_v11 = vsel %vm3336_vm2, %v4913_v8, %v3130_v27 }
 0x1f6   : > { %4918 = vsinq.f32 %v3225_v14  ;;  %vm3443_vm1 = vcmp.eq.s32.totalorder %v6841_v62, 2  ;;  %v6860_v54 = vshrl.u32 %v3529_v56, 30  ;;  %v3589_v60 = vshrl.u32 %v5076_v52, %v3586_v38 }
 0x1f7   : > { %vm3232_vm6 = vcmp.eq.s32.totalorder %v6839_v23, 0  ;;  %vm3440_vm7 = vcmp.eq.s32.totalorder %v6841_v62, 0  ;;  %v3591_v51 = vshll.u32 %v5076_v52, %v3585_v10  ;;  %v3592_v63 = vshrl.u32 %v5077_v55, %v3586_v38 }
 0x1f8   : > { %v3594_v19 = vshll.u32 %v5077_v55, %v3585_v10  ;;  %v3595_v12 = vshrl.u32 %v5073_v42, %v3586_v38  ;;  %vm3231_vm3 = vcmp.lt.s32.totalorder %v6839_v23, 2  ;;  %vm3439_vm8 = vcmp.lt.s32.totalorder %v6841_v62, 2 }
 0x1f9   : > { %v3531_v6 = vshll.u32 %v6860_v54, 30  ;;  %v3579_v53 = vor.u32 8388608, %v3578_v21  ;;  %v3584_v9 = vshrl.u32 %v3583_v31, 5  ;;  %v3597_v1 = vshll.u32 %v5073_v42, %v3585_v10 }
 0x1fa   : > { %v3135_v36 = vsel %vm3128_vm10, %v3131_v35, %v3134_v16  ;;  %vm3229_vm13 = vweird.f32 %v6531_v48  ;;  %v3598_v29 = vshrl.u32 %v7274_v45, %v3586_v38  ;;  %v3600_v32 = vshll.u32 %v7274_v45, %v3585_v10 }
 0x1fb   : > { %v6880_v2 = vmul.f32 %v3899_v5, %v6119_v49  ;;  %v3342_v26 = vsel %vm3335_vm15, %v3338_v11, %v3341_v59  ;;  %v6884_v4 = vsub.s32 %v3528_v40, %v3531_v6  ;;  %v3587_v43 = vshrl.u32 %v5075_v50, %v3586_v38 }
 0x1fc   : > { %v3601_v58 = vshrl.u32 %v7275_v25, %v3586_v38  ;;  %v3590_v46 = vor.u32 %v3589_v60, %v3588_v57  ;;  %v3593_v24 = vor.u32 %v3592_v63, %v3591_v51  ;;  %v3596_v20 = vor.u32 %v3595_v12, %v3594_v19 }
 0x1fd   : > { %v3599_v7 = vor.u32 %v3598_v29, %v3597_v1  ;;  %v3534_v61 = vsub.s32 0, %v6884_v4  ;;  %vm3603_vm4 = vcmp.lt.s32.totalorder %v3584_v9, 1  ;;  %vm3606_vm12 = vcmp.lt.s32.totalorder %v3584_v9, 4 }
 0x1fe   : > { %v6889_v41 = vshll.u32 %v3579_v53, 8  ;;  %v3602_v49 = vor.u32 %v3601_v58, %v3600_v32  ;;  %vm3605_vm14 = vcmp.lt.s32.totalorder %v3584_v9, 3  ;;  %v3608_v44 = vsel %vm3606_vm12, %v3596_v20, 2102212464 }
 0x1ff   : > { %v3612_v13 = vsel %vm3606_vm12, %v3599_v7, 920167782  ;;  %v4917_v31 = vpop.eup %4916  ;;  %v3136_v8 = vsel %vm3126_vm0, nan, %v3135_v36  ;;  %v3343_v47 = vsel %vm3126_vm0, nan, %v3342_v26  ;;  %v4650_v10 = vmin.u32 %v3534_v61, %v6884_v4 }
 0x200   : > { %v3905_v0 = vand.u32 2139095040, %v6880_v2  ;;  %v4919_v22 = vpop.eup %4918  ;;  %v3236_v37 = vxor.u32 2147483648, %v4917_v31  ;;  %vm3604_vm9 = vcmp.lt.s32.totalorder %v3584_v9, 2  ;;  %v3607_v27 = vsel %vm3603_vm4, %v3587_v43, %v3590_v46 }
 0x201   : > { %v3611_v15 = vsel %vm3603_vm4, %v3590_v46, %v3593_v24  ;;  %v3233_v40 = vxor.u32 2147483648, %v4919_v22  ;;  %v3536_v38 = vclz %v4650_v10  ;;  %v3609_v14 = vsel %vm3605_vm14, %v3593_v24, %v3608_v44 }
 0x202   : > { %v3613_v56 = vsel %vm3605_vm14, %v3596_v20, %v3612_v13  ;;  %v3237_v18 = vsel %vm3235_vm5, %v3236_v37, %v4919_v22  ;;  %v3445_v21 = vsel %vm3443_vm1, %v3236_v37, %v4919_v22  ;;  %v3615_v16 = vsel %vm3603_vm4, %v3593_v24, %v3596_v20 }
 0x203   : > { %v3616_v59 = vsel %vm3606_vm12, %v3602_v49, 1326507024  ;;  %v3234_v57 = vsel %vm3232_vm6, %v4917_v31, %v3233_v40  ;;  %v3442_v35 = vsel %vm3440_vm7, %v4917_v31, %v3233_v40  ;;  %v4651_v11 = vadd.s32 4294967294, %v3536_v38 }
 0x204   : > { %v3617_v60 = vsel %vm3605_vm14, %v3599_v7, %v3616_v59  ;;  %v3238_v51 = vsel %vm3231_vm3, %v3234_v57, %v3237_v18  ;;  %v3446_v63 = vsel %vm3439_vm8, %v3442_v35, %v3445_v21  ;;  %v3524_v19 = vadd.s32 %v6824_v34, %v6821_v28 }
 0x205   : > { %v3614_v12 = vsel %vm3604_vm9, %v3611_v15, %v3613_v56  ;;  %v3239_v6 = vsel %vm3229_vm13, nan, %v3238_v51  ;;  %v3447_v53 = vsel %vm3229_vm13, nan, %v3446_v63  ;;  %vm4652_vm0 = vcmp.lt.s32.totalorder %v4651_v11, 0 }
 0x206   : > { %v3618_v23 = vsel %vm3604_vm9, %v3615_v16, %v3617_v60  ;;  %v3450_v62 = vcombine.low %v3136_v8, %v3239_v6  ;;  %v3458_v1 = vcombine.low %v3343_v47, %v3447_v53  ;;  %v3539_v36 = vsel %vm4652_vm0, 0, %v4651_v11 }
 0x207   : > { %v3610_v29 = vsel %vm3604_vm9, %v3607_v27, %v3609_v14  ;;  %v3540_v32 = vsub.s32 32, %v3539_v36  ;;  %v3541_v28 = vshll.u32 %v6884_v4, %v3539_v36  ;;  %v3544_v34 = vsub.s32 4294967266, %v3539_v36 }
 0x208   : > { %v3906_v26 = vshrl.u32 %v3905_v0, 23  ;;  %4644 = vst [vmem:[%s5570_s11 + $0x70] sm:$0xff] %v3450_v62  ;;  %4645 = vst [vmem:[%s5570_s11 + $0x78] sm:$0xff] %v3450_v62  ;;  %v6933_v48 = vmul.u32.u64.low %v6889_v41, %v3618_v23  ;;  %v6934_v43 = vmul.u32.u64.high %v6889_v41, %v3618_v23, %v6933_v48  ;;  %v3626_v61 = vmul.u32 %v6889_v41, %v3610_v29 }
 0x209   : > { %4646 = vst [vmem:[%s5570_s11 + $0x110] sm:$0xff] %v3458_v1  ;;  %4647 = vst [vmem:[%s5570_s11 + $0x118] sm:$0xff] %v3458_v1  ;;  %v6937_v58 = vmul.u32.u64.low %v6889_v41, %v3614_v12  ;;  %v6938_v46 = vmul.u32.u64.high %v6889_v41, %v3614_v12, %v6937_v58  ;;  %v3542_v9 = vshrl.u32 %v3524_v19, %v3540_v32  ;;  %v3545_v24 = vadd.s32 127, %v3544_v34 }
 0x20a   : > { %v4670_v20 = vadd.s32 4294967169, %v3906_v26  ;;  %v6947_v0 = vmul.f32 %v3899_v5, %v6130_v33  ;;  %v3902_v22 = vand.u32 2147483647, %v6880_v2  ;;  %v3554_v27 = vsub.s32 4, %v6860_v54 }
 0x20b   : > { %v3543_v7 = vor.u32 %v3542_v9, %v3541_v28  ;;  %v3546_v4 = vshll.u32 %v3545_v24, 23  ;;  %vm3628_vm10 = vc.u32 %v6934_v43, %v6937_v58  ;;  %v3629_v49 = vadd.s32 1, %v6938_v46 }
 0x20c   : > { %v3912_v31 = vadd.s32 1, %v4670_v20  ;;  %vm3470_vm2 = vcmp.lt.s32.totalorder %v6591_v3, 0  ;;  %vm6956_vm15 = vcmp.le.f32.partialorder %v3468_v17, 0.7853982  ;;  %v3909_v21 = vand.u32 8388607, %v3902_v22 }
 0x20d   : > { %v3547_v44 = vor.u32 4788187, %v3546_v4  ;;  %v3550_v13 = vcvt.s32.f32 %v3543_v7  ;;  %v3630_v8 = vsel %vm3628_vm10, %v3629_v49, %v6938_v46  ;;  %v3555_v33 = vsel %vm3470_vm2, %v3554_v27, %v6860_v54 }
 0x20e   : > { %v3631_v10 = vadd.s32 %v3630_v8, %v3626_v61  ;;  %vm3913_vm11 = vcmp.gt.s32.totalorder %v3912_v31, 0  ;;  %v4008_v16 = vand.u32 2139095040, %v6947_v0  ;;  %v3557_v53 = vsel %vm6956_vm15, 0, %v3555_v33 }
 0x20f   : > { %v3548_v47 = vand.u32 2147483647, %v3547_v44  ;;  %v3914_v37 = vsel %vm3913_vm11, %v3912_v31, 0  ;;  %v4005_v62 = vand.u32 2147483647, %v6947_v0  ;;  %v3627_v29 = vadd.s32 %v6937_v58, %v6934_v43 }
 0x210   : > { %v3632_v15 = vadd.s32 536870912, %v3631_v10  ;;  %v3916_v40 = vand.u32 31, %v3914_v37  ;;  %v3915_v63 = vshrl.u32 %v3914_v37, 5  ;;  %v4009_v1 = vshrl.u32 %v4008_v16, 23 }
 0x211   : > { %v3551_v41 = vmul.f32 %v3550_v13, %v3548_v47  ;;  %v3910_v32 = vor.u32 8388608, %v3909_v21  ;;  %v4012_v58 = vand.u32 8388607, %v4005_v62  ;;  %vm3573_vm8 = vcmp.lt.s32.totalorder %v6701_v39, 0 }
 0x212   : > { %v6952_v14 = vshrl.u32 %v3632_v15, 30  ;;  %v3917_v56 = vsub.s32 32, %v3916_v40  ;;  %v3922_v57 = vshll.u32 %v5076_v52, %v3916_v40  ;;  %v3925_v35 = vshll.u32 %v5077_v55, %v3916_v40 }
 0x213   : > { %v3552_v38 = vxor.u32 2147483648, %v3551_v41  ;;  %v3928_v11 = vshll.u32 %v5073_v42, %v3916_v40  ;;  %v3919_v19 = vshll.u32 %v5075_v50, %v3916_v40  ;;  %v3931_v6 = vshll.u32 %v7274_v45, %v3916_v40 }
 0x214   : > { %v3634_v5 = vshll.u32 %v6952_v14, 30  ;;  %v3923_v60 = vshrl.u32 %v5077_v55, %v3917_v56  ;;  %v3926_v54 = vshrl.u32 %v5073_v42, %v3917_v56  ;;  %v3929_v51 = vshrl.u32 %v7274_v45, %v3917_v56 }
 0x215   : > { %v3553_v59 = vsel %vm3470_vm2, %v3552_v38, %v3551_v41  ;;  %v3920_v12 = vshrl.u32 %v5076_v52, %v3917_v56  ;;  %v3932_v28 = vshrl.u32 %v7275_v25, %v3917_v56  ;;  %vm3934_vm5 = vcmp.lt.s32.totalorder %v3915_v63, 1 }
 0x216   : > { %v6968_v17 = vsub.s32 %v3631_v10, %v3634_v5  ;;  %v3556_v36 = vsel %vm6956_vm15, %v6591_v3, %v3553_v59  ;;  %v3924_v26 = vor.u32 %v3923_v60, %v3922_v57  ;;  %v3927_v48 = vor.u32 %v3926_v54, %v3925_v35 }
 0x217   : > { %v3930_v46 = vor.u32 %v3929_v51, %v3928_v11  ;;  %v3921_v9 = vor.u32 %v3920_v12, %v3919_v19  ;;  %v3933_v24 = vor.u32 %v3932_v28, %v3931_v6  ;;  %vm3937_vm1 = vcmp.lt.s32.totalorder %v3915_v63, 4 }
 0x218   : > { %v3637_v23 = vsub.s32 0, %v6968_v17  ;;  %4920 = vcosq.f32 %v3556_v36  ;;  %vm3936_vm6 = vcmp.lt.s32.totalorder %v3915_v63, 3  ;;  %v4674_v7 = vadd.s32 4294967169, %v4009_v1 }
 0x219   : > { %v3918_v4 = vshrl.u32 %v5075_v50, %v3917_v56  ;;  %vm3935_vm7 = vcmp.lt.s32.totalorder %v3915_v63, 2  ;;  %v6987_v43 = vshll.u32 %v3910_v32, 8  ;;  %v3939_v49 = vsel %vm3937_vm1, %v3927_v48, 2102212464 }
 0x21a   : > { %v4654_v34 = vmin.u32 %v3637_v23, %v6968_v17  ;;  %v3943_v44 = vsel %vm3937_vm1, %v3930_v46, 920167782  ;;  %v3946_v13 = vsel %vm3934_vm5, %v3924_v26, %v3927_v48  ;;  %v3657_v31 = vsub.s32 4, %v6952_v14 }
 0x21b   : > { %v3942_v8 = vsel %vm3934_vm5, %v3921_v9, %v3924_v26  ;;  %v3944_v47 = vsel %vm3936_vm6, %v3927_v48, %v3943_v44  ;;  %v3947_v10 = vsel %vm3937_vm1, %v3933_v24, 1326507024  ;;  %4922 = vsinq.f32 %v3556_v36 }
 0x21c   : > { %v3639_v20 = vclz %v4654_v34  ;;  %v3948_v37 = vsel %vm3936_vm6, %v3930_v46, %v3947_v10  ;;  %v4015_v41 = vadd.s32 1, %v4674_v7  ;;  %v3938_v15 = vsel %vm3934_vm5, %v3918_v4, %v3921_v9 }
 0x21d   : > { %v3940_v40 = vsel %vm3936_vm6, %v3924_v26, %v3939_v49  ;;  %v3949_v38 = vsel %vm3935_vm7, %v3946_v13, %v3948_v37  ;;  %v3945_v5 = vsel %vm3935_vm7, %v3942_v8, %v3944_v47  ;;  %v3767_v21 = vadd.s32 3, %v3557_v53 }
 0x21e   : > { %v4655_v61 = vadd.s32 4294967294, %v3639_v20  ;;  %v7006_v16 = vmul.u32.u64.low %v6987_v43, %v3949_v38  ;;  %v7007_v59 = vmul.u32.u64.high %v6987_v43, %v3949_v38, %v7006_v16  ;;  %v3941_v11 = vsel %vm3935_vm7, %v3938_v15, %v3940_v40 }
 0x21f   : > { %vm4016_vm13 = vcmp.gt.s32.totalorder %v4015_v41, 0  ;;  %v7010_v60 = vand.u32 3, %v3557_v53  ;;  %v4013_v51 = vor.u32 8388608, %v4012_v58  ;;  %v3658_v23 = vsel %vm3573_vm8, %v3657_v31, %v6952_v14 }
 0x220   : > { %vm4656_vm3 = vcmp.lt.s32.totalorder %v4655_v61, 0  ;;  %vm7024_vm4 = vcmp.le.f32.partialorder %v3571_v30, 0.7853982  ;;  %v7028_v53 = vand.u32 3, %v3767_v21  ;;  %v3957_v1 = vmul.u32 %v6987_v43, %v3941_v11 }
 0x221   : > { %v3642_v27 = vsel %vm4656_vm3, 0, %v4655_v61  ;;  %v4017_v36 = vsel %vm4016_vm13, %v4015_v41, 0  ;;  %vm3566_vm14 = vcmp.eq.s32.totalorder %v7010_v60, 2  ;;  %v3660_v30 = vsel %vm7024_vm4, 0, %v3658_v23 }
 0x222   : > { %v3643_v56 = vsub.s32 32, %v3642_v27  ;;  %v3644_v18 = vshll.u32 %v6968_v17, %v3642_v27  ;;  %v3647_v33 = vsub.s32 4294967266, %v3642_v27  ;;  %v7017_v19 = vpop.eup %4920  ;;  %v4019_v28 = vand.u32 31, %v4017_v36 }
 0x223   : > { %v7013_v54 = vmul.u32.u64.low %v6987_v43, %v3945_v5  ;;  %v7014_v17 = vmul.u32.u64.high %v6987_v43, %v3945_v5, %v7013_v54  ;;  %v3567_v14 = vxor.u32 2147483648, %v7017_v19  ;;  %v7038_v26 = vshll.u32 %v4013_v51, 8 }
 0x224   : > { %v3645_v57 = vshrl.u32 %v3627_v29, %v3643_v56  ;;  %v3648_v35 = vadd.s32 127, %v3647_v33  ;;  %v7040_v9 = vshrl.u32 %v4017_v36, 5  ;;  %v4020_v24 = vsub.s32 32, %v4019_v28 }
 0x225   : > { %vm3959_vm12 = vc.u32 %v7007_v59, %v7013_v54  ;;  %v3960_v34 = vadd.s32 1, %v7014_v17  ;;  %v4923_v48 = vpop.eup %4922  ;;  %v4022_v20 = vshll.u32 %v5075_v50, %v4019_v28  ;;  %vm3563_vm9 = vcmp.eq.s32.totalorder %v7010_v60, 0 }
 0x226   : > { %v3646_v12 = vor.u32 %v3645_v57, %v3644_v18  ;;  %v3649_v6 = vshll.u32 %v3648_v35, 23  ;;  %vm3773_vm0 = vcmp.eq.s32.totalorder %v7028_v53, 2  ;;  %v4025_v4 = vshll.u32 %v5076_v52, %v4019_v28 }
 0x227   : > { %v3961_v7 = vsel %vm3959_vm12, %v3960_v34, %v7014_v17  ;;  %v4028_v43 = vshll.u32 %v5077_v55, %v4019_v28  ;;  %v4031_v58 = vshll.u32 %v5073_v42, %v4019_v28  ;;  %vm3770_vm10 = vcmp.eq.s32.totalorder %v7028_v53, 0 }
 0x228   : > { %v3650_v29 = vor.u32 4788187, %v3649_v6  ;;  %v3653_v32 = vcvt.s32.f32 %v3646_v12  ;;  %v3962_v49 = vadd.s32 %v3961_v7, %v3957_v1  ;;  %v4023_v44 = vshrl.u32 %v5076_v52, %v4020_v24 }
 0x229   : > { %v4034_v13 = vshll.u32 %v7274_v45, %v4019_v28  ;;  %v4026_v31 = vshrl.u32 %v5077_v55, %v4020_v24  ;;  %v4029_v8 = vshrl.u32 %v5073_v42, %v4020_v24  ;;  %v4032_v47 = vshrl.u32 %v7274_v45, %v4020_v24 }
 0x22a   : > { %v3651_v46 = vand.u32 2147483647, %v3650_v29  ;;  %v4035_v10 = vshrl.u32 %v7275_v25, %v4020_v24  ;;  %v3564_v37 = vxor.u32 2147483648, %v4923_v48  ;;  %v3963_v27 = vadd.s32 536870912, %v3962_v49 }
 0x22b   : > { %v4024_v15 = vor.u32 %v4023_v44, %v4022_v20  ;;  %vm3562_vm11 = vcmp.lt.s32.totalorder %v7010_v60, 2  ;;  %vm3769_vm2 = vcmp.lt.s32.totalorder %v7028_v53, 2  ;;  %v4021_v52 = vshrl.u32 %v5075_v50, %v4020_v24 }
 0x22c   : > { %v3654_v61 = vmul.f32 %v3653_v32, %v3651_v46  ;;  %v4027_v40 = vor.u32 %v4026_v31, %v4025_v4  ;;  %v4033_v38 = vor.u32 %v4032_v47, %v4031_v58  ;;  %vm4037_vm15 = vcmp.lt.s32.totalorder %v7040_v9, 1 }
 0x22d   : > { %v7062_v55 = vshrl.u32 %v3963_v27, 30  ;;  %v4030_v45 = vor.u32 %v4029_v8, %v4028_v43  ;;  %v4036_v25 = vor.u32 %v4035_v10, %v4034_v13  ;;  %vm4038_vm5 = vcmp.lt.s32.totalorder %v7040_v9, 2 }
 0x22e   : > { %v3655_v41 = vxor.u32 2147483648, %v3654_v61  ;;  %vm4039_vm1 = vcmp.lt.s32.totalorder %v7040_v9, 3  ;;  %vm4040_vm6 = vcmp.lt.s32.totalorder %v7040_v9, 4  ;;  %v4045_v33 = vsel %vm4037_vm15, %v4024_v15, %v4027_v40 }
 0x22f   : > { %v3965_v50 = vshll.u32 %v7062_v55, 30  ;;  %v4042_v18 = vsel %vm4040_vm6, %v4030_v45, 2102212464  ;;  %v3664_v5 = vand.u32 3, %v3660_v30  ;;  %v3871_v21 = vadd.s32 3, %v3660_v30 }
 0x230   : > { %v3656_v42 = vsel %vm3573_vm8, %v3655_v41, %v3654_v61  ;;  %v4046_v16 = vsel %vm4040_vm6, %v4033_v38, 920167782  ;;  %v3568_v57 = vsel %vm3566_vm14, %v3567_v14, %v4923_v48  ;;  %v4049_v17 = vsel %vm4037_vm15, %v4027_v40, %v4030_v45 }
 0x231   : > { %v3659_v56 = vsel %vm7024_vm4, %v6701_v39, %v3656_v42  ;;  %v7079_v35 = vsub.s32 %v3962_v49, %v3965_v50  ;;  %v4047_v11 = vsel %vm4039_vm1, %v4030_v45, %v4046_v16  ;;  %v4041_v51 = vsel %vm4037_vm15, %v4021_v52, %v4024_v15 }
 0x232   : > { %4924 = vcosq.f32 %v3659_v56  ;;  %v4043_v12 = vsel %vm4039_vm1, %v4027_v40, %v4042_v18  ;;  %v4048_v6 = vsel %vm4038_vm5, %v4045_v33, %v4047_v11  ;;  %v4050_v23 = vsel %vm4040_vm6, %v4036_v25, 1326507024 }
 0x233   : > { %4926 = vsinq.f32 %v3659_v56  ;;  %v3565_v63 = vsel %vm3563_vm9, %v7017_v19, %v3564_v37  ;;  %v3775_v1 = vsel %vm3773_vm0, %v3567_v14, %v4923_v48  ;;  %v3968_v36 = vsub.s32 0, %v7079_v35 }
 0x234   : > { %v4051_v29 = vsel %vm4039_vm1, %v4033_v38, %v4050_v23  ;;  %v3772_v32 = vsel %vm3770_vm10, %v7017_v19, %v3564_v37  ;;  %v7107_v30 = vmul.u32.u64.low %v7038_v26, %v4048_v6  ;;  %v7108_v34 = vmul.u32.u64.high %v7038_v26, %v4048_v6, %v7107_v30 }
 0x235   : > { %v4052_v28 = vsel %vm4038_vm5, %v4049_v17, %v4051_v29  ;;  %v3872_v46 = vand.u32 3, %v3871_v21  ;;  %v4671_v14 = vmin.u32 %v3968_v36, %v7079_v35  ;;  %v4044_v48 = vsel %vm4038_vm5, %v4041_v51, %v4043_v12 }
 0x236   : > { %vm3560_vm7 = vweird.f32 %v6591_v3  ;;  %vm3663_vm3 = vweird.f32 %v6701_v39  ;;  %v7117_v19 = vmul.u32.u64.low %v7038_v26, %v4052_v28  ;;  %v7118_v24 = vmul.u32.u64.high %v7038_v26, %v4052_v28, %v7117_v19 }
 0x237   : > { %v3569_v20 = vsel %vm3562_vm11, %v3565_v63, %v3568_v57  ;;  %vm3665_vm8 = vcmp.lt.s32.totalorder %v3664_v5, 2  ;;  %v3776_v7 = vsel %vm3769_vm2, %v3772_v32, %v3775_v1  ;;  %v3970_v4 = vclz %v4671_v14 }
 0x238   : > { %vm3666_vm13 = vcmp.eq.s32.totalorder %v3664_v5, 0  ;;  %vm3669_vm4 = vcmp.eq.s32.totalorder %v3664_v5, 2  ;;  %v4060_v9 = vmul.u32 %v7038_v26, %v4044_v48  ;;  %v4063_v43 = vadd.s32 1, %v7108_v34 }
 0x239   : > { %vm3873_vm12 = vcmp.lt.s32.totalorder %v3872_v46, 2  ;;  %vm3874_vm14 = vcmp.eq.s32.totalorder %v3872_v46, 0  ;;  %vm3877_vm9 = vcmp.eq.s32.totalorder %v3872_v46, 2  ;;  %v4672_v61 = vadd.s32 4294967294, %v3970_v4 }
 0x23a   : > { %v3570_v60 = vsel %vm3560_vm7, nan, %v3569_v20  ;;  %v3777_v53 = vsel %vm3560_vm7, nan, %v3776_v7  ;;  %vm4062_vm0 = vc.u32 %v7118_v24, %v7107_v30  ;;  %v3958_v26 = vadd.s32 %v7013_v54, %v7007_v59 }
 0x23b   : > { %vm4673_vm10 = vcmp.lt.s32.totalorder %v4672_v61, 0  ;;  %v4064_v31 = vsel %vm4062_vm0, %v4063_v43, %v7108_v34  ;;  %vm3904_vm11 = vcmp.lt.s32.totalorder %v6880_v2, 0  ;;  %v4061_v63 = vadd.s32 %v7107_v30, %v7118_v24 }
 0x23c   : > { %v4925_v58 = vpop.eup %4924  ;;  %v3973_v10 = vsel %vm4673_vm10, 0, %v4672_v61  ;;  %v4065_v37 = vadd.s32 %v4064_v31, %v4060_v9  ;;  %vm7154_vm15 = vcmp.le.f32.partialorder %v3902_v22, 0.7853982  ;;  %v3988_v48 = vsub.s32 4, %v7062_v55 }
 0x23d   : > { %v4927_v49 = vpop.eup %4926  ;;  %v3670_v44 = vxor.u32 2147483648, %v4925_v58  ;;  %v3974_v27 = vsub.s32 32, %v3973_v10  ;;  %v3975_v15 = vshll.u32 %v7079_v35, %v3973_v10  ;;  %v3978_v52 = vsub.s32 4294967266, %v3973_v10 }
 0x23e   : > { %v3667_v13 = vxor.u32 2147483648, %v4927_v49  ;;  %v4066_v40 = vadd.s32 536870912, %v4065_v37  ;;  %v3989_v7 = vsel %vm3904_vm11, %v3988_v48, %v7062_v55  ;;  %vm4007_vm5 = vcmp.lt.s32.totalorder %v6947_v0, 0 }
 0x23f   : > { %v3671_v8 = vsel %vm3669_vm4, %v3670_v44, %v4927_v49  ;;  %v3879_v47 = vsel %vm3877_vm9, %v3670_v44, %v4927_v49  ;;  %v3976_v45 = vshrl.u32 %v3958_v26, %v3974_v27  ;;  %v3979_v50 = vadd.s32 127, %v3978_v52 }
 0x240   : > { %v3668_v41 = vsel %vm3666_vm13, %v4925_v58, %v3667_v13  ;;  %v3876_v3 = vsel %vm3874_vm14, %v4925_v58, %v3667_v13  ;;  %v4067_v18 = vshrl.u32 %v4066_v40, 30  ;;  %v3991_v43 = vsel %vm7154_vm15, 0, %v3989_v7 }
 0x241   : > { %v3672_v59 = vsel %vm3665_vm8, %v3668_v41, %v3671_v8  ;;  %v3880_v54 = vsel %vm3873_vm12, %v3876_v3, %v3879_v47  ;;  %v3977_v33 = vor.u32 %v3976_v45, %v3975_v15  ;;  %v3980_v5 = vshll.u32 %v3979_v50, 23 }
 0x242   : > { %v3673_v38 = vsel %vm3663_vm3, nan, %v3672_v59  ;;  %v3881_v42 = vsel %vm3663_vm3, nan, %v3880_v54  ;;  %v4068_v21 = vshll.u32 %v4067_v18, 30  ;;  %v4091_v9 = vsub.s32 4, %v4067_v18 }
 0x243   : > { %v3884_v25 = vcombine.low %v3570_v60, %v3673_v38  ;;  %v3892_v56 = vcombine.low %v3777_v53, %v3881_v42  ;;  %v3981_v16 = vor.u32 4788187, %v3980_v5  ;;  %v3984_v57 = vcvt.s32.f32 %v3977_v33 }
 0x244   : > { %v4069_v35 = vsub.s32 %v4065_v37, %v4068_v21  ;;  %vm4006_vm1 = vcmp.le.f32.partialorder %v4005_v62, 0.7853982  ;;  %v4092_v49 = vsel %vm4007_vm5, %v4091_v9, %v4067_v18  ;;  %v4201_v60 = vadd.s32 3, %v3991_v43 }
 0x245   : > { %4665 = vst [vmem:[%s5570_s11 + $0x80] sm:$0xff] %v3884_v25  ;;  %4666 = vst [vmem:[%s5570_s11 + $0x88] sm:$0xff] %v3884_v25  ;;  %v3982_v11 = vand.u32 2147483647, %v3981_v16  ;;  %v4094_v13 = vsel %vm4006_vm1, 0, %v4092_v49  ;;  %v3995_v31 = vand.u32 3, %v3991_v43  ;;  %vm3994_vm12 = vweird.f32 %v6880_v2 }
 0x246   : > { %4667 = vst [vmem:[%s5570_s11 + $0x120] sm:$0xff] %v3892_v56  ;;  %4668 = vst [vmem:[%s5570_s11 + $0x128] sm:$0xff] %v3892_v56  ;;  %v4071_v17 = vsub.s32 0, %v4069_v35  ;;  %v4202_v8 = vand.u32 3, %v4201_v60  ;;  %v4305_v47 = vadd.s32 3, %v4094_v13  ;;  %v4098_v62 = vand.u32 3, %v4094_v13 }
 0x247   : > { %v3985_v51 = vmul.f32 %v3984_v57, %v3982_v11  ;;  %vm3997_vm6 = vcmp.eq.s32.totalorder %v3995_v31, 0  ;;  %vm4000_vm7 = vcmp.eq.s32.totalorder %v3995_v31, 2  ;;  %vm3996_vm13 = vcmp.lt.s32.totalorder %v3995_v31, 2 }
 0x248   : > { %v4675_v39 = vmin.u32 %v4071_v17, %v4069_v35  ;;  %vm4204_vm3 = vcmp.eq.s32.totalorder %v4202_v8, 0  ;;  %vm4207_vm8 = vcmp.eq.s32.totalorder %v4202_v8, 2  ;;  %v4306_v41 = vand.u32 3, %v4305_v47 }
 0x249   : > { %v3986_v6 = vxor.u32 2147483648, %v3985_v51  ;;  %vm4203_vm4 = vcmp.lt.s32.totalorder %v4202_v8, 2  ;;  %vm4100_vm14 = vcmp.eq.s32.totalorder %v4098_v62, 0  ;;  %vm4103_vm9 = vcmp.eq.s32.totalorder %v4098_v62, 2 }
 0x24a   : > { %v4073_v12 = vclz %v4675_v39  ;;  %vm4311_vm0 = vcmp.eq.s32.totalorder %v4306_v41, 2  ;;  %vm4308_vm10 = vcmp.eq.s32.totalorder %v4306_v41, 0 }
 0x24b   : > { %v3987_v29 = vsel %vm3904_vm11, %v3986_v6, %v3985_v51  ;;  %vm4099_vm11 = vcmp.lt.s32.totalorder %v4098_v62, 2 }
 0x24c   : > { %v4676_v23 = vadd.s32 4294967294, %v4073_v12  ;;  %v3990_v30 = vsel %vm7154_vm15, %v6880_v2, %v3987_v29  ;;  %vm4097_vm15 = vweird.f32 %v6947_v0 }
 0x24d   : > { %4928 = vcosq.f32 %v3990_v30 }
 0x24e   : > { %vm4677_vm2 = vcmp.lt.s32.totalorder %v4676_v23, 0  ;;  %4930 = vsinq.f32 %v3990_v30 }
 0x24f   : > { %v4076_v36 = vsel %vm4677_vm2, 0, %v4676_v23  ;;  %vm4307_vm2 = vcmp.lt.s32.totalorder %v4306_v41, 2 }
 0x250   : > { %v4077_v32 = vsub.s32 32, %v4076_v36  ;;  %v4078_v28 = vshll.u32 %v4069_v35, %v4076_v36  ;;  %v4081_v34 = vsub.s32 4294967266, %v4076_v36 }
 0x252   : > { %v4079_v46 = vshrl.u32 %v4061_v63, %v4077_v32  ;;  %v4082_v14 = vadd.s32 127, %v4081_v34 }
 0x254   : > { %v4080_v19 = vor.u32 %v4079_v46, %v4078_v28  ;;  %v4083_v22 = vshll.u32 %v4082_v14, 23 }
 0x256   : > { %v4084_v24 = vor.u32 4788187, %v4083_v22  ;;  %v4087_v20 = vcvt.s32.f32 %v4080_v19 }
 0x257   : > { %v4929_v55 = vpop.eup %4928 }
 0x258   : > { %v4085_v4 = vand.u32 2147483647, %v4084_v24  ;;  %v4931_v26 = vpop.eup %4930  ;;  %v4001_v37 = vxor.u32 2147483648, %v4929_v55 }
 0x259   : > { %v3998_v10 = vxor.u32 2147483648, %v4931_v26 }
 0x25a   : > { %v4088_v58 = vmul.f32 %v4087_v20, %v4085_v4  ;;  %v4002_v27 = vsel %vm4000_vm7, %v4001_v37, %v4931_v26  ;;  %v4209_v59 = vsel %vm4207_vm8, %v4001_v37, %v4931_v26 }
 0x25b   : > { %v3999_v3 = vsel %vm3997_vm6, %v4929_v55, %v3998_v10  ;;  %v4206_v15 = vsel %vm4204_vm3, %v4929_v55, %v3998_v10 }
 0x25c   : > { %v4089_v61 = vxor.u32 2147483648, %v4088_v58  ;;  %v4003_v40 = vsel %vm3996_vm13, %v3999_v3, %v4002_v27  ;;  %v4210_v42 = vsel %vm4203_vm4, %v4206_v15, %v4209_v59 }
 0x25d   : > { %v4004_v50 = vsel %vm3994_vm12, nan, %v4003_v40  ;;  %v4211_v33 = vsel %vm3994_vm12, nan, %v4210_v42 }
 0x25e   : > { %v4090_v44 = vsel %vm4007_vm5, %v4089_v61, %v4088_v58 }
 0x25f   : > { %v4093_v53 = vsel %vm4006_vm1, %v6947_v0, %v4090_v44 }
 0x260   : > { %4932 = vcosq.f32 %v4093_v53 }
 0x261   : > { %4934 = vsinq.f32 %v4093_v53 }
 0x26a   : > { %v4933_v54 = vpop.eup %4932 }
 0x26b   : > { %v4935_v52 = vpop.eup %4934  ;;  %v4104_v38 = vxor.u32 2147483648, %v4933_v54 }
 0x26c   : > { %v4101_v45 = vxor.u32 2147483648, %v4935_v52 }
 0x26d   : > { %v4105_v25 = vsel %vm4103_vm9, %v4104_v38, %v4935_v52  ;;  %v4313_v56 = vsel %vm4311_vm0, %v4104_v38, %v4935_v52 }
 0x26e   : > { %v4102_v18 = vsel %vm4100_vm14, %v4933_v54, %v4101_v45  ;;  %v4310_v5 = vsel %vm4308_vm10, %v4933_v54, %v4101_v45 }
 0x26f   : > { %v4106_v21 = vsel %vm4099_vm11, %v4102_v18, %v4105_v25  ;;  %v4314_v0 = vsel %vm4307_vm2, %v4310_v5, %v4313_v56 }
 0x270   : > { %v4107_v16 = vsel %vm4097_vm15, nan, %v4106_v21  ;;  %v4315_v57 = vsel %vm4097_vm15, nan, %v4314_v0 }
 0x271   : > { %v4318_v35 = vcombine.low %v4004_v50, %v4107_v16  ;;  %v4326_v11 = vcombine.low %v4211_v33, %v4315_v57 }
 0x273   : > { %4686 = vst [vmem:[%s5570_s11 + $0x90] sm:$0xff] %v4318_v35  ;;  %4687 = vst [vmem:[%s5570_s11 + $0x98] sm:$0xff] %v4318_v35 }
 0x274   : > { %4688 = vst [vmem:[%s5570_s11 + $0x130] sm:$0xff] %v4326_v11  ;;  %4689 = vst [vmem:[%s5570_s11 + $0x138] sm:$0xff] %v4326_v11 }
 0x275   : > { %4994 = shalt.err (!%p4991_p7)
}
 0x276   : > { %s4995_s13 = scalar_lea.hbm %s7185_s16, 5120  ;;  %s4999_s27 = scalar_lea.hbm %s7247_s6, 10240 }
 0x277   : > { %p4996_p9 = scmp.ne.s32.totalorder %s7185_s16, %s4995_s13  ;;  %p5000_p4 = scmp.lt.u32.totalorder %s7185_s16, %s7247_s6 }
 0x278   : > { %p5001_p10 = scmp.lt.u32.totalorder %s4999_s27, %s4995_s13  ;;  %p5003_p13 = scmp.lt.u32.totalorder %s4995_s13, %s7185_s16 }
 0x279   : > { %p4997_p8 = pnand %p4996_p9, %p7310_p1 }
 0x27a   : > { %p5002_p11 = por %p5001_p10, %p5000_p4 }
 0x27b   : > { %p4998_p12 = pneg %p4997_p8 }
 0x27c   : > { %p5004_p0 = por %p5003_p13, %p5002_p11 }
 0x27e   : > { %p5005_p2 = pnand %p5004_p0, %p4998_p12 }
 0x280   : > { %5008 = shalt.err (!%p5005_p2)
}
 0x281   : > { %s5081_s24 = smov 128   ;;  %s5082_s14 = smov 8  }
 0x282   : > { %4779 = dma.vmem_to_hbm [thread:$0]  (%p7310_p1), %s7187_s8, 5120, %s7185_s16, %s7195_s15, %s5081_s24, %s5081_s24, %s5082_s14  }
 0x283 PF: > { %p4801_p3 = scmp.ge.s32.totalorder %s5067_s26, 2  ;;  %s4365_s17 = sand.u32 1, %s5047_s21  }
 0x284   : > { %p7311_p5 = scmp.ne.s32.totalorder %s7262_s9, 0  ;;  %s4366_s18 = scalar_lea.sflag [#allocation3], %s4365_s17 }
 0x286   : > { %p4792_p6 = pnand %p4801_p3, %p7311_p5 }
 0x288   : > { %5042 = dma.done.wait (!%p4792_p6), %s4366_s18, 5120  }
 0x289   : > { %5044 = vsyncadd (!%p4792_p6), %s4366_s18, 4294962176  ;;  %s21_s26 = sadd.s32 1, %s5067_s26   ;;  %s7312_s21 = smov %s5051_s22 }
 0x28a   : > { %p18_p7 = scmp.ge.s32.totalorder %s21_s26, 4   ;;  %s7313_s22 = smov %s5055_s23 }
 0x28b   : > { %s7314_s23 = smov %s5171_s10  ;;  %s7315_s24 = smov %s5063_s25 }
 0x28c   : > { %s7316_s25 = smov %s7318_s29  ;;  %20 = sbr.rel (!%p18_p7) target bundleno = 6 (0x6), region = 137 }
 0x293   :  { %4371 = vsyncpa [#allocation3], 1 }
 0x294   :  { %4373 = vsyncpa [#allocation3 + $0x1], 1 }
 0x295   :  { %4374 = vsyncpa [#allocation4], 1 }
 0x296   :  { %4376 = vsyncpa [#allocation4 + $0x1], 1 }
 0x297   :  { %4377 = vsyncpa [#allocation6], 1 }

</bundles_post_ra>
